<compile_context>
chip_gen: v7x
topology: tpu7x:2x2x1
jax: 0.10.0
libtpu: 0.0.40
codegen_flags: <defaults>
</compile_context>

<pallas_src>
import math

import jax
import jax.numpy as jnp
from jax.experimental import pallas as pl
from jax.experimental.pallas import tpu as pltpu


# --------------------------------------------------------------------------- #
# Kernel
# --------------------------------------------------------------------------- #
def make_decoder_kernel(heads, d_head):
    scale = 1.0 / math.sqrt(d_head)
    bf16 = jnp.bfloat16

    def _layer_norm(x, gamma, beta, eps=1e-5):
        mu = jnp.mean(x, axis=-1, keepdims=True)
        var = jnp.mean((x - mu) ** 2, axis=-1, keepdims=True)
        return (x - mu) * jax.lax.rsqrt(var + eps) * gamma + beta

    def kernel(x_ref, mem_ref, tgt_mask_ref, src_mask_ref,
               s_wq, s_bq, s_wk, s_bk, s_wv, s_bv, s_wo, s_bo,
               c_wq, c_bq, c_wk, c_bk, c_wv, c_bv, c_wo, c_bo,
               f_w1, f_b1, f_w2, f_b2,
               ln1_g, ln1_b, ln2_g, ln2_b, ln3_g, ln3_b,
               lnf_g, lnf_b,
               out_ref, x_scr):
        l = pl.program_id(1)

        # Activation carried across the layer grid axis in a VMEM scratch buffer.
        @pl.when(l == 0)
        def _():
            x_scr[...] = x_ref[0]

        x = x_scr[...]                          # (L_pred, D), f32 residual stream
        mem_b = mem_ref[0].astype(bf16)         # (L_mem, D), bf16 matmul operand

        # Hoisted boolean masks (loop-invariant across heads / sublayers).
        tgt_mask = tgt_mask_ref[0] > 0.5        # (L_pred, L_pred)
        src_mask = src_mask_ref[0] > 0.5        # (L_pred, L_mem)

        def mha(q_bf, k_bf, v_bf, mask, wq, bq, wk, bk, wv, bv, wo, bo):
            # q_bf: (Lq, D) bf16; k_bf/v_bf: (Lk, D) bf16
            # wq/wk/wv refs: (1, heads, D, d_head) bf16; biases f32
            # wo ref:        (1, heads, d_head, D) bf16; bo: (1, 1, D) f32
            Lq = q_bf.shape[0]
            D = wo.shape[-1]
            out = jnp.zeros((Lq, D), jnp.float32)
            for h in range(heads):              # leading-axis weight indexing only
                qh = jnp.dot(q_bf, wq[0, h],
                             preferred_element_type=jnp.float32) + bq[0, h]
                kh = jnp.dot(k_bf, wk[0, h],
                             preferred_element_type=jnp.float32) + bk[0, h]
                vh = jnp.dot(v_bf, wv[0, h],
                             preferred_element_type=jnp.float32) + bv[0, h]
                # scores = qh @ kh.T (trans_b dot_general), bf16 operands, f32 acc.
                s = jax.lax.dot_general(
                    qh.astype(bf16), kh.astype(bf16),
                    (((1,), (1,)), ((), ())),
                    preferred_element_type=jnp.float32) * scale
                # PyTorch: scores.masked_fill(mask.logical_not(), 1e-09)
                # (value fill, NOT -inf) -- reproduced faithfully.
                s = jnp.where(mask, s, jnp.float32(1e-9))
                s = s - jnp.max(s, axis=-1, keepdims=True)
                e = jnp.exp(s)
                # exact reciprocal keeps the 2e-3 check tight; approx=True would
                # move it fully onto the EUP at ~2^-12 relative error.
                inv = pl.reciprocal(jnp.sum(e, axis=-1, keepdims=True), approx=False)
                attn = e * inv
                ctx = jnp.dot(attn.astype(bf16), vh.astype(bf16),
                              preferred_element_type=jnp.float32)
                # Fold the output projection per head: no concat, no lane slicing.
                out = out + jnp.dot(ctx.astype(bf16), wo[0, h],
                                    preferred_element_type=jnp.float32)
            return out + bo[0]

        # --- sublayer 0: self-attention (SublayerConnection: pre-LN + residual) ---
        xn = _layer_norm(x, ln1_g[0], ln1_b[0]).astype(bf16)
        x = x + mha(xn, xn, xn, tgt_mask,
                    s_wq, s_bq, s_wk, s_bk, s_wv, s_bv, s_wo, s_bo)

        # --- sublayer 1: encoder-decoder attention ---
        xn = _layer_norm(x, ln2_g[0], ln2_b[0]).astype(bf16)
        x = x + mha(xn, mem_b, mem_b, src_mask,
                    c_wq, c_bq, c_wk, c_bk, c_wv, c_bv, c_wo, c_bo)

        # --- sublayer 2: position-wise feed-forward ---
        xn = _layer_norm(x, ln3_g[0], ln3_b[0]).astype(bf16)
        h1 = jnp.maximum(
            jnp.dot(xn, f_w1[0], preferred_element_type=jnp.float32) + f_b1[0], 0.0)
        x = x + jnp.dot(h1.astype(bf16), f_w2[0],
                        preferred_element_type=jnp.float32) + f_b2[0]
        # TODO(synk): nn.Dropout inside SublayerConnection is identity (inference/eval).

        x_scr[...] = x

        @pl.when(l == pl.num_programs(1) - 1)
        def _():
            out_ref[0] = _layer_norm(x, lnf_g[...], lnf_b[...])

    return kernel


PARAM_ORDER = [
    "s_wq", "s_bq", "s_wk", "s_bk", "s_wv", "s_bv", "s_wo", "s_bo",
    "c_wq", "c_bq", "c_wk", "c_bk", "c_wv", "c_bv", "c_wo", "c_bo",
    "f_w1", "f_b1", "f_w2", "f_b2",
    "ln1_g", "ln1_b", "ln2_g", "ln2_b", "ln3_g", "ln3_b",
    "lnf_g", "lnf_b",
]


# --------------------------------------------------------------------------- #
# Wrapper
# --------------------------------------------------------------------------- #
def transformer_decoder(predictions, predictions_mask, memory, memory_mask, params,
                        *, num_layers, heads):
    N, L_pred, D = predictions.shape
    L_mem = memory.shape[1]
    d_head = D // heads

    kernel = make_decoder_kernel(heads, d_head)

    tgt_mask = predictions_mask.astype(jnp.float32)   # (1, L_pred, L_pred)
    src_mask = memory_mask.astype(jnp.float32)        # (1, L_pred, L_mem)

    param_list = [params[k] for k in PARAM_ORDER]

    def layer_spec(arr):
        nd = arr.ndim
        return pl.BlockSpec((1,) + arr.shape[1:],
                            lambda b, l, _nd=nd: (l,) + (0,) * (_nd - 1))

    def const_spec(arr):
        nd = arr.ndim
        return pl.BlockSpec(arr.shape, lambda b, l, _nd=nd: (0,) * _nd)

    in_specs = [
        pl.BlockSpec((1, L_pred, D), lambda b, l: (b, 0, 0)),   # predictions
        pl.BlockSpec((1, L_mem, D), lambda b, l: (b, 0, 0)),    # memory
        const_spec(tgt_mask),
        const_spec(src_mask),
    ]
    for name, arr in zip(PARAM_ORDER, param_list):
        in_specs.append(const_spec(arr) if name.startswith("lnf") else layer_spec(arr))

    # VMEM budget: per-grid-step blocks (double-buffered by the pipeline) + scratch
    # + headroom, clamped to stay well under v7x's 64 MiB physical VMEM.
    def _bytes(shape, dtype):
        n = 1
        for s in shape:
            n *= int(s)
        return n * jnp.dtype(dtype).itemsize

    per_step = (_bytes((1, L_pred, D), predictions.dtype)
                + _bytes((1, L_mem, D), memory.dtype)
                + _bytes(tgt_mask.shape, tgt_mask.dtype)
                + _bytes(src_mask.shape, src_mask.dtype)
                + _bytes((1, L_pred, D), jnp.float32)     # output block
                + _bytes((L_pred, D), jnp.float32))       # activation scratch
    for name, arr in zip(PARAM_ORDER, param_list):
        blk = arr.shape if name.startswith("lnf") else (1,) + arr.shape[1:]
        per_step += _bytes(blk, arr.dtype)
    vmem_limit = int(min(60 * 2**20, max(32 * 2**20, 3 * per_step)))

    out = pl.pallas_call(
        kernel,
        out_shape=jax.ShapeDtypeStruct((N, L_pred, D), jnp.float32),
        grid=(N, num_layers),
        in_specs=in_specs,
        out_specs=pl.BlockSpec((1, L_pred, D), lambda b, l: (b, 0, 0)),
        scratch_shapes=[pltpu.VMEM((L_pred, D), jnp.float32)],
        compiler_params=pltpu.CompilerParams(
            dimension_semantics=("parallel", "arbitrary"),
            vmem_limit_bytes=vmem_limit),
    )(predictions, memory, tgt_mask, src_mask, *param_list)
    return out


# --------------------------------------------------------------------------- #
# Deterministic parameter init (xavier weights in bf16, small random biases,
# LayerNorm gamma ~ 1, beta ~ 0).  Q/K/V weights: (L, heads, D, d_head);
# output projection: (L, heads, d_head, D).
# --------------------------------------------------------------------------- #
def init_params(key, num_layers, d_model, d_ff, heads):
    d_head = d_model // heads

    def xavier(k, shape, fan_in, fan_out):
        limit = math.sqrt(6.0 / (fan_in + fan_out))
        return jax.random.uniform(k, shape, jnp.float32, -limit, limit)

    def small(k, shape):
        return jax.random.uniform(k, shape, jnp.float32, -0.05, 0.05)

    keys = iter(jax.random.split(key, 64))
    p = {}
    for prefix in ("s", "c"):  # self-attn / cross-attn
        for name in ("wq", "wk", "wv"):
            w = xavier(next(keys), (num_layers, d_model, d_model), d_model, d_model)
            p[f"{prefix}_{name}"] = (w.reshape(num_layers, d_model, heads, d_head)
                                      .transpose(0, 2, 1, 3).astype(jnp.bfloat16))
        for name in ("bq", "bk", "bv"):
            p[f"{prefix}_{name}"] = small(next(keys), (num_layers, heads, 1, d_head))
        wo = xavier(next(keys), (num_layers, d_model, d_model), d_model, d_model)
        p[f"{prefix}_wo"] = wo.reshape(num_layers, heads, d_head, d_model).astype(jnp.bfloat16)
        p[f"{prefix}_bo"] = small(next(keys), (num_layers, 1, d_model))
    p["f_w1"] = xavier(next(keys), (num_layers, d_model, d_ff), d_model, d_ff).astype(jnp.bfloat16)
    p["f_b1"] = small(next(keys), (num_layers, 1, d_ff))
    p["f_w2"] = xavier(next(keys), (num_layers, d_ff, d_model), d_ff, d_model).astype(jnp.bfloat16)
    p["f_b2"] = small(next(keys), (num_layers, 1, d_model))
    for i in (1, 2, 3):
        p[f"ln{i}_g"] = 1.0 + small(next(keys), (num_layers, 1, d_model))
        p[f"ln{i}_b"] = small(next(keys), (num_layers, 1, d_model))
    p["lnf_g"] = 1.0 + small(next(keys), (1, d_model))
    p["lnf_b"] = small(next(keys), (1, d_model))
    return p


# --------------------------------------------------------------------------- #
# Pure-JAX reference (mirrors the PyTorch module, same bf16 operand casts with
# f32 accumulation) for a correctness check.
# --------------------------------------------------------------------------- #
def reference_decoder(predictions, predictions_mask, memory, memory_mask, params,
                      *, num_layers, heads):
    D = predictions.shape[-1]
    d_head = D // heads
    scale = 1.0 / math.sqrt(d_head)
    bf = jnp.bfloat16

    def ln(x, g, b, eps=1e-5):
        mu = x.mean(-1, keepdims=True)
        var = ((x - mu) ** 2).mean(-1, keepdims=True)
        return (x - mu) * jax.lax.rsqrt(var + eps) * g + b

    def mha(q_in, k_in, v_in, mask, wq, bq, wk, bk, wv, bv, wo, bo):
        q = jnp.einsum('nqD,hDd->nhqd', q_in.astype(bf), wq,
                       preferred_element_type=jnp.float32) + bq[None]
        k = jnp.einsum('nkD,hDd->nhkd', k_in.astype(bf), wk,
                       preferred_element_type=jnp.float32) + bk[None]
        v = jnp.einsum('nkD,hDd->nhkd', v_in.astype(bf), wv,
                       preferred_element_type=jnp.float32) + bv[None]
        s = jnp.einsum('nhqd,nhkd->nhqk', q.astype(bf), k.astype(bf),
                       preferred_element_type=jnp.float32) * scale
        s = jnp.where(mask[:, None], s, jnp.float32(1e-9))
        s = s - s.max(-1, keepdims=True)
        e = jnp.exp(s)
        attn = e / e.sum(-1, keepdims=True)
        ctx = jnp.einsum('nhqk,nhkd->nhqd', attn.astype(bf), v.astype(bf),
                         preferred_element_type=jnp.float32)
        out = jnp.einsum('nhqd,hdD->nqD', ctx.astype(bf), wo,
                         preferred_element_type=jnp.float32)
        return out + bo[None]

    def ffn(xn, w1, b1, w2, b2):
        h = jnp.maximum(jnp.einsum('nqD,DF->nqF', xn.astype(bf), w1,
                                   preferred_element_type=jnp.float32) + b1, 0.0)
        return jnp.einsum('nqF,FD->nqD', h.astype(bf), w2,
                          preferred_element_type=jnp.float32) + b2

    x = predictions
    for l in range(num_layers):
        xn = ln(x, params["ln1_g"][l], params["ln1_b"][l])
        x = x + mha(xn, xn, xn, predictions_mask,
                    params["s_wq"][l], params["s_bq"][l], params["s_wk"][l], params["s_bk"][l],
                    params["s_wv"][l], params["s_bv"][l], params["s_wo"][l], params["s_bo"][l])
        xn = ln(x, params["ln2_g"][l], params["ln2_b"][l])
        x = x + mha(xn, memory, memory, memory_mask,
                    params["c_wq"][l], params["c_bq"][l], params["c_wk"][l], params["c_bk"][l],
                    params["c_wv"][l], params["c_bv"][l], params["c_wo"][l], params["c_bo"][l])
        xn = ln(x, params["ln3_g"][l], params["ln3_b"][l])
        x = x + ffn(xn, params["f_w1"][l], params["f_b1"][l],
                    params["f_w2"][l], params["f_b2"][l])
    return ln(x, params["lnf_g"], params["lnf_b"])


# --------------------------------------------------------------------------- #
if __name__ == "__main__":
    N, L_pred, L_mem = 2, 8, 16
    d_model, heads, d_ff, num_layers = 128, 4, 256, 2   # lane-dense feature dim

    key = jax.random.PRNGKey(0)
    k1, k2, kp = jax.random.split(key, 3)
    predictions = jax.random.normal(k1, (N, L_pred, d_model), jnp.float32)
    memory = jax.random.normal(k2, (N, L_mem, d_model), jnp.float32)
    # shapes match the module's asserts: (1, L_pred, L_pred) and (1, L_pred, L_mem)
    predictions_mask = jnp.tril(jnp.ones((L_pred, L_pred), bool))[None]
    memory_mask = jnp.ones((1, L_pred, L_mem), bool)

    params = init_params(kp, num_layers, d_model, d_ff, heads)

    out = transformer_decoder(predictions, predictions_mask, memory, memory_mask,
                              params, num_layers=num_layers, heads=heads)
    out = jax.block_until_ready(out)

    ref = reference_decoder(predictions, predictions_mask, memory, memory_mask,
                            params, num_layers=num_layers, heads=heads)
    assert out.shape == (N, L_pred, d_model)
    err = float(jnp.max(jnp.abs(out - ref)))
    assert jnp.allclose(out, ref, atol=2e-3, rtol=2e-3), err
    print("KERNEL_OK")
</pallas_src>

<mosaic_0001>
module attributes {stable_mosaic.version = 11 : i64} {
  func.func @kernel(%arg0: i32, %arg1: i32, %arg2: memref<1x8x128xf32, #tpu.memory_space<vmem>>, %arg3: memref<1x16x128xf32, #tpu.memory_space<vmem>>, %arg4: memref<1x8x8xf32, #tpu.memory_space<vmem>>, %arg5: memref<1x8x16xf32, #tpu.memory_space<vmem>>, %arg6: memref<1x4x128x32xbf16, #tpu.memory_space<vmem>>, %arg7: memref<1x4x1x32xf32, #tpu.memory_space<vmem>>, %arg8: memref<1x4x128x32xbf16, #tpu.memory_space<vmem>>, %arg9: memref<1x4x1x32xf32, #tpu.memory_space<vmem>>, %arg10: memref<1x4x128x32xbf16, #tpu.memory_space<vmem>>, %arg11: memref<1x4x1x32xf32, #tpu.memory_space<vmem>>, %arg12: memref<1x4x32x128xbf16, #tpu.memory_space<vmem>>, %arg13: memref<1x1x128xf32, #tpu.memory_space<vmem>>, %arg14: memref<1x4x128x32xbf16, #tpu.memory_space<vmem>>, %arg15: memref<1x4x1x32xf32, #tpu.memory_space<vmem>>, %arg16: memref<1x4x128x32xbf16, #tpu.memory_space<vmem>>, %arg17: memref<1x4x1x32xf32, #tpu.memory_space<vmem>>, %arg18: memref<1x4x128x32xbf16, #tpu.memory_space<vmem>>, %arg19: memref<1x4x1x32xf32, #tpu.memory_space<vmem>>, %arg20: memref<1x4x32x128xbf16, #tpu.memory_space<vmem>>, %arg21: memref<1x1x128xf32, #tpu.memory_space<vmem>>, %arg22: memref<1x128x256xbf16, #tpu.memory_space<vmem>>, %arg23: memref<1x1x256xf32, #tpu.memory_space<vmem>>, %arg24: memref<1x256x128xbf16, #tpu.memory_space<vmem>>, %arg25: memref<1x1x128xf32, #tpu.memory_space<vmem>>, %arg26: memref<1x1x128xf32, #tpu.memory_space<vmem>>, %arg27: memref<1x1x128xf32, #tpu.memory_space<vmem>>, %arg28: memref<1x1x128xf32, #tpu.memory_space<vmem>>, %arg29: memref<1x1x128xf32, #tpu.memory_space<vmem>>, %arg30: memref<1x1x128xf32, #tpu.memory_space<vmem>>, %arg31: memref<1x1x128xf32, #tpu.memory_space<vmem>>, %arg32: memref<1x128xf32, #tpu.memory_space<vmem>>, %arg33: memref<1x128xf32, #tpu.memory_space<vmem>>, %arg34: memref<1x8x128xf32, #tpu.memory_space<vmem>>, %arg35: memref<8x128xf32, #tpu.memory_space<vmem>>) attributes {dimension_semantics = [#tpu.dimension_semantics<parallel>, #tpu.dimension_semantics<arbitrary>], iteration_bounds = array<i64: 2, 2>, scalar_prefetch = 0 : i64, scratch_operands = 1 : i64, tpu.core_type = #tpu.core_type<tc>, window_params = [{transform_indices = @transform_0, window_bounds = array<i64: 1, 8, 128>}, {transform_indices = @transform_1, window_bounds = array<i64: 1, 16, 128>}, {pipeline_mode = #tpu.pipeline_mode<synchronous>, transform_indices = @transform_2, window_bounds = array<i64: 1, 8, 8>}, {pipeline_mode = #tpu.pipeline_mode<synchronous>, transform_indices = @transform_3, window_bounds = array<i64: 1, 8, 16>}, {transform_indices = @transform_4, window_bounds = array<i64: 1, 4, 128, 32>}, {transform_indices = @transform_5, window_bounds = array<i64: 1, 4, 1, 32>}, {transform_indices = @transform_6, window_bounds = array<i64: 1, 4, 128, 32>}, {transform_indices = @transform_7, window_bounds = array<i64: 1, 4, 1, 32>}, {transform_indices = @transform_8, window_bounds = array<i64: 1, 4, 128, 32>}, {transform_indices = @transform_9, window_bounds = array<i64: 1, 4, 1, 32>}, {transform_indices = @transform_10, window_bounds = array<i64: 1, 4, 32, 128>}, {transform_indices = @transform_11, window_bounds = array<i64: 1, 1, 128>}, {transform_indices = @transform_12, window_bounds = array<i64: 1, 4, 128, 32>}, {transform_indices = @transform_13, window_bounds = array<i64: 1, 4, 1, 32>}, {transform_indices = @transform_14, window_bounds = array<i64: 1, 4, 128, 32>}, {transform_indices = @transform_15, window_bounds = array<i64: 1, 4, 1, 32>}, {transform_indices = @transform_16, window_bounds = array<i64: 1, 4, 128, 32>}, {transform_indices = @transform_17, window_bounds = array<i64: 1, 4, 1, 32>}, {transform_indices = @transform_18, window_bounds = array<i64: 1, 4, 32, 128>}, {transform_indices = @transform_19, window_bounds = array<i64: 1, 1, 128>}, {transform_indices = @transform_20, window_bounds = array<i64: 1, 128, 256>}, {transform_indices = @transform_21, window_bounds = array<i64: 1, 1, 256>}, {transform_indices = @transform_22, window_bounds = array<i64: 1, 256, 128>}, {transform_indices = @transform_23, window_bounds = array<i64: 1, 1, 128>}, {transform_indices = @transform_24, window_bounds = array<i64: 1, 1, 128>}, {transform_indices = @transform_25, window_bounds = array<i64: 1, 1, 128>}, {transform_indices = @transform_26, window_bounds = array<i64: 1, 1, 128>}, {transform_indices = @transform_27, window_bounds = array<i64: 1, 1, 128>}, {transform_indices = @transform_28, window_bounds = array<i64: 1, 1, 128>}, {transform_indices = @transform_29, window_bounds = array<i64: 1, 1, 128>}, {pipeline_mode = #tpu.pipeline_mode<synchronous>, transform_indices = @transform_30, window_bounds = array<i64: 1, 128>}, {pipeline_mode = #tpu.pipeline_mode<synchronous>, transform_indices = @transform_31, window_bounds = array<i64: 1, 128>}, {transform_indices = @transform_32, window_bounds = array<i64: 1, 8, 128>}]} {
    %c0_i32 = arith.constant 0 : i32
    %0 = arith.cmpi eq, %arg1, %c0_i32 : i32
    %1 = arith.extui %0 : i1 to i32
    %c0_i32_0 = arith.constant 0 : i32
    %2 = arith.cmpi ne, %1, %c0_i32_0 : i32
    scf.if %2 {
      %c0_372 = arith.constant 0 : index
      %c0_373 = arith.constant 0 : index
      %c0_374 = arith.constant 0 : index
      %498 = vector.load %arg2[%c0_372, %c0_373, %c0_374] : memref<1x8x128xf32, #tpu.memory_space<vmem>>, vector<1x8x128xf32>
      %499 = vector.shape_cast %498 : vector<1x8x128xf32> to vector<8x128xf32>
      %c0_375 = arith.constant 0 : index
      %c0_376 = arith.constant 0 : index
      %500 = vector.load %arg35[%c0_375, %c0_376] : memref<8x128xf32, #tpu.memory_space<vmem>>, vector<8x128xf32>
      tpu.vector_store %arg35[%c0_375, %c0_376], %499 {strides = array<i32>} : memref<8x128xf32, #tpu.memory_space<vmem>>, vector<8x128xf32>,
    } else {
    }
    %c0 = arith.constant 0 : index
    %c0_1 = arith.constant 0 : index
    %3 = vector.load %arg35[%c0, %c0_1] : memref<8x128xf32, #tpu.memory_space<vmem>>, vector<8x128xf32>
    %c0_2 = arith.constant 0 : index
    %c0_3 = arith.constant 0 : index
    %c0_4 = arith.constant 0 : index
    %4 = vector.load %arg3[%c0_2, %c0_3, %c0_4] : memref<1x16x128xf32, #tpu.memory_space<vmem>>, vector<1x16x128xf32>
    %5 = vector.shape_cast %4 : vector<1x16x128xf32> to vector<16x128xf32>
    %6 = arith.truncf %5 : vector<16x128xf32> to vector<16x128xbf16>
    %c0_5 = arith.constant 0 : index
    %c0_6 = arith.constant 0 : index
    %c0_7 = arith.constant 0 : index
    %7 = vector.load %arg4[%c0_5, %c0_6, %c0_7] : memref<1x8x8xf32, #tpu.memory_space<vmem>>, vector<1x8x8xf32>
    %8 = vector.shape_cast %7 : vector<1x8x8xf32> to vector<8x8xf32>
    %cst = arith.constant 5.000000e-01 : f32
    %9 = vector.broadcast %cst : f32 to vector<8x8xf32>
    %10 = arith.cmpf ogt, %8, %9 : vector<8x8xf32>
    %c0_8 = arith.constant 0 : index
    %c0_9 = arith.constant 0 : index
    %c0_10 = arith.constant 0 : index
    %11 = vector.load %arg5[%c0_8, %c0_9, %c0_10] : memref<1x8x16xf32, #tpu.memory_space<vmem>>, vector<1x8x16xf32>
    %12 = vector.shape_cast %11 : vector<1x8x16xf32> to vector<8x16xf32>
    %cst_11 = arith.constant 5.000000e-01 : f32
    %13 = vector.broadcast %cst_11 : f32 to vector<8x16xf32>
    %14 = arith.cmpf ogt, %12, %13 : vector<8x16xf32>
    %c0_12 = arith.constant 0 : index
    %c0_13 = arith.constant 0 : index
    %c0_14 = arith.constant 0 : index
    %15 = vector.load %arg26[%c0_12, %c0_13, %c0_14] : memref<1x1x128xf32, #tpu.memory_space<vmem>>, vector<1x1x128xf32>
    %16 = vector.shape_cast %15 : vector<1x1x128xf32> to vector<1x128xf32>
    %c0_15 = arith.constant 0 : index
    %c0_16 = arith.constant 0 : index
    %c0_17 = arith.constant 0 : index
    %17 = vector.load %arg27[%c0_15, %c0_16, %c0_17] : memref<1x1x128xf32, #tpu.memory_space<vmem>>, vector<1x1x128xf32>
    %18 = vector.shape_cast %17 : vector<1x1x128xf32> to vector<1x128xf32>
    %cst_18 = arith.constant dense<0.000000e+00> : vector<8xf32>
    %19 = vector.multi_reduction <add>, %3, %cst_18 [1] : vector<8x128xf32> to vector<8xf32>
    %20 = vector.shape_cast %19 : vector<8xf32> to vector<8x1xf32>
    %cst_19 = arith.constant 1.280000e+02 : f32
    %21 = vector.broadcast %cst_19 : f32 to vector<8x1xf32>
    %22 = arith.divf %20, %21 : vector<8x1xf32>
    %23 = vector.broadcast %22 : vector<8x1xf32> to vector<8x128xf32>
    %24 = arith.subf %3, %23 : vector<8x128xf32>
    %25 = arith.mulf %24, %24 : vector<8x128xf32>
    %cst_20 = arith.constant dense<0.000000e+00> : vector<8xf32>
    %26 = vector.multi_reduction <add>, %25, %cst_20 [1] : vector<8x128xf32> to vector<8xf32>
    %27 = vector.shape_cast %26 : vector<8xf32> to vector<8x1xf32>
    %cst_21 = arith.constant 1.280000e+02 : f32
    %28 = vector.broadcast %cst_21 : f32 to vector<8x1xf32>
    %29 = arith.divf %27, %28 : vector<8x1xf32>
    %30 = vector.broadcast %22 : vector<8x1xf32> to vector<8x128xf32>
    %31 = arith.subf %3, %30 : vector<8x128xf32>
    %cst_22 = arith.constant 9.99999974E-6 : f32
    %32 = vector.broadcast %cst_22 : f32 to vector<8x1xf32>
    %33 = arith.addf %29, %32 : vector<8x1xf32>
    %34 = math.rsqrt %33 : vector<8x1xf32>
    %35 = vector.broadcast %34 : vector<8x1xf32> to vector<8x128xf32>
    %36 = arith.mulf %31, %35 : vector<8x128xf32>
    %37 = vector.broadcast %16 : vector<1x128xf32> to vector<8x128xf32>
    %38 = arith.mulf %36, %37 : vector<8x128xf32>
    %39 = vector.broadcast %18 : vector<1x128xf32> to vector<8x128xf32>
    %40 = arith.addf %38, %39 : vector<8x128xf32>
    %41 = arith.truncf %40 : vector<8x128xf32> to vector<8x128xbf16>
    %cst_23 = arith.constant 0.000000e+00 : f32
    %42 = vector.broadcast %cst_23 : f32 to vector<8x128xf32>
    %c0_24 = arith.constant 0 : index
    %c0_25 = arith.constant 0 : index
    %c0_26 = arith.constant 0 : index
    %c0_27 = arith.constant 0 : index
    %43 = vector.load %arg6[%c0_24, %c0_25, %c0_26, %c0_27] : memref<1x4x128x32xbf16, #tpu.memory_space<vmem>>, vector<1x1x128x32xbf16>
    %44 = vector.shape_cast %43 : vector<1x1x128x32xbf16> to vector<128x32xbf16>
    %cst_28 = arith.constant dense<0.000000e+00> : vector<8x32xf32>
    %45 = tpu.matmul %41, %44, %cst_28 {dimension_numbers = #tpu.dot_dimension_numbers<[1], [0], [0], [1], [0, 0, 1, 1], [], []>} : vector<8x128xbf16>, vector<128x32xbf16>, vector<8x32xf32> -> vector<8x32xf32>
    %c0_29 = arith.constant 0 : index
    %c0_30 = arith.constant 0 : index
    %c0_31 = arith.constant 0 : index
    %c0_32 = arith.constant 0 : index
    %46 = vector.load %arg7[%c0_29, %c0_30, %c0_31, %c0_32] : memref<1x4x1x32xf32, #tpu.memory_space<vmem>>, vector<1x1x1x32xf32>
    %47 = vector.shape_cast %46 : vector<1x1x1x32xf32> to vector<1x32xf32>
    %48 = vector.broadcast %47 : vector<1x32xf32> to vector<8x32xf32>
    %49 = arith.addf %45, %48 : vector<8x32xf32>
    %c0_33 = arith.constant 0 : index
    %c0_34 = arith.constant 0 : index
    %c0_35 = arith.constant 0 : index
    %c0_36 = arith.constant 0 : index
    %50 = vector.load %arg8[%c0_33, %c0_34, %c0_35, %c0_36] : memref<1x4x128x32xbf16, #tpu.memory_space<vmem>>, vector<1x1x128x32xbf16>
    %51 = vector.shape_cast %50 : vector<1x1x128x32xbf16> to vector<128x32xbf16>
    %cst_37 = arith.constant dense<0.000000e+00> : vector<8x32xf32>
    %52 = tpu.matmul %41, %51, %cst_37 {dimension_numbers = #tpu.dot_dimension_numbers<[1], [0], [0], [1], [0, 0, 1, 1], [], []>} : vector<8x128xbf16>, vector<128x32xbf16>, vector<8x32xf32> -> vector<8x32xf32>
    %c0_38 = arith.constant 0 : index
    %c0_39 = arith.constant 0 : index
    %c0_40 = arith.constant 0 : index
    %c0_41 = arith.constant 0 : index
    %53 = vector.load %arg9[%c0_38, %c0_39, %c0_40, %c0_41] : memref<1x4x1x32xf32, #tpu.memory_space<vmem>>, vector<1x1x1x32xf32>
    %54 = vector.shape_cast %53 : vector<1x1x1x32xf32> to vector<1x32xf32>
    %55 = vector.broadcast %54 : vector<1x32xf32> to vector<8x32xf32>
    %56 = arith.addf %52, %55 : vector<8x32xf32>
    %c0_42 = arith.constant 0 : index
    %c0_43 = arith.constant 0 : index
    %c0_44 = arith.constant 0 : index
    %c0_45 = arith.constant 0 : index
    %57 = vector.load %arg10[%c0_42, %c0_43, %c0_44, %c0_45] : memref<1x4x128x32xbf16, #tpu.memory_space<vmem>>, vector<1x1x128x32xbf16>
    %58 = vector.shape_cast %57 : vector<1x1x128x32xbf16> to vector<128x32xbf16>
    %cst_46 = arith.constant dense<0.000000e+00> : vector<8x32xf32>
    %59 = tpu.matmul %41, %58, %cst_46 {dimension_numbers = #tpu.dot_dimension_numbers<[1], [0], [0], [1], [0, 0, 1, 1], [], []>} : vector<8x128xbf16>, vector<128x32xbf16>, vector<8x32xf32> -> vector<8x32xf32>
    %c0_47 = arith.constant 0 : index
    %c0_48 = arith.constant 0 : index
    %c0_49 = arith.constant 0 : index
    %c0_50 = arith.constant 0 : index
    %60 = vector.load %arg11[%c0_47, %c0_48, %c0_49, %c0_50] : memref<1x4x1x32xf32, #tpu.memory_space<vmem>>, vector<1x1x1x32xf32>
    %61 = vector.shape_cast %60 : vector<1x1x1x32xf32> to vector<1x32xf32>
    %62 = vector.broadcast %61 : vector<1x32xf32> to vector<8x32xf32>
    %63 = arith.addf %59, %62 : vector<8x32xf32>
    %64 = arith.truncf %49 : vector<8x32xf32> to vector<8x32xbf16>
    %65 = arith.truncf %56 : vector<8x32xf32> to vector<8x32xbf16>
    %cst_51 = arith.constant dense<0.000000e+00> : vector<8x8xf32>
    %66 = tpu.matmul %64, %65, %cst_51 {dimension_numbers = #tpu.dot_dimension_numbers<[1], [1], [0], [0], [0, 0, 1, 0], [], []>} : vector<8x32xbf16>, vector<8x32xbf16>, vector<8x8xf32> -> vector<8x8xf32>
    %cst_52 = arith.constant 0.176776692 : f32
    %67 = vector.broadcast %cst_52 : f32 to vector<8x8xf32>
    %68 = arith.mulf %66, %67 : vector<8x8xf32>
    %cst_53 = arith.constant 9.99999971E-10 : f32
    %69 = vector.broadcast %cst_53 : f32 to vector<8x8xf32>
    %70 = arith.select %10, %68, %69 : vector<8x8xi1>, vector<8x8xf32>
    %cst_54 = arith.constant dense<0xFF800000> : vector<8xf32>
    %71 = vector.multi_reduction <maximumf>, %70, %cst_54 [1] : vector<8x8xf32> to vector<8xf32>
    %72 = vector.shape_cast %71 : vector<8xf32> to vector<8x1xf32>
    %73 = vector.broadcast %72 : vector<8x1xf32> to vector<8x8xf32>
    %74 = arith.subf %70, %73 : vector<8x8xf32>
    %75 = math.exp %74 : vector<8x8xf32>
    %cst_55 = arith.constant dense<0.000000e+00> : vector<8xf32>
    %76 = vector.multi_reduction <add>, %75, %cst_55 [1] : vector<8x8xf32> to vector<8xf32>
    %77 = vector.shape_cast %76 : vector<8xf32> to vector<8x1xf32>
    %78 = tpu.reciprocal %77 : vector<8x1xf32> -> vector<8x1xf32>
    %79 = vector.broadcast %78 : vector<8x1xf32> to vector<8x8xf32>
    %80 = arith.mulf %75, %79 : vector<8x8xf32>
    %81 = arith.truncf %80 : vector<8x8xf32> to vector<8x8xbf16>
    %82 = arith.truncf %63 : vector<8x32xf32> to vector<8x32xbf16>
    %cst_56 = arith.constant dense<0.000000e+00> : vector<8x32xf32>
    %83 = tpu.matmul %81, %82, %cst_56 {dimension_numbers = #tpu.dot_dimension_numbers<[1], [0], [0], [1], [0, 0, 1, 1], [], []>} : vector<8x8xbf16>, vector<8x32xbf16>, vector<8x32xf32> -> vector<8x32xf32>
    %84 = arith.truncf %83 : vector<8x32xf32> to vector<8x32xbf16>
    %c0_57 = arith.constant 0 : index
    %c0_58 = arith.constant 0 : index
    %c0_59 = arith.constant 0 : index
    %c0_60 = arith.constant 0 : index
    %85 = vector.load %arg12[%c0_57, %c0_58, %c0_59, %c0_60] : memref<1x4x32x128xbf16, #tpu.memory_space<vmem>>, vector<1x1x32x128xbf16>
    %86 = vector.shape_cast %85 : vector<1x1x32x128xbf16> to vector<32x128xbf16>
    %cst_61 = arith.constant dense<0.000000e+00> : vector<8x128xf32>
    %87 = tpu.matmul %84, %86, %cst_61 {dimension_numbers = #tpu.dot_dimension_numbers<[1], [0], [0], [1], [0, 0, 1, 1], [], []>} : vector<8x32xbf16>, vector<32x128xbf16>, vector<8x128xf32> -> vector<8x128xf32>
    %88 = arith.addf %42, %87 : vector<8x128xf32>
    %c0_62 = arith.constant 0 : index
    %c1 = arith.constant 1 : index
    %c0_63 = arith.constant 0 : index
    %c0_64 = arith.constant 0 : index
    %89 = vector.load %arg6[%c0_62, %c1, %c0_63, %c0_64] : memref<1x4x128x32xbf16, #tpu.memory_space<vmem>>, vector<1x1x128x32xbf16>
    %90 = vector.shape_cast %89 : vector<1x1x128x32xbf16> to vector<128x32xbf16>
    %cst_65 = arith.constant dense<0.000000e+00> : vector<8x32xf32>
    %91 = tpu.matmul %41, %90, %cst_65 {dimension_numbers = #tpu.dot_dimension_numbers<[1], [0], [0], [1], [0, 0, 1, 1], [], []>} : vector<8x128xbf16>, vector<128x32xbf16>, vector<8x32xf32> -> vector<8x32xf32>
    %c0_66 = arith.constant 0 : index
    %c1_67 = arith.constant 1 : index
    %c0_68 = arith.constant 0 : index
    %c0_69 = arith.constant 0 : index
    %92 = vector.load %arg7[%c0_66, %c1_67, %c0_68, %c0_69] : memref<1x4x1x32xf32, #tpu.memory_space<vmem>>, vector<1x1x1x32xf32>
    %93 = vector.shape_cast %92 : vector<1x1x1x32xf32> to vector<1x32xf32>
    %94 = vector.broadcast %93 : vector<1x32xf32> to vector<8x32xf32>
    %95 = arith.addf %91, %94 : vector<8x32xf32>
    %c0_70 = arith.constant 0 : index
    %c1_71 = arith.constant 1 : index
    %c0_72 = arith.constant 0 : index
    %c0_73 = arith.constant 0 : index
    %96 = vector.load %arg8[%c0_70, %c1_71, %c0_72, %c0_73] : memref<1x4x128x32xbf16, #tpu.memory_space<vmem>>, vector<1x1x128x32xbf16>
    %97 = vector.shape_cast %96 : vector<1x1x128x32xbf16> to vector<128x32xbf16>
    %cst_74 = arith.constant dense<0.000000e+00> : vector<8x32xf32>
    %98 = tpu.matmul %41, %97, %cst_74 {dimension_numbers = #tpu.dot_dimension_numbers<[1], [0], [0], [1], [0, 0, 1, 1], [], []>} : vector<8x128xbf16>, vector<128x32xbf16>, vector<8x32xf32> -> vector<8x32xf32>
    %c0_75 = arith.constant 0 : index
    %c1_76 = arith.constant 1 : index
    %c0_77 = arith.constant 0 : index
    %c0_78 = arith.constant 0 : index
    %99 = vector.load %arg9[%c0_75, %c1_76, %c0_77, %c0_78] : memref<1x4x1x32xf32, #tpu.memory_space<vmem>>, vector<1x1x1x32xf32>
    %100 = vector.shape_cast %99 : vector<1x1x1x32xf32> to vector<1x32xf32>
    %101 = vector.broadcast %100 : vector<1x32xf32> to vector<8x32xf32>
    %102 = arith.addf %98, %101 : vector<8x32xf32>
    %c0_79 = arith.constant 0 : index
    %c1_80 = arith.constant 1 : index
    %c0_81 = arith.constant 0 : index
    %c0_82 = arith.constant 0 : index
    %103 = vector.load %arg10[%c0_79, %c1_80, %c0_81, %c0_82] : memref<1x4x128x32xbf16, #tpu.memory_space<vmem>>, vector<1x1x128x32xbf16>
    %104 = vector.shape_cast %103 : vector<1x1x128x32xbf16> to vector<128x32xbf16>
    %cst_83 = arith.constant dense<0.000000e+00> : vector<8x32xf32>
    %105 = tpu.matmul %41, %104, %cst_83 {dimension_numbers = #tpu.dot_dimension_numbers<[1], [0], [0], [1], [0, 0, 1, 1], [], []>} : vector<8x128xbf16>, vector<128x32xbf16>, vector<8x32xf32> -> vector<8x32xf32>
    %c0_84 = arith.constant 0 : index
    %c1_85 = arith.constant 1 : index
    %c0_86 = arith.constant 0 : index
    %c0_87 = arith.constant 0 : index
    %106 = vector.load %arg11[%c0_84, %c1_85, %c0_86, %c0_87] : memref<1x4x1x32xf32, #tpu.memory_space<vmem>>, vector<1x1x1x32xf32>
    %107 = vector.shape_cast %106 : vector<1x1x1x32xf32> to vector<1x32xf32>
    %108 = vector.broadcast %107 : vector<1x32xf32> to vector<8x32xf32>
    %109 = arith.addf %105, %108 : vector<8x32xf32>
    %110 = arith.truncf %95 : vector<8x32xf32> to vector<8x32xbf16>
    %111 = arith.truncf %102 : vector<8x32xf32> to vector<8x32xbf16>
    %cst_88 = arith.constant dense<0.000000e+00> : vector<8x8xf32>
    %112 = tpu.matmul %110, %111, %cst_88 {dimension_numbers = #tpu.dot_dimension_numbers<[1], [1], [0], [0], [0, 0, 1, 0], [], []>} : vector<8x32xbf16>, vector<8x32xbf16>, vector<8x8xf32> -> vector<8x8xf32>
    %cst_89 = arith.constant 0.176776692 : f32
    %113 = vector.broadcast %cst_89 : f32 to vector<8x8xf32>
    %114 = arith.mulf %112, %113 : vector<8x8xf32>
    %cst_90 = arith.constant 9.99999971E-10 : f32
    %115 = vector.broadcast %cst_90 : f32 to vector<8x8xf32>
    %116 = arith.select %10, %114, %115 : vector<8x8xi1>, vector<8x8xf32>
    %cst_91 = arith.constant dense<0xFF800000> : vector<8xf32>
    %117 = vector.multi_reduction <maximumf>, %116, %cst_91 [1] : vector<8x8xf32> to vector<8xf32>
    %118 = vector.shape_cast %117 : vector<8xf32> to vector<8x1xf32>
    %119 = vector.broadcast %118 : vector<8x1xf32> to vector<8x8xf32>
    %120 = arith.subf %116, %119 : vector<8x8xf32>
    %121 = math.exp %120 : vector<8x8xf32>
    %cst_92 = arith.constant dense<0.000000e+00> : vector<8xf32>
    %122 = vector.multi_reduction <add>, %121, %cst_92 [1] : vector<8x8xf32> to vector<8xf32>
    %123 = vector.shape_cast %122 : vector<8xf32> to vector<8x1xf32>
    %124 = tpu.reciprocal %123 : vector<8x1xf32> -> vector<8x1xf32>
    %125 = vector.broadcast %124 : vector<8x1xf32> to vector<8x8xf32>
    %126 = arith.mulf %121, %125 : vector<8x8xf32>
    %127 = arith.truncf %126 : vector<8x8xf32> to vector<8x8xbf16>
    %128 = arith.truncf %109 : vector<8x32xf32> to vector<8x32xbf16>
    %cst_93 = arith.constant dense<0.000000e+00> : vector<8x32xf32>
    %129 = tpu.matmul %127, %128, %cst_93 {dimension_numbers = #tpu.dot_dimension_numbers<[1], [0], [0], [1], [0, 0, 1, 1], [], []>} : vector<8x8xbf16>, vector<8x32xbf16>, vector<8x32xf32> -> vector<8x32xf32>
    %130 = arith.truncf %129 : vector<8x32xf32> to vector<8x32xbf16>
    %c0_94 = arith.constant 0 : index
    %c1_95 = arith.constant 1 : index
    %c0_96 = arith.constant 0 : index
    %c0_97 = arith.constant 0 : index
    %131 = vector.load %arg12[%c0_94, %c1_95, %c0_96, %c0_97] : memref<1x4x32x128xbf16, #tpu.memory_space<vmem>>, vector<1x1x32x128xbf16>
    %132 = vector.shape_cast %131 : vector<1x1x32x128xbf16> to vector<32x128xbf16>
    %cst_98 = arith.constant dense<0.000000e+00> : vector<8x128xf32>
    %133 = tpu.matmul %130, %132, %cst_98 {dimension_numbers = #tpu.dot_dimension_numbers<[1], [0], [0], [1], [0, 0, 1, 1], [], []>} : vector<8x32xbf16>, vector<32x128xbf16>, vector<8x128xf32> -> vector<8x128xf32>
    %134 = arith.addf %88, %133 : vector<8x128xf32>
    %c0_99 = arith.constant 0 : index
    %c2 = arith.constant 2 : index
    %c0_100 = arith.constant 0 : index
    %c0_101 = arith.constant 0 : index
    %135 = vector.load %arg6[%c0_99, %c2, %c0_100, %c0_101] : memref<1x4x128x32xbf16, #tpu.memory_space<vmem>>, vector<1x1x128x32xbf16>
    %136 = vector.shape_cast %135 : vector<1x1x128x32xbf16> to vector<128x32xbf16>
    %cst_102 = arith.constant dense<0.000000e+00> : vector<8x32xf32>
    %137 = tpu.matmul %41, %136, %cst_102 {dimension_numbers = #tpu.dot_dimension_numbers<[1], [0], [0], [1], [0, 0, 1, 1], [], []>} : vector<8x128xbf16>, vector<128x32xbf16>, vector<8x32xf32> -> vector<8x32xf32>
    %c0_103 = arith.constant 0 : index
    %c2_104 = arith.constant 2 : index
    %c0_105 = arith.constant 0 : index
    %c0_106 = arith.constant 0 : index
    %138 = vector.load %arg7[%c0_103, %c2_104, %c0_105, %c0_106] : memref<1x4x1x32xf32, #tpu.memory_space<vmem>>, vector<1x1x1x32xf32>
    %139 = vector.shape_cast %138 : vector<1x1x1x32xf32> to vector<1x32xf32>
    %140 = vector.broadcast %139 : vector<1x32xf32> to vector<8x32xf32>
    %141 = arith.addf %137, %140 : vector<8x32xf32>
    %c0_107 = arith.constant 0 : index
    %c2_108 = arith.constant 2 : index
    %c0_109 = arith.constant 0 : index
    %c0_110 = arith.constant 0 : index
    %142 = vector.load %arg8[%c0_107, %c2_108, %c0_109, %c0_110] : memref<1x4x128x32xbf16, #tpu.memory_space<vmem>>, vector<1x1x128x32xbf16>
    %143 = vector.shape_cast %142 : vector<1x1x128x32xbf16> to vector<128x32xbf16>
    %cst_111 = arith.constant dense<0.000000e+00> : vector<8x32xf32>
    %144 = tpu.matmul %41, %143, %cst_111 {dimension_numbers = #tpu.dot_dimension_numbers<[1], [0], [0], [1], [0, 0, 1, 1], [], []>} : vector<8x128xbf16>, vector<128x32xbf16>, vector<8x32xf32> -> vector<8x32xf32>
    %c0_112 = arith.constant 0 : index
    %c2_113 = arith.constant 2 : index
    %c0_114 = arith.constant 0 : index
    %c0_115 = arith.constant 0 : index
    %145 = vector.load %arg9[%c0_112, %c2_113, %c0_114, %c0_115] : memref<1x4x1x32xf32, #tpu.memory_space<vmem>>, vector<1x1x1x32xf32>
    %146 = vector.shape_cast %145 : vector<1x1x1x32xf32> to vector<1x32xf32>
    %147 = vector.broadcast %146 : vector<1x32xf32> to vector<8x32xf32>
    %148 = arith.addf %144, %147 : vector<8x32xf32>
    %c0_116 = arith.constant 0 : index
    %c2_117 = arith.constant 2 : index
    %c0_118 = arith.constant 0 : index
    %c0_119 = arith.constant 0 : index
    %149 = vector.load %arg10[%c0_116, %c2_117, %c0_118, %c0_119] : memref<1x4x128x32xbf16, #tpu.memory_space<vmem>>, vector<1x1x128x32xbf16>
    %150 = vector.shape_cast %149 : vector<1x1x128x32xbf16> to vector<128x32xbf16>
    %cst_120 = arith.constant dense<0.000000e+00> : vector<8x32xf32>
    %151 = tpu.matmul %41, %150, %cst_120 {dimension_numbers = #tpu.dot_dimension_numbers<[1], [0], [0], [1], [0, 0, 1, 1], [], []>} : vector<8x128xbf16>, vector<128x32xbf16>, vector<8x32xf32> -> vector<8x32xf32>
    %c0_121 = arith.constant 0 : index
    %c2_122 = arith.constant 2 : index
    %c0_123 = arith.constant 0 : index
    %c0_124 = arith.constant 0 : index
    %152 = vector.load %arg11[%c0_121, %c2_122, %c0_123, %c0_124] : memref<1x4x1x32xf32, #tpu.memory_space<vmem>>, vector<1x1x1x32xf32>
    %153 = vector.shape_cast %152 : vector<1x1x1x32xf32> to vector<1x32xf32>
    %154 = vector.broadcast %153 : vector<1x32xf32> to vector<8x32xf32>
    %155 = arith.addf %151, %154 : vector<8x32xf32>
    %156 = arith.truncf %141 : vector<8x32xf32> to vector<8x32xbf16>
    %157 = arith.truncf %148 : vector<8x32xf32> to vector<8x32xbf16>
    %cst_125 = arith.constant dense<0.000000e+00> : vector<8x8xf32>
    %158 = tpu.matmul %156, %157, %cst_125 {dimension_numbers = #tpu.dot_dimension_numbers<[1], [1], [0], [0], [0, 0, 1, 0], [], []>} : vector<8x32xbf16>, vector<8x32xbf16>, vector<8x8xf32> -> vector<8x8xf32>
    %cst_126 = arith.constant 0.176776692 : f32
    %159 = vector.broadcast %cst_126 : f32 to vector<8x8xf32>
    %160 = arith.mulf %158, %159 : vector<8x8xf32>
    %cst_127 = arith.constant 9.99999971E-10 : f32
    %161 = vector.broadcast %cst_127 : f32 to vector<8x8xf32>
    %162 = arith.select %10, %160, %161 : vector<8x8xi1>, vector<8x8xf32>
    %cst_128 = arith.constant dense<0xFF800000> : vector<8xf32>
    %163 = vector.multi_reduction <maximumf>, %162, %cst_128 [1] : vector<8x8xf32> to vector<8xf32>
    %164 = vector.shape_cast %163 : vector<8xf32> to vector<8x1xf32>
    %165 = vector.broadcast %164 : vector<8x1xf32> to vector<8x8xf32>
    %166 = arith.subf %162, %165 : vector<8x8xf32>
    %167 = math.exp %166 : vector<8x8xf32>
    %cst_129 = arith.constant dense<0.000000e+00> : vector<8xf32>
    %168 = vector.multi_reduction <add>, %167, %cst_129 [1] : vector<8x8xf32> to vector<8xf32>
    %169 = vector.shape_cast %168 : vector<8xf32> to vector<8x1xf32>
    %170 = tpu.reciprocal %169 : vector<8x1xf32> -> vector<8x1xf32>
    %171 = vector.broadcast %170 : vector<8x1xf32> to vector<8x8xf32>
    %172 = arith.mulf %167, %171 : vector<8x8xf32>
    %173 = arith.truncf %172 : vector<8x8xf32> to vector<8x8xbf16>
    %174 = arith.truncf %155 : vector<8x32xf32> to vector<8x32xbf16>
    %cst_130 = arith.constant dense<0.000000e+00> : vector<8x32xf32>
    %175 = tpu.matmul %173, %174, %cst_130 {dimension_numbers = #tpu.dot_dimension_numbers<[1], [0], [0], [1], [0, 0, 1, 1], [], []>} : vector<8x8xbf16>, vector<8x32xbf16>, vector<8x32xf32> -> vector<8x32xf32>
    %176 = arith.truncf %175 : vector<8x32xf32> to vector<8x32xbf16>
    %c0_131 = arith.constant 0 : index
    %c2_132 = arith.constant 2 : index
    %c0_133 = arith.constant 0 : index
    %c0_134 = arith.constant 0 : index
    %177 = vector.load %arg12[%c0_131, %c2_132, %c0_133, %c0_134] : memref<1x4x32x128xbf16, #tpu.memory_space<vmem>>, vector<1x1x32x128xbf16>
    %178 = vector.shape_cast %177 : vector<1x1x32x128xbf16> to vector<32x128xbf16>
    %cst_135 = arith.constant dense<0.000000e+00> : vector<8x128xf32>
    %179 = tpu.matmul %176, %178, %cst_135 {dimension_numbers = #tpu.dot_dimension_numbers<[1], [0], [0], [1], [0, 0, 1, 1], [], []>} : vector<8x32xbf16>, vector<32x128xbf16>, vector<8x128xf32> -> vector<8x128xf32>
    %180 = arith.addf %134, %179 : vector<8x128xf32>
    %c0_136 = arith.constant 0 : index
    %c3 = arith.constant 3 : index
    %c0_137 = arith.constant 0 : index
    %c0_138 = arith.constant 0 : index
    %181 = vector.load %arg6[%c0_136, %c3, %c0_137, %c0_138] : memref<1x4x128x32xbf16, #tpu.memory_space<vmem>>, vector<1x1x128x32xbf16>
    %182 = vector.shape_cast %181 : vector<1x1x128x32xbf16> to vector<128x32xbf16>
    %cst_139 = arith.constant dense<0.000000e+00> : vector<8x32xf32>
    %183 = tpu.matmul %41, %182, %cst_139 {dimension_numbers = #tpu.dot_dimension_numbers<[1], [0], [0], [1], [0, 0, 1, 1], [], []>} : vector<8x128xbf16>, vector<128x32xbf16>, vector<8x32xf32> -> vector<8x32xf32>
    %c0_140 = arith.constant 0 : index
    %c3_141 = arith.constant 3 : index
    %c0_142 = arith.constant 0 : index
    %c0_143 = arith.constant 0 : index
    %184 = vector.load %arg7[%c0_140, %c3_141, %c0_142, %c0_143] : memref<1x4x1x32xf32, #tpu.memory_space<vmem>>, vector<1x1x1x32xf32>
    %185 = vector.shape_cast %184 : vector<1x1x1x32xf32> to vector<1x32xf32>
    %186 = vector.broadcast %185 : vector<1x32xf32> to vector<8x32xf32>
    %187 = arith.addf %183, %186 : vector<8x32xf32>
    %c0_144 = arith.constant 0 : index
    %c3_145 = arith.constant 3 : index
    %c0_146 = arith.constant 0 : index
    %c0_147 = arith.constant 0 : index
    %188 = vector.load %arg8[%c0_144, %c3_145, %c0_146, %c0_147] : memref<1x4x128x32xbf16, #tpu.memory_space<vmem>>, vector<1x1x128x32xbf16>
    %189 = vector.shape_cast %188 : vector<1x1x128x32xbf16> to vector<128x32xbf16>
    %cst_148 = arith.constant dense<0.000000e+00> : vector<8x32xf32>
    %190 = tpu.matmul %41, %189, %cst_148 {dimension_numbers = #tpu.dot_dimension_numbers<[1], [0], [0], [1], [0, 0, 1, 1], [], []>} : vector<8x128xbf16>, vector<128x32xbf16>, vector<8x32xf32> -> vector<8x32xf32>
    %c0_149 = arith.constant 0 : index
    %c3_150 = arith.constant 3 : index
    %c0_151 = arith.constant 0 : index
    %c0_152 = arith.constant 0 : index
    %191 = vector.load %arg9[%c0_149, %c3_150, %c0_151, %c0_152] : memref<1x4x1x32xf32, #tpu.memory_space<vmem>>, vector<1x1x1x32xf32>
    %192 = vector.shape_cast %191 : vector<1x1x1x32xf32> to vector<1x32xf32>
    %193 = vector.broadcast %192 : vector<1x32xf32> to vector<8x32xf32>
    %194 = arith.addf %190, %193 : vector<8x32xf32>
    %c0_153 = arith.constant 0 : index
    %c3_154 = arith.constant 3 : index
    %c0_155 = arith.constant 0 : index
    %c0_156 = arith.constant 0 : index
    %195 = vector.load %arg10[%c0_153, %c3_154, %c0_155, %c0_156] : memref<1x4x128x32xbf16, #tpu.memory_space<vmem>>, vector<1x1x128x32xbf16>
    %196 = vector.shape_cast %195 : vector<1x1x128x32xbf16> to vector<128x32xbf16>
    %cst_157 = arith.constant dense<0.000000e+00> : vector<8x32xf32>
    %197 = tpu.matmul %41, %196, %cst_157 {dimension_numbers = #tpu.dot_dimension_numbers<[1], [0], [0], [1], [0, 0, 1, 1], [], []>} : vector<8x128xbf16>, vector<128x32xbf16>, vector<8x32xf32> -> vector<8x32xf32>
    %c0_158 = arith.constant 0 : index
    %c3_159 = arith.constant 3 : index
    %c0_160 = arith.constant 0 : index
    %c0_161 = arith.constant 0 : index
    %198 = vector.load %arg11[%c0_158, %c3_159, %c0_160, %c0_161] : memref<1x4x1x32xf32, #tpu.memory_space<vmem>>, vector<1x1x1x32xf32>
    %199 = vector.shape_cast %198 : vector<1x1x1x32xf32> to vector<1x32xf32>
    %200 = vector.broadcast %199 : vector<1x32xf32> to vector<8x32xf32>
    %201 = arith.addf %197, %200 : vector<8x32xf32>
    %202 = arith.truncf %187 : vector<8x32xf32> to vector<8x32xbf16>
    %203 = arith.truncf %194 : vector<8x32xf32> to vector<8x32xbf16>
    %cst_162 = arith.constant dense<0.000000e+00> : vector<8x8xf32>
    %204 = tpu.matmul %202, %203, %cst_162 {dimension_numbers = #tpu.dot_dimension_numbers<[1], [1], [0], [0], [0, 0, 1, 0], [], []>} : vector<8x32xbf16>, vector<8x32xbf16>, vector<8x8xf32> -> vector<8x8xf32>
    %cst_163 = arith.constant 0.176776692 : f32
    %205 = vector.broadcast %cst_163 : f32 to vector<8x8xf32>
    %206 = arith.mulf %204, %205 : vector<8x8xf32>
    %cst_164 = arith.constant 9.99999971E-10 : f32
    %207 = vector.broadcast %cst_164 : f32 to vector<8x8xf32>
    %208 = arith.select %10, %206, %207 : vector<8x8xi1>, vector<8x8xf32>
    %cst_165 = arith.constant dense<0xFF800000> : vector<8xf32>
    %209 = vector.multi_reduction <maximumf>, %208, %cst_165 [1] : vector<8x8xf32> to vector<8xf32>
    %210 = vector.shape_cast %209 : vector<8xf32> to vector<8x1xf32>
    %211 = vector.broadcast %210 : vector<8x1xf32> to vector<8x8xf32>
    %212 = arith.subf %208, %211 : vector<8x8xf32>
    %213 = math.exp %212 : vector<8x8xf32>
    %cst_166 = arith.constant dense<0.000000e+00> : vector<8xf32>
    %214 = vector.multi_reduction <add>, %213, %cst_166 [1] : vector<8x8xf32> to vector<8xf32>
    %215 = vector.shape_cast %214 : vector<8xf32> to vector<8x1xf32>
    %216 = tpu.reciprocal %215 : vector<8x1xf32> -> vector<8x1xf32>
    %217 = vector.broadcast %216 : vector<8x1xf32> to vector<8x8xf32>
    %218 = arith.mulf %213, %217 : vector<8x8xf32>
    %219 = arith.truncf %218 : vector<8x8xf32> to vector<8x8xbf16>
    %220 = arith.truncf %201 : vector<8x32xf32> to vector<8x32xbf16>
    %cst_167 = arith.constant dense<0.000000e+00> : vector<8x32xf32>
    %221 = tpu.matmul %219, %220, %cst_167 {dimension_numbers = #tpu.dot_dimension_numbers<[1], [0], [0], [1], [0, 0, 1, 1], [], []>} : vector<8x8xbf16>, vector<8x32xbf16>, vector<8x32xf32> -> vector<8x32xf32>
    %222 = arith.truncf %221 : vector<8x32xf32> to vector<8x32xbf16>
    %c0_168 = arith.constant 0 : index
    %c3_169 = arith.constant 3 : index
    %c0_170 = arith.constant 0 : index
    %c0_171 = arith.constant 0 : index
    %223 = vector.load %arg12[%c0_168, %c3_169, %c0_170, %c0_171] : memref<1x4x32x128xbf16, #tpu.memory_space<vmem>>, vector<1x1x32x128xbf16>
    %224 = vector.shape_cast %223 : vector<1x1x32x128xbf16> to vector<32x128xbf16>
    %cst_172 = arith.constant dense<0.000000e+00> : vector<8x128xf32>
    %225 = tpu.matmul %222, %224, %cst_172 {dimension_numbers = #tpu.dot_dimension_numbers<[1], [0], [0], [1], [0, 0, 1, 1], [], []>} : vector<8x32xbf16>, vector<32x128xbf16>, vector<8x128xf32> -> vector<8x128xf32>
    %226 = arith.addf %180, %225 : vector<8x128xf32>
    %c0_173 = arith.constant 0 : index
    %c0_174 = arith.constant 0 : index
    %c0_175 = arith.constant 0 : index
    %227 = vector.load %arg13[%c0_173, %c0_174, %c0_175] : memref<1x1x128xf32, #tpu.memory_space<vmem>>, vector<1x1x128xf32>
    %228 = vector.shape_cast %227 : vector<1x1x128xf32> to vector<1x128xf32>
    %229 = vector.broadcast %228 : vector<1x128xf32> to vector<8x128xf32>
    %230 = arith.addf %226, %229 : vector<8x128xf32>
    %231 = arith.addf %3, %230 : vector<8x128xf32>
    %c0_176 = arith.constant 0 : index
    %c0_177 = arith.constant 0 : index
    %c0_178 = arith.constant 0 : index
    %232 = vector.load %arg28[%c0_176, %c0_177, %c0_178] : memref<1x1x128xf32, #tpu.memory_space<vmem>>, vector<1x1x128xf32>
    %233 = vector.shape_cast %232 : vector<1x1x128xf32> to vector<1x128xf32>
    %c0_179 = arith.constant 0 : index
    %c0_180 = arith.constant 0 : index
    %c0_181 = arith.constant 0 : index
    %234 = vector.load %arg29[%c0_179, %c0_180, %c0_181] : memref<1x1x128xf32, #tpu.memory_space<vmem>>, vector<1x1x128xf32>
    %235 = vector.shape_cast %234 : vector<1x1x128xf32> to vector<1x128xf32>
    %cst_182 = arith.constant dense<0.000000e+00> : vector<8xf32>
    %236 = vector.multi_reduction <add>, %231, %cst_182 [1] : vector<8x128xf32> to vector<8xf32>
    %237 = vector.shape_cast %236 : vector<8xf32> to vector<8x1xf32>
    %cst_183 = arith.constant 1.280000e+02 : f32
    %238 = vector.broadcast %cst_183 : f32 to vector<8x1xf32>
    %239 = arith.divf %237, %238 : vector<8x1xf32>
    %240 = vector.broadcast %239 : vector<8x1xf32> to vector<8x128xf32>
    %241 = arith.subf %231, %240 : vector<8x128xf32>
    %242 = arith.mulf %241, %241 : vector<8x128xf32>
    %cst_184 = arith.constant dense<0.000000e+00> : vector<8xf32>
    %243 = vector.multi_reduction <add>, %242, %cst_184 [1] : vector<8x128xf32> to vector<8xf32>
    %244 = vector.shape_cast %243 : vector<8xf32> to vector<8x1xf32>
    %cst_185 = arith.constant 1.280000e+02 : f32
    %245 = vector.broadcast %cst_185 : f32 to vector<8x1xf32>
    %246 = arith.divf %244, %245 : vector<8x1xf32>
    %247 = vector.broadcast %239 : vector<8x1xf32> to vector<8x128xf32>
    %248 = arith.subf %231, %247 : vector<8x128xf32>
    %cst_186 = arith.constant 9.99999974E-6 : f32
    %249 = vector.broadcast %cst_186 : f32 to vector<8x1xf32>
    %250 = arith.addf %246, %249 : vector<8x1xf32>
    %251 = math.rsqrt %250 : vector<8x1xf32>
    %252 = vector.broadcast %251 : vector<8x1xf32> to vector<8x128xf32>
    %253 = arith.mulf %248, %252 : vector<8x128xf32>
    %254 = vector.broadcast %233 : vector<1x128xf32> to vector<8x128xf32>
    %255 = arith.mulf %253, %254 : vector<8x128xf32>
    %256 = vector.broadcast %235 : vector<1x128xf32> to vector<8x128xf32>
    %257 = arith.addf %255, %256 : vector<8x128xf32>
    %258 = arith.truncf %257 : vector<8x128xf32> to vector<8x128xbf16>
    %cst_187 = arith.constant 0.000000e+00 : f32
    %259 = vector.broadcast %cst_187 : f32 to vector<8x128xf32>
    %c0_188 = arith.constant 0 : index
    %c0_189 = arith.constant 0 : index
    %c0_190 = arith.constant 0 : index
    %c0_191 = arith.constant 0 : index
    %260 = vector.load %arg14[%c0_188, %c0_189, %c0_190, %c0_191] : memref<1x4x128x32xbf16, #tpu.memory_space<vmem>>, vector<1x1x128x32xbf16>
    %261 = vector.shape_cast %260 : vector<1x1x128x32xbf16> to vector<128x32xbf16>
    %cst_192 = arith.constant dense<0.000000e+00> : vector<8x32xf32>
    %262 = tpu.matmul %258, %261, %cst_192 {dimension_numbers = #tpu.dot_dimension_numbers<[1], [0], [0], [1], [0, 0, 1, 1], [], []>} : vector<8x128xbf16>, vector<128x32xbf16>, vector<8x32xf32> -> vector<8x32xf32>
    %c0_193 = arith.constant 0 : index
    %c0_194 = arith.constant 0 : index
    %c0_195 = arith.constant 0 : index
    %c0_196 = arith.constant 0 : index
    %263 = vector.load %arg15[%c0_193, %c0_194, %c0_195, %c0_196] : memref<1x4x1x32xf32, #tpu.memory_space<vmem>>, vector<1x1x1x32xf32>
    %264 = vector.shape_cast %263 : vector<1x1x1x32xf32> to vector<1x32xf32>
    %265 = vector.broadcast %264 : vector<1x32xf32> to vector<8x32xf32>
    %266 = arith.addf %262, %265 : vector<8x32xf32>
    %c0_197 = arith.constant 0 : index
    %c0_198 = arith.constant 0 : index
    %c0_199 = arith.constant 0 : index
    %c0_200 = arith.constant 0 : index
    %267 = vector.load %arg16[%c0_197, %c0_198, %c0_199, %c0_200] : memref<1x4x128x32xbf16, #tpu.memory_space<vmem>>, vector<1x1x128x32xbf16>
    %268 = vector.shape_cast %267 : vector<1x1x128x32xbf16> to vector<128x32xbf16>
    %cst_201 = arith.constant dense<0.000000e+00> : vector<16x32xf32>
    %269 = tpu.matmul %6, %268, %cst_201 {dimension_numbers = #tpu.dot_dimension_numbers<[1], [0], [0], [1], [0, 0, 1, 1], [], []>} : vector<16x128xbf16>, vector<128x32xbf16>, vector<16x32xf32> -> vector<16x32xf32>
    %c0_202 = arith.constant 0 : index
    %c0_203 = arith.constant 0 : index
    %c0_204 = arith.constant 0 : index
    %c0_205 = arith.constant 0 : index
    %270 = vector.load %arg17[%c0_202, %c0_203, %c0_204, %c0_205] : memref<1x4x1x32xf32, #tpu.memory_space<vmem>>, vector<1x1x1x32xf32>
    %271 = vector.shape_cast %270 : vector<1x1x1x32xf32> to vector<1x32xf32>
    %272 = vector.broadcast %271 : vector<1x32xf32> to vector<16x32xf32>
    %273 = arith.addf %269, %272 : vector<16x32xf32>
    %c0_206 = arith.constant 0 : index
    %c0_207 = arith.constant 0 : index
    %c0_208 = arith.constant 0 : index
    %c0_209 = arith.constant 0 : index
    %274 = vector.load %arg18[%c0_206, %c0_207, %c0_208, %c0_209] : memref<1x4x128x32xbf16, #tpu.memory_space<vmem>>, vector<1x1x128x32xbf16>
    %275 = vector.shape_cast %274 : vector<1x1x128x32xbf16> to vector<128x32xbf16>
    %cst_210 = arith.constant dense<0.000000e+00> : vector<16x32xf32>
    %276 = tpu.matmul %6, %275, %cst_210 {dimension_numbers = #tpu.dot_dimension_numbers<[1], [0], [0], [1], [0, 0, 1, 1], [], []>} : vector<16x128xbf16>, vector<128x32xbf16>, vector<16x32xf32> -> vector<16x32xf32>
    %c0_211 = arith.constant 0 : index
    %c0_212 = arith.constant 0 : index
    %c0_213 = arith.constant 0 : index
    %c0_214 = arith.constant 0 : index
    %277 = vector.load %arg19[%c0_211, %c0_212, %c0_213, %c0_214] : memref<1x4x1x32xf32, #tpu.memory_space<vmem>>, vector<1x1x1x32xf32>
    %278 = vector.shape_cast %277 : vector<1x1x1x32xf32> to vector<1x32xf32>
    %279 = vector.broadcast %278 : vector<1x32xf32> to vector<16x32xf32>
    %280 = arith.addf %276, %279 : vector<16x32xf32>
    %281 = arith.truncf %266 : vector<8x32xf32> to vector<8x32xbf16>
    %282 = arith.truncf %273 : vector<16x32xf32> to vector<16x32xbf16>
    %cst_215 = arith.constant dense<0.000000e+00> : vector<8x16xf32>
    %283 = tpu.matmul %281, %282, %cst_215 {dimension_numbers = #tpu.dot_dimension_numbers<[1], [1], [0], [0], [0, 0, 1, 0], [], []>} : vector<8x32xbf16>, vector<16x32xbf16>, vector<8x16xf32> -> vector<8x16xf32>
    %cst_216 = arith.constant 0.176776692 : f32
    %284 = vector.broadcast %cst_216 : f32 to vector<8x16xf32>
    %285 = arith.mulf %283, %284 : vector<8x16xf32>
    %cst_217 = arith.constant 9.99999971E-10 : f32
    %286 = vector.broadcast %cst_217 : f32 to vector<8x16xf32>
    %287 = arith.select %14, %285, %286 : vector<8x16xi1>, vector<8x16xf32>
    %cst_218 = arith.constant dense<0xFF800000> : vector<8xf32>
    %288 = vector.multi_reduction <maximumf>, %287, %cst_218 [1] : vector<8x16xf32> to vector<8xf32>
    %289 = vector.shape_cast %288 : vector<8xf32> to vector<8x1xf32>
    %290 = vector.broadcast %289 : vector<8x1xf32> to vector<8x16xf32>
    %291 = arith.subf %287, %290 : vector<8x16xf32>
    %292 = math.exp %291 : vector<8x16xf32>
    %cst_219 = arith.constant dense<0.000000e+00> : vector<8xf32>
    %293 = vector.multi_reduction <add>, %292, %cst_219 [1] : vector<8x16xf32> to vector<8xf32>
    %294 = vector.shape_cast %293 : vector<8xf32> to vector<8x1xf32>
    %295 = tpu.reciprocal %294 : vector<8x1xf32> -> vector<8x1xf32>
    %296 = vector.broadcast %295 : vector<8x1xf32> to vector<8x16xf32>
    %297 = arith.mulf %292, %296 : vector<8x16xf32>
    %298 = arith.truncf %297 : vector<8x16xf32> to vector<8x16xbf16>
    %299 = arith.truncf %280 : vector<16x32xf32> to vector<16x32xbf16>
    %cst_220 = arith.constant dense<0.000000e+00> : vector<8x32xf32>
    %300 = tpu.matmul %298, %299, %cst_220 {dimension_numbers = #tpu.dot_dimension_numbers<[1], [0], [0], [1], [0, 0, 1, 1], [], []>} : vector<8x16xbf16>, vector<16x32xbf16>, vector<8x32xf32> -> vector<8x32xf32>
    %301 = arith.truncf %300 : vector<8x32xf32> to vector<8x32xbf16>
    %c0_221 = arith.constant 0 : index
    %c0_222 = arith.constant 0 : index
    %c0_223 = arith.constant 0 : index
    %c0_224 = arith.constant 0 : index
    %302 = vector.load %arg20[%c0_221, %c0_222, %c0_223, %c0_224] : memref<1x4x32x128xbf16, #tpu.memory_space<vmem>>, vector<1x1x32x128xbf16>
    %303 = vector.shape_cast %302 : vector<1x1x32x128xbf16> to vector<32x128xbf16>
    %cst_225 = arith.constant dense<0.000000e+00> : vector<8x128xf32>
    %304 = tpu.matmul %301, %303, %cst_225 {dimension_numbers = #tpu.dot_dimension_numbers<[1], [0], [0], [1], [0, 0, 1, 1], [], []>} : vector<8x32xbf16>, vector<32x128xbf16>, vector<8x128xf32> -> vector<8x128xf32>
    %305 = arith.addf %259, %304 : vector<8x128xf32>
    %c0_226 = arith.constant 0 : index
    %c1_227 = arith.constant 1 : index
    %c0_228 = arith.constant 0 : index
    %c0_229 = arith.constant 0 : index
    %306 = vector.load %arg14[%c0_226, %c1_227, %c0_228, %c0_229] : memref<1x4x128x32xbf16, #tpu.memory_space<vmem>>, vector<1x1x128x32xbf16>
    %307 = vector.shape_cast %306 : vector<1x1x128x32xbf16> to vector<128x32xbf16>
    %cst_230 = arith.constant dense<0.000000e+00> : vector<8x32xf32>
    %308 = tpu.matmul %258, %307, %cst_230 {dimension_numbers = #tpu.dot_dimension_numbers<[1], [0], [0], [1], [0, 0, 1, 1], [], []>} : vector<8x128xbf16>, vector<128x32xbf16>, vector<8x32xf32> -> vector<8x32xf32>
    %c0_231 = arith.constant 0 : index
    %c1_232 = arith.constant 1 : index
    %c0_233 = arith.constant 0 : index
    %c0_234 = arith.constant 0 : index
    %309 = vector.load %arg15[%c0_231, %c1_232, %c0_233, %c0_234] : memref<1x4x1x32xf32, #tpu.memory_space<vmem>>, vector<1x1x1x32xf32>
    %310 = vector.shape_cast %309 : vector<1x1x1x32xf32> to vector<1x32xf32>
    %311 = vector.broadcast %310 : vector<1x32xf32> to vector<8x32xf32>
    %312 = arith.addf %308, %311 : vector<8x32xf32>
    %c0_235 = arith.constant 0 : index
    %c1_236 = arith.constant 1 : index
    %c0_237 = arith.constant 0 : index
    %c0_238 = arith.constant 0 : index
    %313 = vector.load %arg16[%c0_235, %c1_236, %c0_237, %c0_238] : memref<1x4x128x32xbf16, #tpu.memory_space<vmem>>, vector<1x1x128x32xbf16>
    %314 = vector.shape_cast %313 : vector<1x1x128x32xbf16> to vector<128x32xbf16>
    %cst_239 = arith.constant dense<0.000000e+00> : vector<16x32xf32>
    %315 = tpu.matmul %6, %314, %cst_239 {dimension_numbers = #tpu.dot_dimension_numbers<[1], [0], [0], [1], [0, 0, 1, 1], [], []>} : vector<16x128xbf16>, vector<128x32xbf16>, vector<16x32xf32> -> vector<16x32xf32>
    %c0_240 = arith.constant 0 : index
    %c1_241 = arith.constant 1 : index
    %c0_242 = arith.constant 0 : index
    %c0_243 = arith.constant 0 : index
    %316 = vector.load %arg17[%c0_240, %c1_241, %c0_242, %c0_243] : memref<1x4x1x32xf32, #tpu.memory_space<vmem>>, vector<1x1x1x32xf32>
    %317 = vector.shape_cast %316 : vector<1x1x1x32xf32> to vector<1x32xf32>
    %318 = vector.broadcast %317 : vector<1x32xf32> to vector<16x32xf32>
    %319 = arith.addf %315, %318 : vector<16x32xf32>
    %c0_244 = arith.constant 0 : index
    %c1_245 = arith.constant 1 : index
    %c0_246 = arith.constant 0 : index
    %c0_247 = arith.constant 0 : index
    %320 = vector.load %arg18[%c0_244, %c1_245, %c0_246, %c0_247] : memref<1x4x128x32xbf16, #tpu.memory_space<vmem>>, vector<1x1x128x32xbf16>
    %321 = vector.shape_cast %320 : vector<1x1x128x32xbf16> to vector<128x32xbf16>
    %cst_248 = arith.constant dense<0.000000e+00> : vector<16x32xf32>
    %322 = tpu.matmul %6, %321, %cst_248 {dimension_numbers = #tpu.dot_dimension_numbers<[1], [0], [0], [1], [0, 0, 1, 1], [], []>} : vector<16x128xbf16>, vector<128x32xbf16>, vector<16x32xf32> -> vector<16x32xf32>
    %c0_249 = arith.constant 0 : index
    %c1_250 = arith.constant 1 : index
    %c0_251 = arith.constant 0 : index
    %c0_252 = arith.constant 0 : index
    %323 = vector.load %arg19[%c0_249, %c1_250, %c0_251, %c0_252] : memref<1x4x1x32xf32, #tpu.memory_space<vmem>>, vector<1x1x1x32xf32>
    %324 = vector.shape_cast %323 : vector<1x1x1x32xf32> to vector<1x32xf32>
    %325 = vector.broadcast %324 : vector<1x32xf32> to vector<16x32xf32>
    %326 = arith.addf %322, %325 : vector<16x32xf32>
    %327 = arith.truncf %312 : vector<8x32xf32> to vector<8x32xbf16>
    %328 = arith.truncf %319 : vector<16x32xf32> to vector<16x32xbf16>
    %cst_253 = arith.constant dense<0.000000e+00> : vector<8x16xf32>
    %329 = tpu.matmul %327, %328, %cst_253 {dimension_numbers = #tpu.dot_dimension_numbers<[1], [1], [0], [0], [0, 0, 1, 0], [], []>} : vector<8x32xbf16>, vector<16x32xbf16>, vector<8x16xf32> -> vector<8x16xf32>
    %cst_254 = arith.constant 0.176776692 : f32
    %330 = vector.broadcast %cst_254 : f32 to vector<8x16xf32>
    %331 = arith.mulf %329, %330 : vector<8x16xf32>
    %cst_255 = arith.constant 9.99999971E-10 : f32
    %332 = vector.broadcast %cst_255 : f32 to vector<8x16xf32>
    %333 = arith.select %14, %331, %332 : vector<8x16xi1>, vector<8x16xf32>
    %cst_256 = arith.constant dense<0xFF800000> : vector<8xf32>
    %334 = vector.multi_reduction <maximumf>, %333, %cst_256 [1] : vector<8x16xf32> to vector<8xf32>
    %335 = vector.shape_cast %334 : vector<8xf32> to vector<8x1xf32>
    %336 = vector.broadcast %335 : vector<8x1xf32> to vector<8x16xf32>
    %337 = arith.subf %333, %336 : vector<8x16xf32>
    %338 = math.exp %337 : vector<8x16xf32>
    %cst_257 = arith.constant dense<0.000000e+00> : vector<8xf32>
    %339 = vector.multi_reduction <add>, %338, %cst_257 [1] : vector<8x16xf32> to vector<8xf32>
    %340 = vector.shape_cast %339 : vector<8xf32> to vector<8x1xf32>
    %341 = tpu.reciprocal %340 : vector<8x1xf32> -> vector<8x1xf32>
    %342 = vector.broadcast %341 : vector<8x1xf32> to vector<8x16xf32>
    %343 = arith.mulf %338, %342 : vector<8x16xf32>
    %344 = arith.truncf %343 : vector<8x16xf32> to vector<8x16xbf16>
    %345 = arith.truncf %326 : vector<16x32xf32> to vector<16x32xbf16>
    %cst_258 = arith.constant dense<0.000000e+00> : vector<8x32xf32>
    %346 = tpu.matmul %344, %345, %cst_258 {dimension_numbers = #tpu.dot_dimension_numbers<[1], [0], [0], [1], [0, 0, 1, 1], [], []>} : vector<8x16xbf16>, vector<16x32xbf16>, vector<8x32xf32> -> vector<8x32xf32>
    %347 = arith.truncf %346 : vector<8x32xf32> to vector<8x32xbf16>
    %c0_259 = arith.constant 0 : index
    %c1_260 = arith.constant 1 : index
    %c0_261 = arith.constant 0 : index
    %c0_262 = arith.constant 0 : index
    %348 = vector.load %arg20[%c0_259, %c1_260, %c0_261, %c0_262] : memref<1x4x32x128xbf16, #tpu.memory_space<vmem>>, vector<1x1x32x128xbf16>
    %349 = vector.shape_cast %348 : vector<1x1x32x128xbf16> to vector<32x128xbf16>
    %cst_263 = arith.constant dense<0.000000e+00> : vector<8x128xf32>
    %350 = tpu.matmul %347, %349, %cst_263 {dimension_numbers = #tpu.dot_dimension_numbers<[1], [0], [0], [1], [0, 0, 1, 1], [], []>} : vector<8x32xbf16>, vector<32x128xbf16>, vector<8x128xf32> -> vector<8x128xf32>
    %351 = arith.addf %305, %350 : vector<8x128xf32>
    %c0_264 = arith.constant 0 : index
    %c2_265 = arith.constant 2 : index
    %c0_266 = arith.constant 0 : index
    %c0_267 = arith.constant 0 : index
    %352 = vector.load %arg14[%c0_264, %c2_265, %c0_266, %c0_267] : memref<1x4x128x32xbf16, #tpu.memory_space<vmem>>, vector<1x1x128x32xbf16>
    %353 = vector.shape_cast %352 : vector<1x1x128x32xbf16> to vector<128x32xbf16>
    %cst_268 = arith.constant dense<0.000000e+00> : vector<8x32xf32>
    %354 = tpu.matmul %258, %353, %cst_268 {dimension_numbers = #tpu.dot_dimension_numbers<[1], [0], [0], [1], [0, 0, 1, 1], [], []>} : vector<8x128xbf16>, vector<128x32xbf16>, vector<8x32xf32> -> vector<8x32xf32>
    %c0_269 = arith.constant 0 : index
    %c2_270 = arith.constant 2 : index
    %c0_271 = arith.constant 0 : index
    %c0_272 = arith.constant 0 : index
    %355 = vector.load %arg15[%c0_269, %c2_270, %c0_271, %c0_272] : memref<1x4x1x32xf32, #tpu.memory_space<vmem>>, vector<1x1x1x32xf32>
    %356 = vector.shape_cast %355 : vector<1x1x1x32xf32> to vector<1x32xf32>
    %357 = vector.broadcast %356 : vector<1x32xf32> to vector<8x32xf32>
    %358 = arith.addf %354, %357 : vector<8x32xf32>
    %c0_273 = arith.constant 0 : index
    %c2_274 = arith.constant 2 : index
    %c0_275 = arith.constant 0 : index
    %c0_276 = arith.constant 0 : index
    %359 = vector.load %arg16[%c0_273, %c2_274, %c0_275, %c0_276] : memref<1x4x128x32xbf16, #tpu.memory_space<vmem>>, vector<1x1x128x32xbf16>
    %360 = vector.shape_cast %359 : vector<1x1x128x32xbf16> to vector<128x32xbf16>
    %cst_277 = arith.constant dense<0.000000e+00> : vector<16x32xf32>
    %361 = tpu.matmul %6, %360, %cst_277 {dimension_numbers = #tpu.dot_dimension_numbers<[1], [0], [0], [1], [0, 0, 1, 1], [], []>} : vector<16x128xbf16>, vector<128x32xbf16>, vector<16x32xf32> -> vector<16x32xf32>
    %c0_278 = arith.constant 0 : index
    %c2_279 = arith.constant 2 : index
    %c0_280 = arith.constant 0 : index
    %c0_281 = arith.constant 0 : index
    %362 = vector.load %arg17[%c0_278, %c2_279, %c0_280, %c0_281] : memref<1x4x1x32xf32, #tpu.memory_space<vmem>>, vector<1x1x1x32xf32>
    %363 = vector.shape_cast %362 : vector<1x1x1x32xf32> to vector<1x32xf32>
    %364 = vector.broadcast %363 : vector<1x32xf32> to vector<16x32xf32>
    %365 = arith.addf %361, %364 : vector<16x32xf32>
    %c0_282 = arith.constant 0 : index
    %c2_283 = arith.constant 2 : index
    %c0_284 = arith.constant 0 : index
    %c0_285 = arith.constant 0 : index
    %366 = vector.load %arg18[%c0_282, %c2_283, %c0_284, %c0_285] : memref<1x4x128x32xbf16, #tpu.memory_space<vmem>>, vector<1x1x128x32xbf16>
    %367 = vector.shape_cast %366 : vector<1x1x128x32xbf16> to vector<128x32xbf16>
    %cst_286 = arith.constant dense<0.000000e+00> : vector<16x32xf32>
    %368 = tpu.matmul %6, %367, %cst_286 {dimension_numbers = #tpu.dot_dimension_numbers<[1], [0], [0], [1], [0, 0, 1, 1], [], []>} : vector<16x128xbf16>, vector<128x32xbf16>, vector<16x32xf32> -> vector<16x32xf32>
    %c0_287 = arith.constant 0 : index
    %c2_288 = arith.constant 2 : index
    %c0_289 = arith.constant 0 : index
    %c0_290 = arith.constant 0 : index
    %369 = vector.load %arg19[%c0_287, %c2_288, %c0_289, %c0_290] : memref<1x4x1x32xf32, #tpu.memory_space<vmem>>, vector<1x1x1x32xf32>
    %370 = vector.shape_cast %369 : vector<1x1x1x32xf32> to vector<1x32xf32>
    %371 = vector.broadcast %370 : vector<1x32xf32> to vector<16x32xf32>
    %372 = arith.addf %368, %371 : vector<16x32xf32>
    %373 = arith.truncf %358 : vector<8x32xf32> to vector<8x32xbf16>
    %374 = arith.truncf %365 : vector<16x32xf32> to vector<16x32xbf16>
    %cst_291 = arith.constant dense<0.000000e+00> : vector<8x16xf32>
    %375 = tpu.matmul %373, %374, %cst_291 {dimension_numbers = #tpu.dot_dimension_numbers<[1], [1], [0], [0], [0, 0, 1, 0], [], []>} : vector<8x32xbf16>, vector<16x32xbf16>, vector<8x16xf32> -> vector<8x16xf32>
    %cst_292 = arith.constant 0.176776692 : f32
    %376 = vector.broadcast %cst_292 : f32 to vector<8x16xf32>
    %377 = arith.mulf %375, %376 : vector<8x16xf32>
    %cst_293 = arith.constant 9.99999971E-10 : f32
    %378 = vector.broadcast %cst_293 : f32 to vector<8x16xf32>
    %379 = arith.select %14, %377, %378 : vector<8x16xi1>, vector<8x16xf32>
    %cst_294 = arith.constant dense<0xFF800000> : vector<8xf32>
    %380 = vector.multi_reduction <maximumf>, %379, %cst_294 [1] : vector<8x16xf32> to vector<8xf32>
    %381 = vector.shape_cast %380 : vector<8xf32> to vector<8x1xf32>
    %382 = vector.broadcast %381 : vector<8x1xf32> to vector<8x16xf32>
    %383 = arith.subf %379, %382 : vector<8x16xf32>
    %384 = math.exp %383 : vector<8x16xf32>
    %cst_295 = arith.constant dense<0.000000e+00> : vector<8xf32>
    %385 = vector.multi_reduction <add>, %384, %cst_295 [1] : vector<8x16xf32> to vector<8xf32>
    %386 = vector.shape_cast %385 : vector<8xf32> to vector<8x1xf32>
    %387 = tpu.reciprocal %386 : vector<8x1xf32> -> vector<8x1xf32>
    %388 = vector.broadcast %387 : vector<8x1xf32> to vector<8x16xf32>
    %389 = arith.mulf %384, %388 : vector<8x16xf32>
    %390 = arith.truncf %389 : vector<8x16xf32> to vector<8x16xbf16>
    %391 = arith.truncf %372 : vector<16x32xf32> to vector<16x32xbf16>
    %cst_296 = arith.constant dense<0.000000e+00> : vector<8x32xf32>
    %392 = tpu.matmul %390, %391, %cst_296 {dimension_numbers = #tpu.dot_dimension_numbers<[1], [0], [0], [1], [0, 0, 1, 1], [], []>} : vector<8x16xbf16>, vector<16x32xbf16>, vector<8x32xf32> -> vector<8x32xf32>
    %393 = arith.truncf %392 : vector<8x32xf32> to vector<8x32xbf16>
    %c0_297 = arith.constant 0 : index
    %c2_298 = arith.constant 2 : index
    %c0_299 = arith.constant 0 : index
    %c0_300 = arith.constant 0 : index
    %394 = vector.load %arg20[%c0_297, %c2_298, %c0_299, %c0_300] : memref<1x4x32x128xbf16, #tpu.memory_space<vmem>>, vector<1x1x32x128xbf16>
    %395 = vector.shape_cast %394 : vector<1x1x32x128xbf16> to vector<32x128xbf16>
    %cst_301 = arith.constant dense<0.000000e+00> : vector<8x128xf32>
    %396 = tpu.matmul %393, %395, %cst_301 {dimension_numbers = #tpu.dot_dimension_numbers<[1], [0], [0], [1], [0, 0, 1, 1], [], []>} : vector<8x32xbf16>, vector<32x128xbf16>, vector<8x128xf32> -> vector<8x128xf32>
    %397 = arith.addf %351, %396 : vector<8x128xf32>
    %c0_302 = arith.constant 0 : index
    %c3_303 = arith.constant 3 : index
    %c0_304 = arith.constant 0 : index
    %c0_305 = arith.constant 0 : index
    %398 = vector.load %arg14[%c0_302, %c3_303, %c0_304, %c0_305] : memref<1x4x128x32xbf16, #tpu.memory_space<vmem>>, vector<1x1x128x32xbf16>
    %399 = vector.shape_cast %398 : vector<1x1x128x32xbf16> to vector<128x32xbf16>
    %cst_306 = arith.constant dense<0.000000e+00> : vector<8x32xf32>
    %400 = tpu.matmul %258, %399, %cst_306 {dimension_numbers = #tpu.dot_dimension_numbers<[1], [0], [0], [1], [0, 0, 1, 1], [], []>} : vector<8x128xbf16>, vector<128x32xbf16>, vector<8x32xf32> -> vector<8x32xf32>
    %c0_307 = arith.constant 0 : index
    %c3_308 = arith.constant 3 : index
    %c0_309 = arith.constant 0 : index
    %c0_310 = arith.constant 0 : index
    %401 = vector.load %arg15[%c0_307, %c3_308, %c0_309, %c0_310] : memref<1x4x1x32xf32, #tpu.memory_space<vmem>>, vector<1x1x1x32xf32>
    %402 = vector.shape_cast %401 : vector<1x1x1x32xf32> to vector<1x32xf32>
    %403 = vector.broadcast %402 : vector<1x32xf32> to vector<8x32xf32>
    %404 = arith.addf %400, %403 : vector<8x32xf32>
    %c0_311 = arith.constant 0 : index
    %c3_312 = arith.constant 3 : index
    %c0_313 = arith.constant 0 : index
    %c0_314 = arith.constant 0 : index
    %405 = vector.load %arg16[%c0_311, %c3_312, %c0_313, %c0_314] : memref<1x4x128x32xbf16, #tpu.memory_space<vmem>>, vector<1x1x128x32xbf16>
    %406 = vector.shape_cast %405 : vector<1x1x128x32xbf16> to vector<128x32xbf16>
    %cst_315 = arith.constant dense<0.000000e+00> : vector<16x32xf32>
    %407 = tpu.matmul %6, %406, %cst_315 {dimension_numbers = #tpu.dot_dimension_numbers<[1], [0], [0], [1], [0, 0, 1, 1], [], []>} : vector<16x128xbf16>, vector<128x32xbf16>, vector<16x32xf32> -> vector<16x32xf32>
    %c0_316 = arith.constant 0 : index
    %c3_317 = arith.constant 3 : index
    %c0_318 = arith.constant 0 : index
    %c0_319 = arith.constant 0 : index
    %408 = vector.load %arg17[%c0_316, %c3_317, %c0_318, %c0_319] : memref<1x4x1x32xf32, #tpu.memory_space<vmem>>, vector<1x1x1x32xf32>
    %409 = vector.shape_cast %408 : vector<1x1x1x32xf32> to vector<1x32xf32>
    %410 = vector.broadcast %409 : vector<1x32xf32> to vector<16x32xf32>
    %411 = arith.addf %407, %410 : vector<16x32xf32>
    %c0_320 = arith.constant 0 : index
    %c3_321 = arith.constant 3 : index
    %c0_322 = arith.constant 0 : index
    %c0_323 = arith.constant 0 : index
    %412 = vector.load %arg18[%c0_320, %c3_321, %c0_322, %c0_323] : memref<1x4x128x32xbf16, #tpu.memory_space<vmem>>, vector<1x1x128x32xbf16>
    %413 = vector.shape_cast %412 : vector<1x1x128x32xbf16> to vector<128x32xbf16>
    %cst_324 = arith.constant dense<0.000000e+00> : vector<16x32xf32>
    %414 = tpu.matmul %6, %413, %cst_324 {dimension_numbers = #tpu.dot_dimension_numbers<[1], [0], [0], [1], [0, 0, 1, 1], [], []>} : vector<16x128xbf16>, vector<128x32xbf16>, vector<16x32xf32> -> vector<16x32xf32>
    %c0_325 = arith.constant 0 : index
    %c3_326 = arith.constant 3 : index
    %c0_327 = arith.constant 0 : index
    %c0_328 = arith.constant 0 : index
    %415 = vector.load %arg19[%c0_325, %c3_326, %c0_327, %c0_328] : memref<1x4x1x32xf32, #tpu.memory_space<vmem>>, vector<1x1x1x32xf32>
    %416 = vector.shape_cast %415 : vector<1x1x1x32xf32> to vector<1x32xf32>
    %417 = vector.broadcast %416 : vector<1x32xf32> to vector<16x32xf32>
    %418 = arith.addf %414, %417 : vector<16x32xf32>
    %419 = arith.truncf %404 : vector<8x32xf32> to vector<8x32xbf16>
    %420 = arith.truncf %411 : vector<16x32xf32> to vector<16x32xbf16>
    %cst_329 = arith.constant dense<0.000000e+00> : vector<8x16xf32>
    %421 = tpu.matmul %419, %420, %cst_329 {dimension_numbers = #tpu.dot_dimension_numbers<[1], [1], [0], [0], [0, 0, 1, 0], [], []>} : vector<8x32xbf16>, vector<16x32xbf16>, vector<8x16xf32> -> vector<8x16xf32>
    %cst_330 = arith.constant 0.176776692 : f32
    %422 = vector.broadcast %cst_330 : f32 to vector<8x16xf32>
    %423 = arith.mulf %421, %422 : vector<8x16xf32>
    %cst_331 = arith.constant 9.99999971E-10 : f32
    %424 = vector.broadcast %cst_331 : f32 to vector<8x16xf32>
    %425 = arith.select %14, %423, %424 : vector<8x16xi1>, vector<8x16xf32>
    %cst_332 = arith.constant dense<0xFF800000> : vector<8xf32>
    %426 = vector.multi_reduction <maximumf>, %425, %cst_332 [1] : vector<8x16xf32> to vector<8xf32>
    %427 = vector.shape_cast %426 : vector<8xf32> to vector<8x1xf32>
    %428 = vector.broadcast %427 : vector<8x1xf32> to vector<8x16xf32>
    %429 = arith.subf %425, %428 : vector<8x16xf32>
    %430 = math.exp %429 : vector<8x16xf32>
    %cst_333 = arith.constant dense<0.000000e+00> : vector<8xf32>
    %431 = vector.multi_reduction <add>, %430, %cst_333 [1] : vector<8x16xf32> to vector<8xf32>
    %432 = vector.shape_cast %431 : vector<8xf32> to vector<8x1xf32>
    %433 = tpu.reciprocal %432 : vector<8x1xf32> -> vector<8x1xf32>
    %434 = vector.broadcast %433 : vector<8x1xf32> to vector<8x16xf32>
    %435 = arith.mulf %430, %434 : vector<8x16xf32>
    %436 = arith.truncf %435 : vector<8x16xf32> to vector<8x16xbf16>
    %437 = arith.truncf %418 : vector<16x32xf32> to vector<16x32xbf16>
    %cst_334 = arith.constant dense<0.000000e+00> : vector<8x32xf32>
    %438 = tpu.matmul %436, %437, %cst_334 {dimension_numbers = #tpu.dot_dimension_numbers<[1], [0], [0], [1], [0, 0, 1, 1], [], []>} : vector<8x16xbf16>, vector<16x32xbf16>, vector<8x32xf32> -> vector<8x32xf32>
    %439 = arith.truncf %438 : vector<8x32xf32> to vector<8x32xbf16>
    %c0_335 = arith.constant 0 : index
    %c3_336 = arith.constant 3 : index
    %c0_337 = arith.constant 0 : index
    %c0_338 = arith.constant 0 : index
    %440 = vector.load %arg20[%c0_335, %c3_336, %c0_337, %c0_338] : memref<1x4x32x128xbf16, #tpu.memory_space<vmem>>, vector<1x1x32x128xbf16>
    %441 = vector.shape_cast %440 : vector<1x1x32x128xbf16> to vector<32x128xbf16>
    %cst_339 = arith.constant dense<0.000000e+00> : vector<8x128xf32>
    %442 = tpu.matmul %439, %441, %cst_339 {dimension_numbers = #tpu.dot_dimension_numbers<[1], [0], [0], [1], [0, 0, 1, 1], [], []>} : vector<8x32xbf16>, vector<32x128xbf16>, vector<8x128xf32> -> vector<8x128xf32>
    %443 = arith.addf %397, %442 : vector<8x128xf32>
    %c0_340 = arith.constant 0 : index
    %c0_341 = arith.constant 0 : index
    %c0_342 = arith.constant 0 : index
    %444 = vector.load %arg21[%c0_340, %c0_341, %c0_342] : memref<1x1x128xf32, #tpu.memory_space<vmem>>, vector<1x1x128xf32>
    %445 = vector.shape_cast %444 : vector<1x1x128xf32> to vector<1x128xf32>
    %446 = vector.broadcast %445 : vector<1x128xf32> to vector<8x128xf32>
    %447 = arith.addf %443, %446 : vector<8x128xf32>
    %448 = arith.addf %231, %447 : vector<8x128xf32>
    %c0_343 = arith.constant 0 : index
    %c0_344 = arith.constant 0 : index
    %c0_345 = arith.constant 0 : index
    %449 = vector.load %arg30[%c0_343, %c0_344, %c0_345] : memref<1x1x128xf32, #tpu.memory_space<vmem>>, vector<1x1x128xf32>
    %450 = vector.shape_cast %449 : vector<1x1x128xf32> to vector<1x128xf32>
    %c0_346 = arith.constant 0 : index
    %c0_347 = arith.constant 0 : index
    %c0_348 = arith.constant 0 : index
    %451 = vector.load %arg31[%c0_346, %c0_347, %c0_348] : memref<1x1x128xf32, #tpu.memory_space<vmem>>, vector<1x1x128xf32>
    %452 = vector.shape_cast %451 : vector<1x1x128xf32> to vector<1x128xf32>
    %cst_349 = arith.constant dense<0.000000e+00> : vector<8xf32>
    %453 = vector.multi_reduction <add>, %448, %cst_349 [1] : vector<8x128xf32> to vector<8xf32>
    %454 = vector.shape_cast %453 : vector<8xf32> to vector<8x1xf32>
    %cst_350 = arith.constant 1.280000e+02 : f32
    %455 = vector.broadcast %cst_350 : f32 to vector<8x1xf32>
    %456 = arith.divf %454, %455 : vector<8x1xf32>
    %457 = vector.broadcast %456 : vector<8x1xf32> to vector<8x128xf32>
    %458 = arith.subf %448, %457 : vector<8x128xf32>
    %459 = arith.mulf %458, %458 : vector<8x128xf32>
    %cst_351 = arith.constant dense<0.000000e+00> : vector<8xf32>
    %460 = vector.multi_reduction <add>, %459, %cst_351 [1] : vector<8x128xf32> to vector<8xf32>
    %461 = vector.shape_cast %460 : vector<8xf32> to vector<8x1xf32>
    %cst_352 = arith.constant 1.280000e+02 : f32
    %462 = vector.broadcast %cst_352 : f32 to vector<8x1xf32>
    %463 = arith.divf %461, %462 : vector<8x1xf32>
    %464 = vector.broadcast %456 : vector<8x1xf32> to vector<8x128xf32>
    %465 = arith.subf %448, %464 : vector<8x128xf32>
    %cst_353 = arith.constant 9.99999974E-6 : f32
    %466 = vector.broadcast %cst_353 : f32 to vector<8x1xf32>
    %467 = arith.addf %463, %466 : vector<8x1xf32>
    %468 = math.rsqrt %467 : vector<8x1xf32>
    %469 = vector.broadcast %468 : vector<8x1xf32> to vector<8x128xf32>
    %470 = arith.mulf %465, %469 : vector<8x128xf32>
    %471 = vector.broadcast %450 : vector<1x128xf32> to vector<8x128xf32>
    %472 = arith.mulf %470, %471 : vector<8x128xf32>
    %473 = vector.broadcast %452 : vector<1x128xf32> to vector<8x128xf32>
    %474 = arith.addf %472, %473 : vector<8x128xf32>
    %475 = arith.truncf %474 : vector<8x128xf32> to vector<8x128xbf16>
    %c0_354 = arith.constant 0 : index
    %c0_355 = arith.constant 0 : index
    %c0_356 = arith.constant 0 : index
    %476 = vector.load %arg22[%c0_354, %c0_355, %c0_356] : memref<1x128x256xbf16, #tpu.memory_space<vmem>>, vector<1x128x256xbf16>
    %477 = vector.shape_cast %476 : vector<1x128x256xbf16> to vector<128x256xbf16>
    %cst_357 = arith.constant dense<0.000000e+00> : vector<8x256xf32>
    %478 = tpu.matmul %475, %477, %cst_357 {dimension_numbers = #tpu.dot_dimension_numbers<[1], [0], [0], [1], [0, 0, 1, 1], [], []>} : vector<8x128xbf16>, vector<128x256xbf16>, vector<8x256xf32> -> vector<8x256xf32>
    %c0_358 = arith.constant 0 : index
    %c0_359 = arith.constant 0 : index
    %c0_360 = arith.constant 0 : index
    %479 = vector.load %arg23[%c0_358, %c0_359, %c0_360] : memref<1x1x256xf32, #tpu.memory_space<vmem>>, vector<1x1x256xf32>
    %480 = vector.shape_cast %479 : vector<1x1x256xf32> to vector<1x256xf32>
    %481 = vector.broadcast %480 : vector<1x256xf32> to vector<8x256xf32>
    %482 = arith.addf %478, %481 : vector<8x256xf32>
    %cst_361 = arith.constant 0.000000e+00 : f32
    %483 = vector.broadcast %cst_361 : f32 to vector<8x256xf32>
    %484 = arith.maximumf %482, %483 : vector<8x256xf32>
    %485 = arith.truncf %484 : vector<8x256xf32> to vector<8x256xbf16>
    %c0_362 = arith.constant 0 : index
    %c0_363 = arith.constant 0 : index
    %c0_364 = arith.constant 0 : index
    %486 = vector.load %arg24[%c0_362, %c0_363, %c0_364] : memref<1x256x128xbf16, #tpu.memory_space<vmem>>, vector<1x256x128xbf16>
    %487 = vector.shape_cast %486 : vector<1x256x128xbf16> to vector<256x128xbf16>
    %cst_365 = arith.constant dense<0.000000e+00> : vector<8x128xf32>
    %488 = tpu.matmul %485, %487, %cst_365 {dimension_numbers = #tpu.dot_dimension_numbers<[1], [0], [0], [1], [0, 0, 1, 1], [], []>} : vector<8x256xbf16>, vector<256x128xbf16>, vector<8x128xf32> -> vector<8x128xf32>
    %489 = arith.addf %448, %488 : vector<8x128xf32>
    %c0_366 = arith.constant 0 : index
    %c0_367 = arith.constant 0 : index
    %c0_368 = arith.constant 0 : index
    %490 = vector.load %arg25[%c0_366, %c0_367, %c0_368] : memref<1x1x128xf32, #tpu.memory_space<vmem>>, vector<1x1x128xf32>
    %491 = vector.shape_cast %490 : vector<1x1x128xf32> to vector<1x128xf32>
    %492 = vector.broadcast %491 : vector<1x128xf32> to vector<8x128xf32>
    %493 = arith.addf %489, %492 : vector<8x128xf32>
    %c0_369 = arith.constant 0 : index
    %c0_370 = arith.constant 0 : index
    %494 = vector.load %arg35[%c0_369, %c0_370] : memref<8x128xf32, #tpu.memory_space<vmem>>, vector<8x128xf32>
    tpu.vector_store %arg35[%c0_369, %c0_370], %493 {strides = array<i32>} : memref<8x128xf32, #tpu.memory_space<vmem>>, vector<8x128xf32>,
    %c1_i32 = arith.constant 1 : i32
    %495 = arith.cmpi eq, %arg1, %c1_i32 : i32
    %496 = arith.extui %495 : i1 to i32
    %c0_i32_371 = arith.constant 0 : i32
    %497 = arith.cmpi ne, %496, %c0_i32_371 : i32
    scf.if %497 {
      %c0_372 = arith.constant 0 : index
      %c0_373 = arith.constant 0 : index
      %498 = vector.load %arg32[%c0_372, %c0_373] : memref<1x128xf32, #tpu.memory_space<vmem>>, vector<1x128xf32>
      %c0_374 = arith.constant 0 : index
      %c0_375 = arith.constant 0 : index
      %499 = vector.load %arg33[%c0_374, %c0_375] : memref<1x128xf32, #tpu.memory_space<vmem>>, vector<1x128xf32>
      %cst_376 = arith.constant dense<0.000000e+00> : vector<8xf32>
      %500 = vector.multi_reduction <add>, %493, %cst_376 [1] : vector<8x128xf32> to vector<8xf32>
      %501 = vector.shape_cast %500 : vector<8xf32> to vector<8x1xf32>
      %cst_377 = arith.constant 1.280000e+02 : f32
      %502 = vector.broadcast %cst_377 : f32 to vector<8x1xf32>
      %503 = arith.divf %501, %502 : vector<8x1xf32>
      %504 = vector.broadcast %503 : vector<8x1xf32> to vector<8x128xf32>
      %505 = arith.subf %493, %504 : vector<8x128xf32>
      %506 = arith.mulf %505, %505 : vector<8x128xf32>
      %cst_378 = arith.constant dense<0.000000e+00> : vector<8xf32>
      %507 = vector.multi_reduction <add>, %506, %cst_378 [1] : vector<8x128xf32> to vector<8xf32>
      %508 = vector.shape_cast %507 : vector<8xf32> to vector<8x1xf32>
      %cst_379 = arith.constant 1.280000e+02 : f32
      %509 = vector.broadcast %cst_379 : f32 to vector<8x1xf32>
      %510 = arith.divf %508, %509 : vector<8x1xf32>
      %511 = vector.broadcast %503 : vector<8x1xf32> to vector<8x128xf32>
      %512 = arith.subf %493, %511 : vector<8x128xf32>
      %cst_380 = arith.constant 9.99999974E-6 : f32
      %513 = vector.broadcast %cst_380 : f32 to vector<8x1xf32>
      %514 = arith.addf %510, %513 : vector<8x1xf32>
      %515 = math.rsqrt %514 : vector<8x1xf32>
      %516 = vector.broadcast %515 : vector<8x1xf32> to vector<8x128xf32>
      %517 = arith.mulf %512, %516 : vector<8x128xf32>
      %518 = vector.broadcast %498 : vector<1x128xf32> to vector<8x128xf32>
      %519 = arith.mulf %517, %518 : vector<8x128xf32>
      %520 = vector.broadcast %499 : vector<1x128xf32> to vector<8x128xf32>
      %521 = arith.addf %519, %520 : vector<8x128xf32>
      %c0_381 = arith.constant 0 : index
      %c0_382 = arith.constant 0 : index
      %c0_383 = arith.constant 0 : index
      %522 = vector.load %arg34[%c0_381, %c0_382, %c0_383] : memref<1x8x128xf32, #tpu.memory_space<vmem>>, vector<1x8x128xf32>
      %523 = vector.shape_cast %522 : vector<1x8x128xf32> to vector<8x128xf32>
      %524 = vector.shape_cast %521 : vector<8x128xf32> to vector<1x8x128xf32>
      tpu.vector_store %arg34[%c0_381, %c0_382, %c0_383], %524 {strides = array<i32>} : memref<1x8x128xf32, #tpu.memory_space<vmem>>, vector<1x8x128xf32>,
    } else {
    }
    return
  }
  func.func @transform_0(%arg0: i32, %arg1: i32) -> (i32, i32, i32) {
    %c0_i32 = arith.constant 0 : i32
    %c0_i32_0 = arith.constant 0 : i32
    %c0_i32_1 = arith.constant 0 : i32
    return %arg0, %c0_i32, %c0_i32_0 : i32, i32, i32
  }
  func.func @transform_1(%arg0: i32, %arg1: i32) -> (i32, i32, i32) {
    %c0_i32 = arith.constant 0 : i32
    %c0_i32_0 = arith.constant 0 : i32
    %c0_i32_1 = arith.constant 0 : i32
    return %arg0, %c0_i32, %c0_i32_0 : i32, i32, i32
  }
  func.func @transform_2(%arg0: i32, %arg1: i32) -> (i32, i32, i32) {
    %c0_i32 = arith.constant 0 : i32
    %c0_i32_0 = arith.constant 0 : i32
    %c0_i32_1 = arith.constant 0 : i32
    %c0_i32_2 = arith.constant 0 : i32
    return %c0_i32, %c0_i32_0, %c0_i32_1 : i32, i32, i32
  }
  func.func @transform_3(%arg0: i32, %arg1: i32) -> (i32, i32, i32) {
    %c0_i32 = arith.constant 0 : i32
    %c0_i32_0 = arith.constant 0 : i32
    %c0_i32_1 = arith.constant 0 : i32
    %c0_i32_2 = arith.constant 0 : i32
    return %c0_i32, %c0_i32_0, %c0_i32_1 : i32, i32, i32
  }
  func.func @transform_4(%arg0: i32, %arg1: i32) -> (i32, i32, i32, i32) {
    %c0_i32 = arith.constant 0 : i32
    %c0_i32_0 = arith.constant 0 : i32
    %c0_i32_1 = arith.constant 0 : i32
    %c0_i32_2 = arith.constant 0 : i32
    return %arg1, %c0_i32, %c0_i32_0, %c0_i32_1 : i32, i32, i32, i32
  }
  func.func @transform_5(%arg0: i32, %arg1: i32) -> (i32, i32, i32, i32) {
    %c0_i32 = arith.constant 0 : i32
    %c0_i32_0 = arith.constant 0 : i32
    %c0_i32_1 = arith.constant 0 : i32
    %c0_i32_2 = arith.constant 0 : i32
    return %arg1, %c0_i32, %c0_i32_0, %c0_i32_1 : i32, i32, i32, i32
  }
  func.func @transform_6(%arg0: i32, %arg1: i32) -> (i32, i32, i32, i32) {
    %c0_i32 = arith.constant 0 : i32
    %c0_i32_0 = arith.constant 0 : i32
    %c0_i32_1 = arith.constant 0 : i32
    %c0_i32_2 = arith.constant 0 : i32
    return %arg1, %c0_i32, %c0_i32_0, %c0_i32_1 : i32, i32, i32, i32
  }
  func.func @transform_7(%arg0: i32, %arg1: i32) -> (i32, i32, i32, i32) {
    %c0_i32 = arith.constant 0 : i32
    %c0_i32_0 = arith.constant 0 : i32
    %c0_i32_1 = arith.constant 0 : i32
    %c0_i32_2 = arith.constant 0 : i32
    return %arg1, %c0_i32, %c0_i32_0, %c0_i32_1 : i32, i32, i32, i32
  }
  func.func @transform_8(%arg0: i32, %arg1: i32) -> (i32, i32, i32, i32) {
    %c0_i32 = arith.constant 0 : i32
    %c0_i32_0 = arith.constant 0 : i32
    %c0_i32_1 = arith.constant 0 : i32
    %c0_i32_2 = arith.constant 0 : i32
    return %arg1, %c0_i32, %c0_i32_0, %c0_i32_1 : i32, i32, i32, i32
  }
  func.func @transform_9(%arg0: i32, %arg1: i32) -> (i32, i32, i32, i32) {
    %c0_i32 = arith.constant 0 : i32
    %c0_i32_0 = arith.constant 0 : i32
    %c0_i32_1 = arith.constant 0 : i32
    %c0_i32_2 = arith.constant 0 : i32
    return %arg1, %c0_i32, %c0_i32_0, %c0_i32_1 : i32, i32, i32, i32
  }
  func.func @transform_10(%arg0: i32, %arg1: i32) -> (i32, i32, i32, i32) {
    %c0_i32 = arith.constant 0 : i32
    %c0_i32_0 = arith.constant 0 : i32
    %c0_i32_1 = arith.constant 0 : i32
    %c0_i32_2 = arith.constant 0 : i32
    return %arg1, %c0_i32, %c0_i32_0, %c0_i32_1 : i32, i32, i32, i32
  }
  func.func @transform_11(%arg0: i32, %arg1: i32) -> (i32, i32, i32) {
    %c0_i32 = arith.constant 0 : i32
    %c0_i32_0 = arith.constant 0 : i32
    %c0_i32_1 = arith.constant 0 : i32
    return %arg1, %c0_i32, %c0_i32_0 : i32, i32, i32
  }
  func.func @transform_12(%arg0: i32, %arg1: i32) -> (i32, i32, i32, i32) {
    %c0_i32 = arith.constant 0 : i32
    %c0_i32_0 = arith.constant 0 : i32
    %c0_i32_1 = arith.constant 0 : i32
    %c0_i32_2 = arith.constant 0 : i32
    return %arg1, %c0_i32, %c0_i32_0, %c0_i32_1 : i32, i32, i32, i32
  }
  func.func @transform_13(%arg0: i32, %arg1: i32) -> (i32, i32, i32, i32) {
    %c0_i32 = arith.constant 0 : i32
    %c0_i32_0 = arith.constant 0 : i32
    %c0_i32_1 = arith.constant 0 : i32
    %c0_i32_2 = arith.constant 0 : i32
    return %arg1, %c0_i32, %c0_i32_0, %c0_i32_1 : i32, i32, i32, i32
  }
  func.func @transform_14(%arg0: i32, %arg1: i32) -> (i32, i32, i32, i32) {
    %c0_i32 = arith.constant 0 : i32
    %c0_i32_0 = arith.constant 0 : i32
    %c0_i32_1 = arith.constant 0 : i32
    %c0_i32_2 = arith.constant 0 : i32
    return %arg1, %c0_i32, %c0_i32_0, %c0_i32_1 : i32, i32, i32, i32
  }
  func.func @transform_15(%arg0: i32, %arg1: i32) -> (i32, i32, i32, i32) {
    %c0_i32 = arith.constant 0 : i32
    %c0_i32_0 = arith.constant 0 : i32
    %c0_i32_1 = arith.constant 0 : i32
    %c0_i32_2 = arith.constant 0 : i32
    return %arg1, %c0_i32, %c0_i32_0, %c0_i32_1 : i32, i32, i32, i32
  }
  func.func @transform_16(%arg0: i32, %arg1: i32) -> (i32, i32, i32, i32) {
    %c0_i32 = arith.constant 0 : i32
    %c0_i32_0 = arith.constant 0 : i32
    %c0_i32_1 = arith.constant 0 : i32
    %c0_i32_2 = arith.constant 0 : i32
    return %arg1, %c0_i32, %c0_i32_0, %c0_i32_1 : i32, i32, i32, i32
  }
  func.func @transform_17(%arg0: i32, %arg1: i32) -> (i32, i32, i32, i32) {
    %c0_i32 = arith.constant 0 : i32
    %c0_i32_0 = arith.constant 0 : i32
    %c0_i32_1 = arith.constant 0 : i32
    %c0_i32_2 = arith.constant 0 : i32
    return %arg1, %c0_i32, %c0_i32_0, %c0_i32_1 : i32, i32, i32, i32
  }
  func.func @transform_18(%arg0: i32, %arg1: i32) -> (i32, i32, i32, i32) {
    %c0_i32 = arith.constant 0 : i32
    %c0_i32_0 = arith.constant 0 : i32
    %c0_i32_1 = arith.constant 0 : i32
    %c0_i32_2 = arith.constant 0 : i32
    return %arg1, %c0_i32, %c0_i32_0, %c0_i32_1 : i32, i32, i32, i32
  }
  func.func @transform_19(%arg0: i32, %arg1: i32) -> (i32, i32, i32) {
    %c0_i32 = arith.constant 0 : i32
    %c0_i32_0 = arith.constant 0 : i32
    %c0_i32_1 = arith.constant 0 : i32
    return %arg1, %c0_i32, %c0_i32_0 : i32, i32, i32
  }
  func.func @transform_20(%arg0: i32, %arg1: i32) -> (i32, i32, i32) {
    %c0_i32 = arith.constant 0 : i32
    %c0_i32_0 = arith.constant 0 : i32
    %c0_i32_1 = arith.constant 0 : i32
    return %arg1, %c0_i32, %c0_i32_0 : i32, i32, i32
  }
  func.func @transform_21(%arg0: i32, %arg1: i32) -> (i32, i32, i32) {
    %c0_i32 = arith.constant 0 : i32
    %c0_i32_0 = arith.constant 0 : i32
    %c0_i32_1 = arith.constant 0 : i32
    return %arg1, %c0_i32, %c0_i32_0 : i32, i32, i32
  }
  func.func @transform_22(%arg0: i32, %arg1: i32) -> (i32, i32, i32) {
    %c0_i32 = arith.constant 0 : i32
    %c0_i32_0 = arith.constant 0 : i32
    %c0_i32_1 = arith.constant 0 : i32
    return %arg1, %c0_i32, %c0_i32_0 : i32, i32, i32
  }
  func.func @transform_23(%arg0: i32, %arg1: i32) -> (i32, i32, i32) {
    %c0_i32 = arith.constant 0 : i32
    %c0_i32_0 = arith.constant 0 : i32
    %c0_i32_1 = arith.constant 0 : i32
    return %arg1, %c0_i32, %c0_i32_0 : i32, i32, i32
  }
  func.func @transform_24(%arg0: i32, %arg1: i32) -> (i32, i32, i32) {
    %c0_i32 = arith.constant 0 : i32
    %c0_i32_0 = arith.constant 0 : i32
    %c0_i32_1 = arith.constant 0 : i32
    return %arg1, %c0_i32, %c0_i32_0 : i32, i32, i32
  }
  func.func @transform_25(%arg0: i32, %arg1: i32) -> (i32, i32, i32) {
    %c0_i32 = arith.constant 0 : i32
    %c0_i32_0 = arith.constant 0 : i32
    %c0_i32_1 = arith.constant 0 : i32
    return %arg1, %c0_i32, %c0_i32_0 : i32, i32, i32
  }
  func.func @transform_26(%arg0: i32, %arg1: i32) -> (i32, i32, i32) {
    %c0_i32 = arith.constant 0 : i32
    %c0_i32_0 = arith.constant 0 : i32
    %c0_i32_1 = arith.constant 0 : i32
    return %arg1, %c0_i32, %c0_i32_0 : i32, i32, i32
  }
  func.func @transform_27(%arg0: i32, %arg1: i32) -> (i32, i32, i32) {
    %c0_i32 = arith.constant 0 : i32
    %c0_i32_0 = arith.constant 0 : i32
    %c0_i32_1 = arith.constant 0 : i32
    return %arg1, %c0_i32, %c0_i32_0 : i32, i32, i32
  }
  func.func @transform_28(%arg0: i32, %arg1: i32) -> (i32, i32, i32) {
    %c0_i32 = arith.constant 0 : i32
    %c0_i32_0 = arith.constant 0 : i32
    %c0_i32_1 = arith.constant 0 : i32
    return %arg1, %c0_i32, %c0_i32_0 : i32, i32, i32
  }
  func.func @transform_29(%arg0: i32, %arg1: i32) -> (i32, i32, i32) {
    %c0_i32 = arith.constant 0 : i32
    %c0_i32_0 = arith.constant 0 : i32
    %c0_i32_1 = arith.constant 0 : i32
    return %arg1, %c0_i32, %c0_i32_0 : i32, i32, i32
  }
  func.func @transform_30(%arg0: i32, %arg1: i32) -> (i32, i32) {
    %c0_i32 = arith.constant 0 : i32
    %c0_i32_0 = arith.constant 0 : i32
    %c0_i32_1 = arith.constant 0 : i32
    return %c0_i32, %c0_i32_0 : i32, i32
  }
  func.func @transform_31(%arg0: i32, %arg1: i32) -> (i32, i32) {
    %c0_i32 = arith.constant 0 : i32
    %c0_i32_0 = arith.constant 0 : i32
    %c0_i32_1 = arith.constant 0 : i32
    return %c0_i32, %c0_i32_0 : i32, i32
  }
  func.func @transform_32(%arg0: i32, %arg1: i32) -> (i32, i32, i32) {
    %c0_i32 = arith.constant 0 : i32
    %c0_i32_0 = arith.constant 0 : i32
    %c0_i32_1 = arith.constant 0 : i32
    return %arg0, %c0_i32, %c0_i32_0 : i32, i32, i32
  }
}

</mosaic_0001>

<bundles_post_ra>
// kernel: tpu_custom_call.1
= control target key start
LH: loop header
LB: loop body
LE: loop exit
PB: predicated region body
PF: predicated region fallthrough
CT: control target
= control target key end

     0   :  { %s8522_s6 = smov 1   ;;  %s8523_s10 = smov 2   ;;  %s9690_s0 = inlined_call_operand.smem [shape: u32[33], index: -1, kind: input, shape index: {}] }
   0x1   :  { %s8566_s5 = sld [smem:[%s9690_s0]]   ;;  %s8524_s14 = smov 3  }
   0x2   :  { %s8571_s9 = sld [smem:[%s9690_s0 + %s8522_s6]]   ;;  %s8525_s18 = smov 4  }
   0x3   :  { %s8576_s13 = sld [smem:[%s9690_s0 + %s8523_s10]]   ;;  %s8526_s22 = smov 5  }
   0x4   :  { %s8581_s17 = sld [smem:[%s9690_s0 + %s8524_s14]]   ;;  %s8527_s26 = smov 6  }
   0x5   :  { %s8586_s21 = sld [smem:[%s9690_s0 + %s8525_s18]]   ;;  %s8528_s30 = smov 7  }
   0x6   :  { %s8591_s25 = sld [smem:[%s9690_s0 + %s8526_s22]]   ;;  %s8529_s4 = smov 8  }
   0x7   :  { %9720 = sst [smem:[#allocation6_spill]] %s8566_s5  ;;  %s8530_s10 = smov 9  }
   0x8   :  { %9721 = sst [smem:[#allocation7_spill]] %s8571_s9  ;;  %s8531_s15 = smov 10  }
   0x9   :  { %9722 = sst [smem:[#allocation8_spill]] %s8576_s13  ;;  %s8532_s20 = smov 11  }
   0xa   :  { %9723 = sst [smem:[#allocation9_spill]] %s8581_s17  ;;  %s8534_s1 = smov 13  }
   0xb   :  { %9724 = sst [smem:[#allocation10_spill]] %s8586_s21  ;;  %s8535_s7 = smov 14  }
   0xc   :  { %9725 = sst [smem:[#allocation11_spill]] %s8591_s25  ;;  %s8537_s22 = smov 16  }
   0xd   :  { %s8596_s29 = sld [smem:[%s9690_s0 + %s8527_s26]]   ;;  %s8533_s26 = smov 12  }
   0xe   :  { %s8601_s3 = sld [smem:[%s9690_s0 + %s8528_s30]]   ;;  %s8538_s28 = smov 17  }
   0xf   :  { %s8606_s8 = sld [smem:[%s9690_s0 + %s8529_s4]]  }
  0x10   :  { %s8611_s14 = sld [smem:[%s9690_s0 + %s8530_s10]]  }
  0x11   :  { %s8616_s19 = sld [smem:[%s9690_s0 + %s8531_s15]]   ;;  %s8536_s15 = smov 15  }
  0x12   :  { %s8621_s24 = sld [smem:[%s9690_s0 + %s8532_s20]]  }
  0x13   :  { %9726 = sst [smem:[#allocation12_spill]] %s8596_s29 }
  0x14   :  { %9727 = sst [smem:[#allocation13_spill]] %s8601_s3 }
  0x15   :  { %9728 = sst [smem:[#allocation14_spill]] %s8606_s8 }
  0x16   :  { %9729 = sst [smem:[#allocation15_spill]] %s8611_s14 }
  0x17   :  { %9730 = sst [smem:[#allocation16_spill]] %s8616_s19 }
  0x18   :  { %9731 = sst [smem:[#allocation17_spill]] %s8621_s24 }
  0x19   :  { %s8626_s30 = sld [smem:[%s9690_s0 + %s8533_s26]]  }
  0x1a   :  { %s8631_s6 = sld [smem:[%s9690_s0 + %s8534_s1]]  }
  0x1b   :  { %s8636_s12 = sld [smem:[%s9690_s0 + %s8535_s7]]   ;;  %s8539_s7 = smov 18  }
  0x1c   :  { %s8641_s20 = sld [smem:[%s9690_s0 + %s8536_s15]]   ;;  %s8540_s15 = smov 19  }
  0x1d   :  { %s8646_s27 = sld [smem:[%s9690_s0 + %s8537_s22]]   ;;  %s8541_s22 = smov 20  }
  0x1e   :  { %s8651_s4 = sld [smem:[%s9690_s0 + %s8538_s28]]   ;;  %s8542_s28 = smov 21  }
  0x1f   :  { %9732 = sst [smem:[#allocation18_spill]] %s8626_s30 }
  0x20   :  { %9733 = sst [smem:[#allocation19_spill]] %s8631_s6 }
  0x21   :  { %9734 = sst [smem:[#allocation20_spill]] %s8636_s12 }
  0x22   :  { %9735 = sst [smem:[#allocation21_spill]] %s8641_s20 }
  0x23   :  { %9736 = sst [smem:[#allocation22_spill]] %s8646_s27 }
  0x24   :  { %9737 = sst [smem:[#allocation23_spill]] %s8651_s4 }
  0x25   :  { %s8656_s17 = sld [smem:[%s9690_s0 + %s8539_s7]]   ;;  %s8543_s7 = smov 22  }
  0x26   :  { %s8661_s13 = sld [smem:[%s9690_s0 + %s8540_s15]]   ;;  %s8544_s15 = smov 23  }
  0x27   :  { %s8666_s27 = sld [smem:[%s9690_s0 + %s8541_s22]]   ;;  %s8545_s22 = smov 24  }
  0x28   :  { %s8671_s4 = sld [smem:[%s9690_s0 + %s8542_s28]]   ;;  %s8546_s28 = smov 25  }
  0x2b   :  { %9738 = sst [smem:[#allocation24_spill]] %s8656_s17 }
  0x2c   :  { %9739 = sst [smem:[#allocation25_spill]] %s8661_s13 }
  0x2d   :  { %9740 = sst [smem:[#allocation26_spill]] %s8666_s27 }
  0x2e   :  { %9741 = sst [smem:[#allocation27_spill]] %s8671_s4 }
  0x2f   :  { %s8676_s17 = sld [smem:[%s9690_s0 + %s8543_s7]]   ;;  %s8547_s7 = smov 26  }
  0x30   :  { %s8681_s13 = sld [smem:[%s9690_s0 + %s8544_s15]]   ;;  %s8548_s15 = smov 27  }
  0x31   :  { %s8686_s27 = sld [smem:[%s9690_s0 + %s8545_s22]]   ;;  %s8549_s22 = smov 28  }
  0x32   :  { %s8691_s4 = sld [smem:[%s9690_s0 + %s8546_s28]]   ;;  %s8550_s28 = smov 29  }
  0x35   :  { %9742 = sst [smem:[#allocation28_spill]] %s8676_s17 }
  0x36   :  { %9743 = sst [smem:[#allocation29_spill]] %s8681_s13 }
  0x37   :  { %9744 = sst [smem:[#allocation30_spill]] %s8686_s27 }
  0x38   :  { %9745 = sst [smem:[#allocation31_spill]] %s8691_s4 }
  0x39   :  { %s8696_s17 = sld [smem:[%s9690_s0 + %s8547_s7]]   ;;  %s8551_s7 = smov 30  }
  0x3a   :  { %s8701_s13 = sld [smem:[%s9690_s0 + %s8548_s15]]   ;;  %s8552_s15 = smov 31  }
  0x3b   :  { %s8706_s27 = sld [smem:[%s9690_s0 + %s8549_s22]]   ;;  %s8553_s22 = smov 32  }
  0x3c   :  { %s8711_s4 = sld [smem:[%s9690_s0 + %s8550_s28]]  }
  0x3f   :  { %9746 = sst [smem:[#allocation32_spill]] %s8696_s17 }
  0x40   :  { %9747 = sst [smem:[#allocation33_spill]] %s8701_s13 }
  0x41   :  { %9748 = sst [smem:[#allocation34_spill]] %s8706_s27 }
  0x42   :  { %s8716_s17 = sld [smem:[%s9690_s0 + %s8551_s7]]  }
  0x43   :  { %s8721_s13 = sld [smem:[%s9690_s0 + %s8552_s15]]  }
  0x44   :  { %s8726_s27 = sld [smem:[%s9690_s0 + %s8553_s22]]  }
  0x48   :  { %9749 = sst [smem:[#allocation35_spill]] %s8716_s17 }
  0x49   :  { %9750 = sst [smem:[#allocation36_spill]] %s8721_s13 }
  0x4a   :  { %9751 = sst [smem:[#allocation37_spill]] %s8726_s27 }
  0x4b   :  { %70 = vsyncpa [#allocation4], 0 }
  0x4c   :  { %72 = vsyncpa [#allocation4 + $0x1], 0  ;;  %s8728_s28 = smov 0   ;;  %s8730_s1 = smov 0  }
  0x4d   :  { %s8732_s2 = smov 0   ;;  %s8734_s7 = smov 0  }
  0x4e   :  { %s8736_s10 = smov 0   ;;  %s8738_s11 = smov 0  }
  0x4f   :  { %s8740_s15 = smov 0   ;;  %s8742_s16 = smov 0  }
  0x50 LB: > { %9752 = sst [smem:[#allocation38_spill]] %s8492_s28  ;;  %s6415_s0 = sadd.s32 4294967295, %s8520_s16   ;;  %s8520_s16 = sphi %s8742_s16, %s78_s16   ;;  %s8516_s15 = sphi %s8740_s15, %s9854_s15   ;;  %s8512_s11 = sphi %s8738_s11, %s9853_s11   ;;  %s8508_s10 = sphi %s8736_s10, %s9852_s10   ;;  %s8504_s7 = sphi %s8734_s7, %s9851_s7   ;;  %s8500_s2 = sphi %s8732_s2, %s9850_s2   ;;  %s8496_s1 = sphi %s8730_s1, %s9849_s1   ;;  %s8492_s28 = sphi %s8728_s28, %s9848_s28  }
  0x51   : > { %9753 = sst [smem:[#allocation39_spill]] %s8496_s1  ;;  %s6416_s18 = sadd.s32 4294967294, %s8520_s16  }
  0x52   : > { %9754 = sst [smem:[#allocation40_spill]] %s8500_s2  ;;  %s87_s22 = sadd.s32 1, %s8512_s11 }
  0x53   : > { %9755 = sst [smem:[#allocation41_spill]] %s8504_s7  ;;  %p88_p0 = scmp.ge.s32.totalorder %s87_s22, 2 }
  0x54   : > { %9756 = sst [smem:[#allocation42_spill]] %s8508_s10  ;;  %s90_s23 = sadd.s32 1, %s8516_s15 }
  0x55   : > { %9757 = sst [smem:[#allocation43_spill]] %s8512_s11  ;;  %p919_p1 = scmp.ne.s32.totalorder %s8500_s2, %s8496_s1 }
  0x56   : > { %9758 = sst [smem:[#allocation44_spill]] %s8516_s15  ;;  %p920_p2 = scmp.eq.s32.totalorder %s6415_s0, 3 }
  0x57   : > { %9759 = sst [smem:[#allocation45_spill]] %s8520_s16  ;;  %s9856_s22 = smov (%p88_p0, %s87_s22), 0 }
  0x58   : > { %9760 = sst [smem:[#allocation46_spill]] %s9856_s22  ;;  %s9858_s23 = smov (!%p88_p0, %s90_s23), %s8516_s15 }
  0x59   : > { %p8777_p3 = por %p920_p2, %p919_p1  ;;  %p925_p4 = scmp.ne.s32.totalorder %s8496_s1, %s8492_s28 }
  0x5a   : > { %p92_p5 = scmp.ge.s32.totalorder %s9858_s23, 2  ;;  %p926_p6 = scmp.eq.s32.totalorder %s6416_s18, 3 }
  0x5b   : > { %s9761_s26 = scalar_select %p8777_p3, 1, 0 }
  0x5c   : > { %p6419_p7 = scmp.ge.s32.totalorder %s8520_s16, 1  ;;  %p1154_p8 = scmp.lt.s32.totalorder %s8520_s16, 5 }
  0x5d   : > { %9762 = sst [smem:[#allocation47_spill]] %s9761_s26  ;;  %s9860_s23 = smov (%p92_p5, %s9858_s23), 0 }
  0x5e   : > { %9763 = sst [smem:[#allocation48_spill]] %s9860_s23  ;;  %p8787_p9 = por %p926_p6, %p925_p4 }
  0x5f   : > { %p1155_p10 = pnand %p6419_p7, %p1154_p8  ;;  %s906_s0 = ssub.s32 %s8516_s15, %s9860_s23 }
  0x60   : > { %s9764_s11 = scalar_select %p8787_p9, 1, 0 }
  0x61   : > { %s909_s22 = sadd.s32 1, %s8500_s2  ;;  %p907_p11 = scmp.eq.s32.totalorder %s906_s0, 0 }
  0x62   : > { %9765 = sst [smem:[#allocation49_spill]] %s9764_s11  ;;  %1158 = sbr.rel (%p1155_p10) target bundleno = 9781 (0x2635), region = 148 }
  0x63   : > { %s8795_s27 = scalar_select %p907_p11, %s8500_s2, %s909_s22  }
  0x65   : > { %9766 = sst [smem:[#allocation50_spill]] %s8795_s27 }
  0x69   : > { %s9767_s5 = sld [smem:[#allocation6_spill]]  ;;  %s9768_s9 = sld [smem:[#allocation7_spill]] }
  0x6a   : > { %s9769_s21 = sld [smem:[#allocation10_spill]]  ;;  %s9770_s25 = sld [smem:[#allocation11_spill]] }
  0x6b   : > { %s9771_s29 = sld [smem:[#allocation12_spill]]  ;;  %s9772_s3 = sld [smem:[#allocation13_spill]] }
  0x6c   : > { %s9696_s18 = sand.u32 1, %s8496_s1   ;;  %s9773_s8 = sld [smem:[#allocation14_spill]] }
  0x6d   : > { %p1345_p12 = scmp.lt.s32.totalorder %s8508_s10, 1  ;;  %s9774_s14 = sld [smem:[#allocation15_spill]] }
  0x6e   : > { %s8801_s22 = sshll.u32 %s9696_s18, 3  ;;  %p1354_p13 = scmp.lt.s32.totalorder %s8504_s7, 1 }
  0x6f   : > { %s1346_s0 = scalar_select %p1345_p12, %s8508_s10, 1 }
  0x70   : > { %s9776_s19 = sld [smem:[#allocation16_spill]]  ;;  %s9777_s30 = sld [smem:[#allocation18_spill]] }
  0x71   : > { %s8806_s23 = scalar_select %p1354_p13, %s8504_s7, 1 }
  0x72   : > { %s6421_s15 = sshll.u32 %s1346_s0, 3  ;;  %s9778_s6 = sld [smem:[#allocation19_spill]] }
  0x73   : > { %s7086_s27 = sshll.u32 %s1346_s0, 4  ;;  %s9779_s12 = sld [smem:[#allocation20_spill]] }
  0x74   : > { %s8809_s2 = scalar_lea.vmem %s9767_s5, %s6421_s15  ;;  %s9781_s20 = sld [smem:[#allocation21_spill]] }
  0x75   : > { %9780 = sst [smem:[#allocation51_spill]] %s8809_s2  ;;  %s8812_s18 = scalar_lea.vmem %s9768_s9, %s7086_s27 }
  0x76   : > { %9782 = sst [smem:[#allocation52_spill]] %s8812_s18  ;;  %s9783_s11 = sld [smem:[#allocation22_spill]] }
  0x77   : > { %s7087_s28 = sshll.u32 %s8806_s23, 8  ;;  %s9784_s16 = sld [smem:[#allocation23_spill]] }
  0x78   : > { %s6426_s26 = sshll.u32 %s8806_s23, 2  ;;  %s9785_s1 = sld [smem:[#allocation24_spill]] }
  0x79   : > { %s8817_s10 = scalar_lea.vmem %s9769_s21, %s7087_s28  ;;  %s9787_s13 = sld [smem:[#allocation25_spill]] }
  0x7a   : > { %9786 = sst [smem:[#allocation53_spill]] %s8817_s10  ;;  %s8820_s17 = scalar_lea.vmem %s9770_s25, %s6426_s26 }
  0x7b   : > { %9788 = sst [smem:[#allocation54_spill]] %s8820_s17  ;;  %s8823_s7 = scalar_lea.vmem %s9771_s29, %s7087_s28 }
  0x7c   : > { %9789 = sst [smem:[#allocation55_spill]] %s8823_s7  ;;  %s9790_s0 = sld [smem:[#allocation26_spill]] }
  0x7d   : > { %s8826_s15 = scalar_lea.vmem %s9772_s3, %s6426_s26  ;;  %s8829_s27 = scalar_lea.vmem %s9773_s8, %s7087_s28 }
  0x7e   : > { %9791 = sst [smem:[#allocation56_spill]] %s8826_s15  ;;  %s9793_s5 = sld [smem:[#allocation27_spill]] }
  0x7f   : > { %9792 = sst [smem:[#allocation57_spill]] %s8829_s27  ;;  %s8832_s9 = scalar_lea.vmem %s9774_s14, %s6426_s26 }
  0x80   : > { %9794 = sst [smem:[#allocation58_spill]] %s8832_s9  ;;  %s9795_s18 = sld [smem:[#allocation28_spill]] }
  0x81   : > { %s7090_s2 = sshll.u32 %s8806_s23, 6  ;;  %s9796_s21 = sld [smem:[#allocation29_spill]] }
  0x82   : > { %s9797_s25 = sld [smem:[#allocation30_spill]]  ;;  %s8838_s17 = scalar_lea.vmem %s9776_s19, %s7090_s2 }
  0x83   : > { %9798 = sst [smem:[#allocation59_spill]] %s8838_s17  ;;  %s9799_s29 = sld [smem:[#allocation31_spill]] }
  0x84   : > { %s8841_s7 = scalar_lea.vmem %s9777_s30, %s7087_s28  ;;  %s9801_s3 = sld [smem:[#allocation32_spill]] }
  0x85   : > { %9800 = sst [smem:[#allocation60_spill]] %s8841_s7  ;;  %s8844_s8 = scalar_lea.vmem %s9778_s6, %s6426_s26 }
  0x86   : > { %9802 = sst [smem:[#allocation61_spill]] %s8844_s8  ;;  %s9803_s14 = sld [smem:[#allocation33_spill]] }
  0x87   : > { %s8847_s9 = scalar_lea.vmem %s9779_s12, %s7087_s28  ;;  %s9805_s15 = sld [smem:[#allocation34_spill]] }
  0x88   : > { %9804 = sst [smem:[#allocation62_spill]] %s8847_s9  ;;  %s8850_s27 = scalar_lea.vmem %s9781_s20, %s6426_s26 }
  0x89   : > { %9806 = sst [smem:[#allocation63_spill]] %s8850_s27  ;;  %s8853_s10 = scalar_lea.vmem %s9783_s11, %s7087_s28 }
  0x8a   : > { %9807 = sst [smem:[#allocation64_spill]] %s8853_s10  ;;  %s8856_s19 = scalar_lea.vmem %s9784_s16, %s6426_s26 }
  0x8b   : > { %9808 = sst [smem:[#allocation65_spill]] %s8856_s19  ;;  %s8859_s30 = scalar_lea.vmem %s9785_s1, %s7090_s2 }
  0x8c   : > { %s1423_s7 = scalar_lea.vmem %s9787_s13, %s8806_s23  ;;  %s7095_s6 = sshll.u32 %s8806_s23, 7 }
  0x8d   : > { %s8865_s8 = scalar_lea.vmem %s9790_s0, %s7095_s6  ;;  %s6448_s24 = sshll.u32 %s8806_s23, 1 }
  0x8e   : > { %s8869_s12 = scalar_lea.vmem %s9793_s5, %s6448_s24  ;;  %s8872_s9 = scalar_lea.vmem %s9795_s18, %s7095_s6 }
  0x8f   : > { %s1440_s20 = scalar_lea.vmem %s9796_s21, %s8806_s23  ;;  %s1443_s27 = scalar_lea.vmem %s9797_s25, %s8806_s23 }
  0x90   : > { %s1446_s17 = scalar_lea.vmem %s9799_s29, %s8806_s23  ;;  %s1449_s11 = scalar_lea.vmem %s9801_s3, %s8806_s23 }
  0x91   : > { %s1452_s28 = scalar_lea.vmem %s9803_s14, %s8806_s23  ;;  %s1455_s10 = scalar_lea.vmem %s9805_s15, %s8806_s23 }
  0x92   : > { %s1458_s16 = scalar_lea.vmem %s8711_s4, %s8806_s23  ;;  %s1344_s26 = scalar_lea.vmem [#allocation3], %s8801_s22 }
  0x93   : > { %s9809_s19 = sld [smem:[#allocation41_spill]] }
  0x99   : > { %p6451_p0 = scmp.ne.s32.totalorder %s9809_s19, 0 }
  0x9a   : > { %s9810_s13 = sld [smem:[#allocation51_spill]] (!%p6451_p0) }
  0x9b   : > { %1463 = sbr.rel (%p6451_p0) target bundleno = 162 (0xa2), region = 152 }
  0xa0   : > { %v1464_v0 = vld [vmem:[%s9810_s13] sm:$0xff] (!%p6451_p0) }
  0xa1   : > { %1465 = vst [vmem:[#allocation2] sm:$0xff] (!%p6451_p0), %v1464_v0 }
  0xa2 PF: > { %s9811_s5 = sld [smem:[#allocation53_spill]]  ;;  %s9812_s24 = sld [smem:[#allocation55_spill]]  ;;  %v8554_v4 = vmov 0.0   ;;  %vm8555_vm0 = vmmov 0   ;;  %v6452_v27 = vld [vmem:[%s1443_s27] ss:$0 sm:$0xff] }
  0xa3   : > { %7391 = vmatprep.subr.bf16.mxu0 %v8554_v4  ;;  %7411 = vmatprep.subr.bf16.mxu1 %v8554_v4  ;;  %s9815_s29 = sld [smem:[#allocation57_spill]]  ;;  %v6453_v29 = vld [vmem:[%s1446_s17] ss:$0 sm:$0xff]  ;;  %s9816_s17 = sld [smem:[#allocation56_spill]]  ;;  %vm1838_vm1 = vcmask 261120   ;;  %vm1904_vm2 = vcmask 1043456  }
  0xa4   : > { %7407 = vmatprep.mubr.msk.bf16.mxu0 %vm8555_vm0, %v8554_v4  ;;  %7427 = vmatprep.mubr.msk.bf16.mxu1 %vm8555_vm0, %v8554_v4  ;;  %s9817_s3 = sld [smem:[#allocation54_spill]]  ;;  %s9818_s14 = sld [smem:[#allocation58_spill]]  ;;  %vm1887_vm4 = vcmask 64512   ;;  %vm3959_vm6 = vcmask 130048  }
  0xa5   : > { %s9819_s19 = sld [smem:[#allocation8_spill]]  ;;  %s9820_s6 = sld [smem:[#allocation59_spill]] }
  0xa6   : > { %s9821_s1 = sld [smem:[#allocation17_spill]]  ;;  %s9822_s2 = sld [smem:[#allocation62_spill]] }
  0xa7   : > { %s9823_s18 = sld [smem:[#allocation60_spill]]  ;;  %s9830_s21 = sld [smem:[#allocation64_spill]] }
  0xa8   : > { %v1466_v1 = vld [vmem:[#allocation2] sm:$0xff]  ;;  %v8139_v5 = vld [vmem:[%s9811_s5 + $0x8] sm:$0xff]   ;;  %v8141_v7 = vld [vmem:[%s9811_s5 + $0x10] sm:$0xff]   ;;  %s9825_s15 = sld [smem:[#allocation52_spill]] }
  0xa9   : > { %1476 = vadd.xlane.f32.xlu0 %v1466_v1  ;;  %v8137_v2 = vld [vmem:[%s9811_s5] sm:$0xff]   ;;  %v8140_v6 = vld [vmem:[%s9812_s24 + $0x8] sm:$0xff]   ;;  %v8142_v12 = vld [vmem:[%s9812_s24 + $0x10] sm:$0xff]  }
  0xaa   : > { %v8138_v3 = vld [vmem:[%s9812_s24] sm:$0xff]   ;;  %7392 = vmatpush3.bf16.msra.mxu0 %v8137_v2  ;;  %v8143_v13 = vld [vmem:[%s9811_s5 + $0x18] sm:$0xff]   ;;  %v8147_v17 = vld [vmem:[%s9811_s5 + $0x28] sm:$0xff]  }
  0xab   : > { %7412 = vmatpush3.bf16.msra.mxu1 %v8138_v3  ;;  %7393 = vmatprep.subr.bf16.mxu0 %v8554_v4  ;;  %v8144_v14 = vld [vmem:[%s9812_s24 + $0x18] sm:$0xff]   ;;  %v8145_v15 = vld [vmem:[%s9811_s5 + $0x20] sm:$0xff]   ;;  %v8148_v18 = vld [vmem:[%s9812_s24 + $0x28] sm:$0xff]  }
  0xac   : > { %7413 = vmatprep.subr.bf16.mxu1 %v8554_v4  ;;  %v8146_v16 = vld [vmem:[%s9812_s24 + $0x20] sm:$0xff]   ;;  %v8149_v19 = vld [vmem:[%s9811_s5 + $0x30] sm:$0xff]   ;;  %v8151_v21 = vld [vmem:[%s9811_s5 + $0x38] sm:$0xff]   ;;  %s9824_s0 = scalar_lea.vmem %s9821_s1, %s8806_s23 }
  0xad   : > { %v8150_v20 = vld [vmem:[%s9812_s24 + $0x30] sm:$0xff]   ;;  %v8152_v22 = vld [vmem:[%s9812_s24 + $0x38] sm:$0xff]   ;;  %v8153_v32 = vld [vmem:[%s9815_s29] sm:$0xff]  }
  0xae   : > { %7394 = vmatpush3.bf16.msra.mxu0 %v8139_v5  ;;  %v8154_v34 = vld [vmem:[%s9815_s29 + $0x8] sm:$0xff]   ;;  %v8155_v35 = vld [vmem:[%s9815_s29 + $0x10] sm:$0xff]   ;;  %v8156_v36 = vld [vmem:[%s9815_s29 + $0x18] sm:$0xff]  }
  0xaf   : > { %7414 = vmatpush3.bf16.msra.mxu1 %v8140_v6  ;;  %7395 = vmatprep.subr.bf16.mxu0 %v8554_v4  ;;  %v8157_v37 = vld [vmem:[%s9815_s29 + $0x20] sm:$0xff]   ;;  %v8158_v38 = vld [vmem:[%s9815_s29 + $0x28] sm:$0xff]   ;;  %v8159_v39 = vld [vmem:[%s9815_s29 + $0x30] sm:$0xff]  }
  0xb0   : > { %7415 = vmatprep.subr.bf16.mxu1 %v8554_v4  ;;  %v8160_v40 = vld [vmem:[%s9815_s29 + $0x38] sm:$0xff]   ;;  %v8161_v41 = vld [vmem:[%s9812_s24 + $0x40] sm:$0xff]   ;;  %v8162_v42 = vld [vmem:[%s9812_s24 + $0x48] sm:$0xff]  }
  0xb1   : > { %v8163_v43 = vld [vmem:[%s9812_s24 + $0x50] sm:$0xff]   ;;  %v8164_v44 = vld [vmem:[%s9812_s24 + $0x58] sm:$0xff]   ;;  %v8165_v45 = vld [vmem:[%s9812_s24 + $0x60] sm:$0xff]  }
  0xb2   : > { %7396 = vmatpush3.bf16.msra.mxu0 %v8141_v7  ;;  %v8166_v46 = vld [vmem:[%s9812_s24 + $0x68] sm:$0xff]   ;;  %v8167_v47 = vld [vmem:[%s9812_s24 + $0x70] sm:$0xff]   ;;  %v8168_v48 = vld [vmem:[%s9812_s24 + $0x78] sm:$0xff]  }
  0xb3   : > { %7397 = vmatprep.subr.bf16.mxu0 %v8554_v4  ;;  %7416 = vmatpush3.bf16.msra.mxu1 %v8142_v12  ;;  %v6463_v49 = vld [vmem:[%s9816_s17] ss:$0 sm:$0xff] }
  0xb4   : > { %7417 = vmatprep.subr.bf16.mxu1 %v8554_v4  ;;  %v6454_v60 = vld [vmem:[%s9817_s3] ss:$0 sm:$0xff] }
  0xb5   : > { %v6472_v0 = vld [vmem:[%s9818_s14] ss:$0 sm:$0xff] }
  0xb6   : > { %7398 = vmatpush3.bf16.msra.mxu0 %v8143_v13 }
  0xb7   : > { %7418 = vmatpush3.bf16.msra.mxu1 %v8144_v14  ;;  %7399 = vmatprep.subr.bf16.mxu0 %v8554_v4 }
  0xb8   : > { %7419 = vmatprep.subr.bf16.mxu1 %v8554_v4 }
  0xba   : > { %7400 = vmatpush3.bf16.msra.mxu0 %v8145_v15 }
  0xbb   : > { %7420 = vmatpush3.bf16.msra.mxu1 %v8146_v16  ;;  %7401 = vmatprep.subr.bf16.mxu0 %v8554_v4 }
  0xbc   : > { %7421 = vmatprep.subr.bf16.mxu1 %v8554_v4 }
  0xbe   : > { %7402 = vmatpush3.bf16.msra.mxu0 %v8147_v17  ;;  %v8995_v17 = vld [vmem:[%s9819_s19] sm:$0xff] }
  0xbf   : > { %7422 = vmatpush3.bf16.msra.mxu1 %v8148_v18  ;;  %7403 = vmatprep.subr.bf16.mxu0 %v8554_v4  ;;  %vm1471_vm3 = vcmp.gt.f32.partialorder %v8995_v17, 0.5  ;;  %v8240_v17 = vld [vmem:[%s9820_s6 + $0x38] sm:$0xff]  }
  0xc0   : > { %7423 = vmatprep.subr.bf16.mxu1 %v8554_v4 }
  0xc2   : > { %7404 = vmatpush3.bf16.msra.mxu0 %v8149_v19 }
  0xc3   : > { %7424 = vmatpush3.bf16.msra.mxu1 %v8150_v20  ;;  %7405 = vmatprep.subr.bf16.mxu0 %v8554_v4 }
  0xc4   : > { %7425 = vmatprep.subr.bf16.mxu1 %v8554_v4 }
  0xc6   : > { %7406 = vmatpush3.bf16.msra.mxu0 %v8151_v21 }
  0xc7   : > { %7426 = vmatpush3.bf16.msra.mxu1 %v8152_v22  ;;  %7431 = vmatprep.subr.bf16.mxu0 %v8554_v4 }
  0xc8   : > { %7451 = vmatprep.subr.bf16.mxu1 %v8554_v4 }
 0x136   : > { %v1477_v8 = vpop.xlane.xlu0 %1476 }
 0x137   : > { %v1479_v9 = vmul.f32 0.0078125, %v1477_v8 }
 0x139   : > { %v1480_v10 = vsub.f32 %v1466_v1, %v1479_v9  ;;  %v6526_v9 = vld [vmem:[%s9816_s17 + $0x1] ss:$0 sm:$0xff] }
 0x13b   : > { %v1481_v11 = vmul.f32 %v1480_v10, %v1480_v10 }
 0x13d   : > { %1482 = vadd.xlane.f32.xlu0 %v1481_v11 }
 0x1ca   : > { %v1483_v23 = vpop.xlane.xlu0 %1482 }
 0x1cb   : > { %v1484_v24 = vmul.f32 0.0078125, %v1483_v23 }
 0x1cd   : > { %v1485_v25 = vadd.f32 1e-05, %v1484_v24 }
 0x1cf   : > { %8385 = vrsqrt.f32 %v1485_v25 }
 0x1d9   : > { %v8386_v26 = vpop.eup %8385 }
 0x1da   : > { %v1487_v28 = vmul.f32 %v8386_v26, %v1480_v10 }
 0x1dc   : > { %v1494_v30 = vmul.f32 %v6452_v27, %v1487_v28 }
 0x1de   : > { %v1501_v31 = vadd.f32 %v6453_v29, %v1494_v30 }
 0x1e0   : > { %v8936_v33 = vpack.c.bf16 %v1501_v31, %v1501_v31 }
 0x1e2   : > { %7408 = vmatmul.mubr.bf16.vlgmr.msra.gmra.mrb[0].mxu0 %v8936_v33  ;;  %7428 = vmatmul.mubr.bf16.vlgmr.msra.gmra.mrb[0].mxu1 %v8936_v33 }
 0x1e3   : > { %7432 = vmatpush3.bf16.msra.mxu0 %v8153_v32  ;;  %7447 = vmatprep.mubr.msk.bf16.mxu0 %vm8555_vm0, %v8554_v4 }
 0x1e4   : > { %7433 = vmatprep.subr.bf16.mxu0 %v8554_v4  ;;  %7453 = vmatprep.mubr.msk.bf16.mxu1 %vm8555_vm0, %v8554_v4 }
 0x1e7   : > { %7434 = vmatpush3.bf16.msra.mxu0 %v8154_v34  ;;  %v8169_v34 = vld [vmem:[%s9811_s5 + $0x40] sm:$0xff]  }
 0x1e8   : > { %7435 = vmatprep.subr.bf16.mxu0 %v8554_v4 }
 0x1eb   : > { %7436 = vmatpush3.bf16.msra.mxu0 %v8155_v35 }
 0x1ec   : > { %7437 = vmatprep.subr.bf16.mxu0 %v8554_v4 }
 0x1ef   : > { %7438 = vmatpush3.bf16.msra.mxu0 %v8156_v36  ;;  %v8170_v36 = vld [vmem:[%s9811_s5 + $0x48] sm:$0xff]  }
 0x1f0   : > { %7439 = vmatprep.subr.bf16.mxu0 %v8554_v4 }
 0x1f3   : > { %7440 = vmatpush3.bf16.msra.mxu0 %v8157_v37  ;;  %v8171_v37 = vld [vmem:[%s9811_s5 + $0x50] sm:$0xff]  }
 0x1f4   : > { %7441 = vmatprep.subr.bf16.mxu0 %v8554_v4 }
 0x1f7   : > { %7442 = vmatpush3.bf16.msra.mxu0 %v8158_v38  ;;  %v8172_v38 = vld [vmem:[%s9811_s5 + $0x58] sm:$0xff]  }
 0x1f8   : > { %7443 = vmatprep.subr.bf16.mxu0 %v8554_v4 }
 0x1fb   : > { %7444 = vmatpush3.bf16.msra.mxu0 %v8159_v39  ;;  %v8173_v39 = vld [vmem:[%s9811_s5 + $0x60] sm:$0xff]  }
 0x1fc   : > { %7445 = vmatprep.subr.bf16.mxu0 %v8554_v4 }
 0x1ff   : > { %7446 = vmatpush3.bf16.msra.mxu0 %v8160_v40  ;;  %v8174_v40 = vld [vmem:[%s9811_s5 + $0x68] sm:$0xff]  }
 0x200   : > { %7483 = vmatprep.subr.bf16.mxu0 %v8554_v4 }
 0x202   : > { %7448 = vmatmul.mubr.bf16.vlgmr.msra.gmra.mrb[4].mxu0 %v8936_v33 }
 0x203   : > { %7484 = vmatpush3.bf16.msra.mxu0 %v8161_v41  ;;  %7499 = vmatprep.mubr.msk.bf16.mxu0 %vm8555_vm0, %v8554_v4  ;;  %v8175_v41 = vld [vmem:[%s9811_s5 + $0x70] sm:$0xff]  }
 0x204   : > { %7485 = vmatprep.subr.bf16.mxu0 %v8554_v4 }
 0x207   : > { %7486 = vmatpush3.bf16.msra.mxu0 %v8162_v42  ;;  %v8176_v42 = vld [vmem:[%s9811_s5 + $0x78] sm:$0xff]  }
 0x208   : > { %7487 = vmatprep.subr.bf16.mxu0 %v8554_v4 }
 0x20b   : > { %7488 = vmatpush3.bf16.msra.mxu0 %v8163_v43  ;;  %v8177_v43 = vld [vmem:[%s9815_s29 + $0x40] sm:$0xff]  }
 0x20c   : > { %7489 = vmatprep.subr.bf16.mxu0 %v8554_v4 }
 0x20f   : > { %7490 = vmatpush3.bf16.msra.mxu0 %v8164_v44  ;;  %v8178_v44 = vld [vmem:[%s9815_s29 + $0x48] sm:$0xff]  }
 0x210   : > { %7491 = vmatprep.subr.bf16.mxu0 %v8554_v4 }
 0x213   : > { %7492 = vmatpush3.bf16.msra.mxu0 %v8165_v45  ;;  %v8179_v45 = vld [vmem:[%s9815_s29 + $0x50] sm:$0xff]  }
 0x214   : > { %7493 = vmatprep.subr.bf16.mxu0 %v8554_v4 }
 0x217   : > { %7494 = vmatpush3.bf16.msra.mxu0 %v8166_v46  ;;  %v8180_v46 = vld [vmem:[%s9815_s29 + $0x58] sm:$0xff]  }
 0x218   : > { %7495 = vmatprep.subr.bf16.mxu0 %v8554_v4 }
 0x21b   : > { %7496 = vmatpush3.bf16.msra.mxu0 %v8167_v47  ;;  %v8181_v47 = vld [vmem:[%s9815_s29 + $0x60] sm:$0xff]  }
 0x21c   : > { %7497 = vmatprep.subr.bf16.mxu0 %v8554_v4 }
 0x21f   : > { %7498 = vmatpush3.bf16.msra.mxu0 %v8168_v48  ;;  %v8182_v48 = vld [vmem:[%s9815_s29 + $0x68] sm:$0xff]  }
 0x220   : > { %7523 = vmatprep.subr.bf16.mxu0 %v8554_v4 }
 0x222   : > { %7500 = vmatmul.mubr.bf16.vlgmr.msra.gmra.mrb[8].mxu0 %v8936_v33 }
 0x223   : > { %7525 = vmatprep.mubr.msk.bf16.mxu0 %vm8555_vm0, %v8554_v4 }
 0x2b5   : > { %v1608_v50 = vpop.f32.mrb[0].mxu0  ;;  %v1719_v51 = vpop.f32.mrb[0].mxu1 }
 0x2b6   : > { %v1720_v52 = vadd.f32 %v6463_v49, %v1719_v51  ;;  %v7409_v53 = vpop.f32.mrb[1].mxu0  ;;  %v7429_v54 = vpop.f32.mrb[1].mxu1  ;;  %v1609_v62 = vadd.f32 %v6454_v60, %v1608_v50  ;;  %v8183_v49 = vld [vmem:[%s9815_s29 + $0x70] sm:$0xff]   ;;  %v8184_v50 = vld [vmem:[%s9815_s29 + $0x78] sm:$0xff]   ;;  %v8185_v51 = vld [vmem:[%s9820_s6] sm:$0xff]  }
 0x2b7   : > { %v1611_v55 = vpop.f32.mrb[2].mxu0  ;;  %v1722_v56 = vpop.f32.mrb[2].mxu1  ;;  %v8187_v54 = vld [vmem:[%s9812_s24 + $0x80] sm:$0xff]   ;;  %v8189_v60 = vld [vmem:[%s9812_s24 + $0x90] sm:$0xff]  }
 0x2b8   : > { %v1837_v57 = vpack.c.bf16 %v1720_v52, %v1720_v52  ;;  %v7410_v58 = vpop.f32.mrb[3].mxu0  ;;  %v7430_v59 = vpop.f32.mrb[3].mxu1  ;;  %v1836_v63 = vpack.c.bf16 %v1609_v62, %v1609_v62  ;;  %v8186_v52 = vld [vmem:[%s9820_s6 + $0x8] sm:$0xff]   ;;  %v8191_v62 = vld [vmem:[%s9812_s24 + $0xa0] sm:$0xff]  }
 0x2b9   : > { %v8188_v59 = vld [vmem:[%s9812_s24 + $0x88] sm:$0xff]  }
 0x2ba   : > { %v1843_v61 = vsel %vm1838_vm1, %v1837_v57, 0 }
 0x2bb   : > { %7452 = vmatpush3.bf16.xpose.msra.mxu1 %v1843_v61  ;;  %v8190_v61 = vld [vmem:[%s9812_s24 + $0x98] sm:$0xff]  }
 0x2bc   : > { %7457 = vmatprep.subr.bf16.mxu1 %v8554_v4 }
 0x2c2   : > { %7454 = vmatmul.mubr.msk.bf16.vlgmr.msra.gmra.mrb[4].mxu1 %vm1838_vm1, %v1836_v63  ;;  %v8192_v63 = vld [vmem:[%s9812_s24 + $0xa8] sm:$0xff]  }
 0x2c3   : > { %7459 = vmatprep.mubr.msk.bf16.mxu1 %vm8555_vm0, %v8554_v4 }
 0x2d5   : > { %v1830_v1 = vpop.f32.mrb[4].mxu0 }
 0x2d6   : > { %v1831_v2 = vadd.f32 %v6472_v0, %v1830_v1  ;;  %v7449_v3 = vpop.f32.mrb[5].mxu0  ;;  %v8193_v0 = vld [vmem:[%s9812_s24 + $0xb0] sm:$0xff]   ;;  %v8194_v1 = vld [vmem:[%s9812_s24 + $0xb8] sm:$0xff]  }
 0x2d7   : > { %v1833_v5 = vpop.f32.mrb[6].mxu0 }
 0x2d8   : > { %v1900_v6 = vpack.c.bf16 %v1831_v2, %v1831_v2  ;;  %v7450_v7 = vpop.f32.mrb[7].mxu0  ;;  %v6500_v2 = vld [vmem:[%s9817_s3 + $0x1] ss:$0 sm:$0xff] }
 0x2da   : > { %v1906_v8 = vsel %vm1904_vm2, %v1900_v6, 0 }
 0x2db   : > { %7458 = vmatpush3.bf16.msra.mxu1 %v1906_v8 }
 0x2dc   : > { %7463 = vmatprep.subr.bf16.mxu1 %v8554_v4 }
 0x2f5   : > { %v2173_v10 = vpop.f32.mrb[8].mxu0 }
 0x2f6   : > { %v2174_v11 = vadd.f32 %v6526_v9, %v2173_v10  ;;  %v7501_v12 = vpop.f32.mrb[9].mxu0  ;;  %v6552_v10 = vld [vmem:[%s9818_s14 + $0x1] ss:$0 sm:$0xff] }
 0x2f7   : > { %v2176_v13 = vpop.f32.mrb[10].mxu0 }
 0x2f8   : > { %v2293_v14 = vpack.c.bf16 %v2174_v11, %v2174_v11  ;;  %v7502_v15 = vpop.f32.mrb[11].mxu0 }
 0x2fa   : > { %v2298_v16 = vsel %vm1838_vm1, %v2293_v14, 0 }
 0x2fb   : > { %7524 = vmatpush3.bf16.xpose.msra.mxu0 %v2298_v16 }
 0x2fc   : > { %7529 = vmatprep.subr.bf16.mxu0 %v8554_v4 }
 0x395   : > { %v1879_v18 = vpop.f32.mrb[4].mxu1 }
 0x396   : > { %v1885_v19 = vmul.f32 0.17677669, %v1879_v18  ;;  %v7455_v20 = vpop.f32.mrb[5].mxu1 }
 0x397   : > { %v1882_v21 = vpop.f32.mrb[6].mxu1 }
 0x398   : > { %v7456_v22 = vpop.f32.mrb[7].mxu1  ;;  %v1886_v23 = vsel %vm1471_vm3, %v1885_v19, 1e-09 }
 0x399   : > { %v1888_v24 = vsel %vm1887_vm4, %v1886_v23, -inf }
 0x39a   : > { %1889 = vmax.xlane.f32.xlu1 %v1888_v24 }
 0x427   : > { %v1890_v25 = vpop.xlane.xlu1 %1889 }
 0x428   : > { %v1891_v26 = vsub.f32 %v1886_v23, %v1890_v25  ;;  %v6616_v23 = vld [vmem:[%s9816_s17 + $0x2] ss:$0 sm:$0xff] }
 0x42a   : > { %v1892_v27 = vmul.f32 1.442695, %v1891_v26 }
 0x42c   : > { %8387 = vpow2.f32 %v1892_v27 }
 0x436   : > { %v8388_v28 = vpop.eup %8387 }
 0x437   : > { %v1894_v29 = vsel %vm1887_vm4, %v8388_v28, 0.0 }
 0x438   : > { %1895 = vadd.xlane.f32.xlu1 %v1894_v29 }
 0x4c5   : > { %v1896_v30 = vpop.xlane.xlu1 %1895 }
 0x4c6   : > { %8389 = vrcp.f32 %v1896_v30 }
 0x4d0   : > { %v8390_v31 = vpop.eup %8389 }
 0x4d1   : > { %v1898_v32 = vmul.f32 %v8390_v31, %v8388_v28 }
 0x4d3   : > { %v1899_v35 = vpack.c.bf16 %v1898_v32, %v1898_v32 }
 0x4d5   : > { %7460 = vmatmul.mubr.msk.bf16.vlgmr.msra.gmra.mrb[8].mxu1 %vm1887_vm4, %v1899_v35 }
 0x4d6   : > { %7464 = vmatpush3.bf16.msra.mxu1 %v8169_v34  ;;  %7479 = vmatprep.mubr.msk.bf16.mxu1 %vm8555_vm0, %v8554_v4 }
 0x4d7   : > { %7465 = vmatprep.subr.bf16.mxu1 %v8554_v4 }
 0x4da   : > { %7466 = vmatpush3.bf16.msra.mxu1 %v8170_v36 }
 0x4db   : > { %7467 = vmatprep.subr.bf16.mxu1 %v8554_v4 }
 0x4de   : > { %7468 = vmatpush3.bf16.msra.mxu1 %v8171_v37 }
 0x4df   : > { %7469 = vmatprep.subr.bf16.mxu1 %v8554_v4 }
 0x4e2   : > { %7470 = vmatpush3.bf16.msra.mxu1 %v8172_v38 }
 0x4e3   : > { %7471 = vmatprep.subr.bf16.mxu1 %v8554_v4 }
 0x4e6   : > { %7472 = vmatpush3.bf16.msra.mxu1 %v8173_v39 }
 0x4e7   : > { %7473 = vmatprep.subr.bf16.mxu1 %v8554_v4 }
 0x4ea   : > { %7474 = vmatpush3.bf16.msra.mxu1 %v8174_v40 }
 0x4eb   : > { %7475 = vmatprep.subr.bf16.mxu1 %v8554_v4 }
 0x4ee   : > { %7476 = vmatpush3.bf16.msra.mxu1 %v8175_v41 }
 0x4ef   : > { %7477 = vmatprep.subr.bf16.mxu1 %v8554_v4 }
 0x4f2   : > { %7478 = vmatpush3.bf16.msra.mxu1 %v8176_v42 }
 0x4f3   : > { %7503 = vmatprep.subr.bf16.mxu1 %v8554_v4 }
 0x4f5   : > { %7480 = vmatmul.mubr.bf16.vlgmr.msra.gmra.mrb[12].mxu1 %v8936_v33 }
 0x4f6   : > { %7504 = vmatpush3.bf16.msra.mxu1 %v8177_v43  ;;  %7519 = vmatprep.mubr.msk.bf16.mxu1 %vm8555_vm0, %v8554_v4 }
 0x4f7   : > { %7505 = vmatprep.subr.bf16.mxu1 %v8554_v4 }
 0x4fa   : > { %7506 = vmatpush3.bf16.msra.mxu1 %v8178_v44 }
 0x4fb   : > { %7507 = vmatprep.subr.bf16.mxu1 %v8554_v4 }
 0x4fe   : > { %7508 = vmatpush3.bf16.msra.mxu1 %v8179_v45 }
 0x4ff   : > { %7509 = vmatprep.subr.bf16.mxu1 %v8554_v4 }
 0x502   : > { %7510 = vmatpush3.bf16.msra.mxu1 %v8180_v46 }
 0x503   : > { %7511 = vmatprep.subr.bf16.mxu1 %v8554_v4 }
 0x506   : > { %7512 = vmatpush3.bf16.msra.mxu1 %v8181_v47  ;;  %v8195_v47 = vld [vmem:[%s9820_s6 + $0x10] sm:$0xff]  }
 0x507   : > { %7513 = vmatprep.subr.bf16.mxu1 %v8554_v4 }
 0x50a   : > { %7514 = vmatpush3.bf16.msra.mxu1 %v8182_v48 }
 0x50b   : > { %7515 = vmatprep.subr.bf16.mxu1 %v8554_v4 }
 0x50e   : > { %7516 = vmatpush3.bf16.msra.mxu1 %v8183_v49  ;;  %v8196_v49 = vld [vmem:[%s9820_s6 + $0x18] sm:$0xff]  }
 0x50f   : > { %7517 = vmatprep.subr.bf16.mxu1 %v8554_v4 }
 0x512   : > { %7518 = vmatpush3.bf16.msra.mxu1 %v8184_v50 }
 0x513   : > { %7543 = vmatprep.subr.bf16.mxu1 %v8554_v4 }
 0x515   : > { %7520 = vmatmul.mubr.bf16.vlgmr.msra.gmra.mrb[16].mxu1 %v8936_v33 }
 0x516   : > { %7544 = vmatpush3.bf16.msra.mxu1 %v8185_v51  ;;  %7547 = vmatprep.mubr.msk.bf16.mxu1 %vm8555_vm0, %v8554_v4  ;;  %v8197_v51 = vld [vmem:[%s9811_s5 + $0x80] sm:$0xff]  }
 0x517   : > { %7545 = vmatprep.subr.bf16.mxu1 %v8554_v4 }
 0x51a   : > { %7546 = vmatpush3.bf16.msra.mxu1 %v8186_v52 }
 0x51b   : > { %7571 = vmatprep.subr.bf16.mxu1 %v8554_v4 }
 0x5a8   : > { %v1942_v53 = vpop.f32.mrb[8].mxu1 }
 0x5a9   : > { %v1948_v55 = vpack.c.bf16 %v1942_v53, %v1942_v53  ;;  %v7461_v56 = vpop.f32.mrb[9].mxu1 }
 0x5aa   : > { %v1945_v57 = vpop.f32.mrb[10].mxu1  ;;  %v8198_v56 = vld [vmem:[%s9811_s5 + $0x88] sm:$0xff]  }
 0x5ab   : > { %v7462_v58 = vpop.f32.mrb[11].mxu1  ;;  %7548 = vmatmul.mubr.msk.bf16.vlgmr.msra.gmra.mrb[20].mxu1 %vm1838_vm1, %v1948_v55  ;;  %v8199_v57 = vld [vmem:[%s9811_s5 + $0x90] sm:$0xff]  }
 0x5ac   : > { %7572 = vmatpush3.bf16.msra.mxu1 %v8187_v54  ;;  %7587 = vmatprep.mubr.msk.bf16.mxu1 %vm8555_vm0, %v8554_v4  ;;  %v8200_v58 = vld [vmem:[%s9811_s5 + $0x98] sm:$0xff]  }
 0x5ad   : > { %7573 = vmatprep.subr.bf16.mxu1 %v8554_v4 }
 0x5b0   : > { %7574 = vmatpush3.bf16.msra.mxu1 %v8188_v59  ;;  %v8201_v59 = vld [vmem:[%s9811_s5 + $0xa0] sm:$0xff]  }
 0x5b1   : > { %7575 = vmatprep.subr.bf16.mxu1 %v8554_v4 }
 0x5b4   : > { %7576 = vmatpush3.bf16.msra.mxu1 %v8189_v60  ;;  %v8202_v60 = vld [vmem:[%s9811_s5 + $0xa8] sm:$0xff]  }
 0x5b5   : > { %7577 = vmatprep.subr.bf16.mxu1 %v8554_v4 }
 0x5b8   : > { %7578 = vmatpush3.bf16.msra.mxu1 %v8190_v61  ;;  %v8203_v61 = vld [vmem:[%s9811_s5 + $0xb0] sm:$0xff]  }
 0x5b9   : > { %7579 = vmatprep.subr.bf16.mxu1 %v8554_v4 }
 0x5bc   : > { %7580 = vmatpush3.bf16.msra.mxu1 %v8191_v62  ;;  %v8204_v62 = vld [vmem:[%s9811_s5 + $0xb8] sm:$0xff]  }
 0x5bd   : > { %7581 = vmatprep.subr.bf16.mxu1 %v8554_v4 }
 0x5c0   : > { %7582 = vmatpush3.bf16.msra.mxu1 %v8192_v63  ;;  %v8205_v63 = vld [vmem:[%s9815_s29 + $0x80] sm:$0xff]  }
 0x5c1   : > { %7583 = vmatprep.subr.bf16.mxu1 %v8554_v4 }
 0x5c4   : > { %7584 = vmatpush3.bf16.msra.mxu1 %v8193_v0  ;;  %v8206_v0 = vld [vmem:[%s9815_s29 + $0x88] sm:$0xff]  }
 0x5c5   : > { %7585 = vmatprep.subr.bf16.mxu1 %v8554_v4 }
 0x5c8   : > { %v2060_v3 = vpop.f32.mrb[12].mxu1  ;;  %7586 = vmatpush3.bf16.msra.mxu1 %v8194_v1  ;;  %v8207_v1 = vld [vmem:[%s9815_s29 + $0x90] sm:$0xff]  }
 0x5c9   : > { %v2061_v5 = vadd.f32 %v6500_v2, %v2060_v3  ;;  %v7481_v6 = vpop.f32.mrb[13].mxu1  ;;  %7611 = vmatprep.subr.bf16.mxu1 %v8554_v4  ;;  %v8208_v2 = vld [vmem:[%s9815_s29 + $0x98] sm:$0xff]   ;;  %v8209_v3 = vld [vmem:[%s9815_s29 + $0xa0] sm:$0xff]  }
 0x5ca   : > { %v2063_v7 = vpop.f32.mrb[14].mxu1  ;;  %v8211_v6 = vld [vmem:[%s9815_s29 + $0xb0] sm:$0xff]  }
 0x5cb   : > { %v2292_v8 = vpack.c.bf16 %v2061_v5, %v2061_v5  ;;  %v7482_v9 = vpop.f32.mrb[15].mxu1  ;;  %7588 = vmatmul.mubr.bf16.vlgmr.msra.gmra.mrb[24].mxu1 %v8936_v33  ;;  %v8210_v5 = vld [vmem:[%s9815_s29 + $0xa8] sm:$0xff]   ;;  %v8212_v7 = vld [vmem:[%s9815_s29 + $0xb8] sm:$0xff]  }
 0x5cc   : > { %7613 = vmatprep.mubr.msk.bf16.mxu1 %vm8555_vm0, %v8554_v4  ;;  %v8214_v9 = vld [vmem:[%s9812_s24 + $0xc8] sm:$0xff]  }
 0x5cd   : > { %7526 = vmatmul.mubr.msk.bf16.vlgmr.msra.gmra.mrb[12].mxu0 %vm1838_vm1, %v2292_v8  ;;  %v8213_v8 = vld [vmem:[%s9812_s24 + $0xc0] sm:$0xff]  }
 0x5ce   : > { %7531 = vmatprep.mubr.msk.bf16.mxu0 %vm8555_vm0, %v8554_v4 }
 0x5e8   : > { %v2286_v11 = vpop.f32.mrb[16].mxu1 }
 0x5e9   : > { %v2287_v12 = vadd.f32 %v6552_v10, %v2286_v11  ;;  %v7521_v13 = vpop.f32.mrb[17].mxu1  ;;  %v8215_v10 = vld [vmem:[%s9812_s24 + $0xd0] sm:$0xff]   ;;  %v8216_v11 = vld [vmem:[%s9812_s24 + $0xd8] sm:$0xff]  }
 0x5ea   : > { %v2289_v14 = vpop.f32.mrb[18].mxu1  ;;  %v8218_v13 = vld [vmem:[%s9812_s24 + $0xe8] sm:$0xff]  }
 0x5eb   : > { %v2354_v15 = vpack.c.bf16 %v2287_v12, %v2287_v12  ;;  %v7522_v16 = vpop.f32.mrb[19].mxu1  ;;  %v8217_v12 = vld [vmem:[%s9812_s24 + $0xe0] sm:$0xff]   ;;  %v8219_v14 = vld [vmem:[%s9812_s24 + $0xf0] sm:$0xff]  }
 0x5ed   : > { %v2359_v18 = vsel %vm1904_vm2, %v2354_v15, 0  ;;  %v8220_v15 = vld [vmem:[%s9812_s24 + $0xf8] sm:$0xff]   ;;  %s9829_s24 = sld [smem:[#allocation61_spill]] }
 0x5ee   : > { %7530 = vmatpush3.bf16.msra.mxu0 %v2359_v18 }
 0x5ef   : > { %7535 = vmatprep.subr.bf16.mxu0 %v8554_v4 }
 0x67e   : > { %v9076_v19 = vpop.f32.mrb[20].mxu1 }
 0x67f   : > { %v7549_v20 = vpop.f32.mrb[21].mxu1 }
 0x680   : > { %v2514_v21 = vpop.f32.mrb[22].mxu1 }
 0x681   : > { %v7550_v22 = vpop.f32.mrb[23].mxu1 }
 0x69e   : > { %v2737_v24 = vpop.f32.mrb[24].mxu1 }
 0x69f   : > { %v2738_v25 = vadd.f32 %v6616_v23, %v2737_v24  ;;  %v7589_v26 = vpop.f32.mrb[25].mxu1  ;;  %v6590_v23 = vld [vmem:[%s9817_s3 + $0x2] ss:$0 sm:$0xff] }
 0x6a0   : > { %v2334_v27 = vpop.f32.mrb[12].mxu0  ;;  %v2740_v28 = vpop.f32.mrb[26].mxu1 }
 0x6a1   : > { %v2857_v29 = vpack.c.bf16 %v2738_v25, %v2738_v25  ;;  %v2340_v30 = vmul.f32 0.17677669, %v2334_v27  ;;  %v7527_v31 = vpop.f32.mrb[13].mxu0  ;;  %v7590_v32 = vpop.f32.mrb[27].mxu1 }
 0x6a2   : > { %v2337_v34 = vpop.f32.mrb[14].mxu0 }
 0x6a3   : > { %v2862_v35 = vsel %vm1838_vm1, %v2857_v29, 0  ;;  %v7528_v36 = vpop.f32.mrb[15].mxu0  ;;  %v2341_v37 = vsel %vm1471_vm3, %v2340_v30, 1e-09  ;;  %v6642_v30 = vld [vmem:[%s9818_s14 + $0x2] ss:$0 sm:$0xff] }
 0x6a4   : > { %7612 = vmatpush3.bf16.xpose.msra.mxu1 %v2862_v35  ;;  %v2342_v38 = vsel %vm1887_vm4, %v2341_v37, -inf }
 0x6a5   : > { %2343 = vmax.xlane.f32.xlu0 %v2342_v38  ;;  %7617 = vmatprep.subr.bf16.mxu1 %v8554_v4  ;;  %v6703_v38 = vld [vmem:[%s9816_s17 + $0x3] ss:$0 sm:$0xff] }
 0x732   : > { %v2344_v39 = vpop.xlane.xlu0 %2343 }
 0x733   : > { %v2345_v40 = vsub.f32 %v2341_v37, %v2344_v39 }
 0x735   : > { %v2346_v41 = vmul.f32 1.442695, %v2345_v40 }
 0x737   : > { %8391 = vpow2.f32 %v2346_v41 }
 0x741   : > { %v8392_v42 = vpop.eup %8391 }
 0x742   : > { %v2348_v43 = vsel %vm1887_vm4, %v8392_v42, 0.0 }
 0x743   : > { %2349 = vadd.xlane.f32.xlu1 %v2348_v43 }
 0x7d0   : > { %v2350_v44 = vpop.xlane.xlu1 %2349 }
 0x7d1   : > { %8393 = vrcp.f32 %v2350_v44 }
 0x7db   : > { %v8394_v45 = vpop.eup %8393 }
 0x7dc   : > { %v2352_v46 = vmul.f32 %v8394_v45, %v8392_v42 }
 0x7de   : > { %v2353_v48 = vpack.c.bf16 %v2352_v46, %v2352_v46 }
 0x7e0   : > { %7532 = vmatmul.mubr.msk.bf16.vlgmr.msra.gmra.mrb[16].mxu0 %vm1887_vm4, %v2353_v48 }
 0x7e1   : > { %7536 = vmatpush3.bf16.msra.mxu0 %v8195_v47  ;;  %7539 = vmatprep.mubr.msk.bf16.mxu0 %vm8555_vm0, %v8554_v4 }
 0x7e2   : > { %7537 = vmatprep.subr.bf16.mxu0 %v8554_v4 }
 0x7e5   : > { %7538 = vmatpush3.bf16.msra.mxu0 %v8196_v49 }
 0x7e6   : > { %7551 = vmatprep.subr.bf16.mxu0 %v8554_v4 }
 0x8b3   : > { %v2395_v50 = vpop.f32.mrb[16].mxu0 }
 0x8b4   : > { %v2401_v52 = vpack.c.bf16 %v2395_v50, %v2395_v50  ;;  %v7533_v53 = vpop.f32.mrb[17].mxu0 }
 0x8b5   : > { %v2398_v54 = vpop.f32.mrb[18].mxu0 }
 0x8b6   : > { %v7534_v55 = vpop.f32.mrb[19].mxu0  ;;  %7540 = vmatmul.mubr.msk.bf16.vlgmr.msra.gmra.mrb[20].mxu0 %vm1838_vm1, %v2401_v52 }
 0x8b7   : > { %7552 = vmatpush3.bf16.msra.mxu0 %v8197_v51  ;;  %7567 = vmatprep.mubr.msk.bf16.mxu0 %vm8555_vm0, %v8554_v4 }
 0x8b8   : > { %7553 = vmatprep.subr.bf16.mxu0 %v8554_v4 }
 0x8bb   : > { %7554 = vmatpush3.bf16.msra.mxu0 %v8198_v56 }
 0x8bc   : > { %7555 = vmatprep.subr.bf16.mxu0 %v8554_v4 }
 0x8bf   : > { %7556 = vmatpush3.bf16.msra.mxu0 %v8199_v57 }
 0x8c0   : > { %7557 = vmatprep.subr.bf16.mxu0 %v8554_v4 }
 0x8c3   : > { %7558 = vmatpush3.bf16.msra.mxu0 %v8200_v58 }
 0x8c4   : > { %7559 = vmatprep.subr.bf16.mxu0 %v8554_v4 }
 0x8c7   : > { %7560 = vmatpush3.bf16.msra.mxu0 %v8201_v59 }
 0x8c8   : > { %7561 = vmatprep.subr.bf16.mxu0 %v8554_v4 }
 0x8cb   : > { %7562 = vmatpush3.bf16.msra.mxu0 %v8202_v60 }
 0x8cc   : > { %7563 = vmatprep.subr.bf16.mxu0 %v8554_v4 }
 0x8cf   : > { %7564 = vmatpush3.bf16.msra.mxu0 %v8203_v61  ;;  %v8221_v61 = vld [vmem:[%s9820_s6 + $0x20] sm:$0xff]  }
 0x8d0   : > { %7565 = vmatprep.subr.bf16.mxu0 %v8554_v4 }
 0x8d3   : > { %7566 = vmatpush3.bf16.msra.mxu0 %v8204_v62 }
 0x8d4   : > { %7591 = vmatprep.subr.bf16.mxu0 %v8554_v4 }
 0x8d6   : > { %7568 = vmatmul.mubr.bf16.vlgmr.msra.gmra.mrb[24].mxu0 %v8936_v33 }
 0x8d7   : > { %7592 = vmatpush3.bf16.msra.mxu0 %v8205_v63  ;;  %7607 = vmatprep.mubr.msk.bf16.mxu0 %vm8555_vm0, %v8554_v4  ;;  %v8222_v63 = vld [vmem:[%s9820_s6 + $0x28] sm:$0xff]  }
 0x8d8   : > { %7593 = vmatprep.subr.bf16.mxu0 %v8554_v4 }
 0x8db   : > { %7594 = vmatpush3.bf16.msra.mxu0 %v8206_v0 }
 0x8dc   : > { %7595 = vmatprep.subr.bf16.mxu0 %v8554_v4 }
 0x8df   : > { %7596 = vmatpush3.bf16.msra.mxu0 %v8207_v1  ;;  %v8223_v1 = vld [vmem:[%s9811_s5 + $0xc0] sm:$0xff]  }
 0x8e0   : > { %7597 = vmatprep.subr.bf16.mxu0 %v8554_v4 }
 0x8e3   : > { %7598 = vmatpush3.bf16.msra.mxu0 %v8208_v2 }
 0x8e4   : > { %7599 = vmatprep.subr.bf16.mxu0 %v8554_v4 }
 0x8e7   : > { %7600 = vmatpush3.bf16.msra.mxu0 %v8209_v3 }
 0x8e8   : > { %7601 = vmatprep.subr.bf16.mxu0 %v8554_v4 }
 0x8eb   : > { %7602 = vmatpush3.bf16.msra.mxu0 %v8210_v5 }
 0x8ec   : > { %7603 = vmatprep.subr.bf16.mxu0 %v8554_v4 }
 0x8ef   : > { %7604 = vmatpush3.bf16.msra.mxu0 %v8211_v6 }
 0x8f0   : > { %7605 = vmatprep.subr.bf16.mxu0 %v8554_v4 }
 0x8f3   : > { %7606 = vmatpush3.bf16.msra.mxu0 %v8212_v7  ;;  %v8224_v7 = vld [vmem:[%s9811_s5 + $0xc8] sm:$0xff]  }
 0x8f4   : > { %7651 = vmatprep.subr.bf16.mxu0 %v8554_v4 }
 0x8f6   : > { %7608 = vmatmul.mubr.bf16.vlgmr.msra.gmra.mrb[28].mxu0 %v8936_v33 }
 0x8f7   : > { %7652 = vmatpush3.bf16.msra.mxu0 %v8213_v8  ;;  %7667 = vmatprep.mubr.msk.bf16.mxu0 %vm8555_vm0, %v8554_v4  ;;  %v8225_v8 = vld [vmem:[%s9811_s5 + $0xd0] sm:$0xff]  }
 0x8f8   : > { %7653 = vmatprep.subr.bf16.mxu0 %v8554_v4 }
 0x8fb   : > { %7654 = vmatpush3.bf16.msra.mxu0 %v8214_v9  ;;  %v8226_v9 = vld [vmem:[%s9811_s5 + $0xd8] sm:$0xff]  }
 0x8fc   : > { %7655 = vmatprep.subr.bf16.mxu0 %v8554_v4 }
 0x8ff   : > { %7656 = vmatpush3.bf16.msra.mxu0 %v8215_v10  ;;  %v8227_v10 = vld [vmem:[%s9811_s5 + $0xe0] sm:$0xff]  }
 0x900   : > { %7657 = vmatprep.subr.bf16.mxu0 %v8554_v4 }
 0x903   : > { %7658 = vmatpush3.bf16.msra.mxu0 %v8216_v11  ;;  %v8228_v11 = vld [vmem:[%s9811_s5 + $0xe8] sm:$0xff]  }
 0x904   : > { %7659 = vmatprep.subr.bf16.mxu0 %v8554_v4 }
 0x907   : > { %7660 = vmatpush3.bf16.msra.mxu0 %v8217_v12  ;;  %v8229_v12 = vld [vmem:[%s9811_s5 + $0xf0] sm:$0xff]  }
 0x908   : > { %7661 = vmatprep.subr.bf16.mxu0 %v8554_v4 }
 0x90b   : > { %7662 = vmatpush3.bf16.msra.mxu0 %v8218_v13  ;;  %v8230_v13 = vld [vmem:[%s9811_s5 + $0xf8] sm:$0xff]   ;;  %s9828_s5 = sld [smem:[#allocation63_spill]] }
 0x90c   : > { %7663 = vmatprep.subr.bf16.mxu0 %v8554_v4 }
 0x90f   : > { %7664 = vmatpush3.bf16.msra.mxu0 %v8219_v14  ;;  %v8231_v14 = vld [vmem:[%s9815_s29 + $0xc0] sm:$0xff]  }
 0x910   : > { %7665 = vmatprep.subr.bf16.mxu0 %v8554_v4 }
 0x913   : > { %7666 = vmatpush3.bf16.msra.mxu0 %v8220_v15  ;;  %v8232_v15 = vld [vmem:[%s9815_s29 + $0xc8] sm:$0xff]  }
 0x914   : > { %7691 = vmatprep.subr.bf16.mxu0 %v8554_v4 }
 0x916   : > { %7668 = vmatmul.mubr.bf16.vlgmr.msra.gmra.mrb[32].mxu0 %v8936_v33 }
 0x917   : > { %7693 = vmatprep.mubr.msk.bf16.mxu0 %vm8555_vm0, %v8554_v4 }
 0x989   : > { %v2456_v16 = vpop.f32.mrb[20].mxu0 }
 0x98a   : > { %v9153_v18 = vadd.f32 %v9076_v19, %v2456_v16  ;;  %v7541_v20 = vpop.f32.mrb[21].mxu0  ;;  %v8233_v16 = vld [vmem:[%s9815_s29 + $0xd0] sm:$0xff]  }
 0x98b   : > { %v2459_v21 = vpop.f32.mrb[22].mxu0  ;;  %v8234_v20 = vld [vmem:[%s9815_s29 + $0xd8] sm:$0xff]  }
 0x98c   : > { %v7542_v22 = vpop.f32.mrb[23].mxu0  ;;  %v8235_v21 = vld [vmem:[%s9815_s29 + $0xe0] sm:$0xff]  }
 0x98d   : > { %v8236_v22 = vld [vmem:[%s9815_s29 + $0xe8] sm:$0xff]  }
 0x9a9   : > { %v2624_v24 = vpop.f32.mrb[24].mxu0 }
 0x9aa   : > { %v2625_v25 = vadd.f32 %v6590_v23, %v2624_v24  ;;  %v7569_v26 = vpop.f32.mrb[25].mxu0  ;;  %v8237_v23 = vld [vmem:[%s9815_s29 + $0xf0] sm:$0xff]   ;;  %v8238_v24 = vld [vmem:[%s9815_s29 + $0xf8] sm:$0xff]  }
 0x9ab   : > { %v2627_v27 = vpop.f32.mrb[26].mxu0 }
 0x9ac   : > { %v2856_v28 = vpack.c.bf16 %v2625_v25, %v2625_v25  ;;  %v7570_v29 = vpop.f32.mrb[27].mxu0 }
 0x9ae   : > { %7614 = vmatmul.mubr.msk.bf16.vlgmr.msra.gmra.mrb[28].mxu1 %vm1838_vm1, %v2856_v28 }
 0x9af   : > { %7619 = vmatprep.mubr.msk.bf16.mxu1 %vm8555_vm0, %v8554_v4 }
 0x9c9   : > { %v2850_v31 = vpop.f32.mrb[28].mxu0 }
 0x9ca   : > { %v2851_v19 = vadd.f32 %v6642_v30, %v2850_v31  ;;  %v7609_v32 = vpop.f32.mrb[29].mxu0  ;;  %v6677_v30 = vld [vmem:[%s9817_s3 + $0x3] ss:$0 sm:$0xff] }
 0x9cb   : > { %v2853_v34 = vpop.f32.mrb[30].mxu0 }
 0x9cc   : > { %v2918_v35 = vpack.c.bf16 %v2851_v19, %v2851_v19  ;;  %v7610_v36 = vpop.f32.mrb[31].mxu0 }
 0x9ce   : > { %v2923_v37 = vsel %vm1904_vm2, %v2918_v35, 0 }
 0x9cf   : > { %7618 = vmatpush3.bf16.msra.mxu1 %v2923_v37 }
 0x9d0   : > { %7623 = vmatprep.subr.bf16.mxu1 %v8554_v4 }
 0x9e9   : > { %v3247_v39 = vpop.f32.mrb[32].mxu0 }
 0x9ea   : > { %v3248_v40 = vadd.f32 %v6703_v38, %v3247_v39  ;;  %v7669_v41 = vpop.f32.mrb[33].mxu0 }
 0x9eb   : > { %v3250_v42 = vpop.f32.mrb[34].mxu0 }
 0x9ec   : > { %v3367_v43 = vpack.c.bf16 %v3248_v40, %v3248_v40  ;;  %v7670_v44 = vpop.f32.mrb[35].mxu0 }
 0x9ee   : > { %v3372_v45 = vsel %vm1838_vm1, %v3367_v43, 0 }
 0x9ef   : > { %7692 = vmatpush3.bf16.xpose.msra.mxu0 %v3372_v45 }
 0x9f0   : > { %7697 = vmatprep.subr.bf16.mxu0 %v8554_v4 }
 0xa81   : > { %v2898_v46 = vpop.f32.mrb[28].mxu1 }
 0xa82   : > { %v2904_v47 = vmul.f32 0.17677669, %v2898_v46  ;;  %v7615_v48 = vpop.f32.mrb[29].mxu1 }
 0xa83   : > { %v2901_v49 = vpop.f32.mrb[30].mxu1 }
 0xa84   : > { %v7616_v50 = vpop.f32.mrb[31].mxu1  ;;  %v2905_v51 = vsel %vm1471_vm3, %v2904_v47, 1e-09 }
 0xa85   : > { %v2906_v52 = vsel %vm1887_vm4, %v2905_v51, -inf }
 0xa86   : > { %2907 = vmax.xlane.f32.xlu0 %v2906_v52 }
 0xb13   : > { %v2908_v53 = vpop.xlane.xlu0 %2907 }
 0xb14   : > { %v2909_v54 = vsub.f32 %v2905_v51, %v2908_v53 }
 0xb16   : > { %v2910_v55 = vmul.f32 1.442695, %v2909_v54 }
 0xb18   : > { %8395 = vpow2.f32 %v2910_v55 }
 0xb22   : > { %v8396_v56 = vpop.eup %8395 }
 0xb23   : > { %v2912_v57 = vsel %vm1887_vm4, %v8396_v56, 0.0 }
 0xb24   : > { %2913 = vadd.xlane.f32.xlu1 %v2912_v57 }
 0xbb1   : > { %v2914_v58 = vpop.xlane.xlu1 %2913 }
 0xbb2   : > { %8397 = vrcp.f32 %v2914_v58  ;;  %v8239_v58 = vld [vmem:[%s9820_s6 + $0x30] sm:$0xff]  }
 0xbbc   : > { %v8398_v59 = vpop.eup %8397 }
 0xbbd   : > { %v2916_v60 = vmul.f32 %v8398_v59, %v8396_v56 }
 0xbbf   : > { %v2917_v62 = vpack.c.bf16 %v2916_v60, %v2916_v60 }
 0xbc1   : > { %7620 = vmatmul.mubr.msk.bf16.vlgmr.msra.gmra.mrb[32].mxu1 %vm1887_vm4, %v2917_v62 }
 0xbc2   : > { %7624 = vmatpush3.bf16.msra.mxu1 %v8221_v61  ;;  %7627 = vmatprep.mubr.msk.bf16.mxu1 %vm8555_vm0, %v8554_v4 }
 0xbc3   : > { %7625 = vmatprep.subr.bf16.mxu1 %v8554_v4 }
 0xbc6   : > { %7626 = vmatpush3.bf16.msra.mxu1 %v8222_v63 }
 0xbc7   : > { %7631 = vmatprep.subr.bf16.mxu1 %v8554_v4 }
 0xc94   : > { %v2959_v0 = vpop.f32.mrb[32].mxu1 }
 0xc95   : > { %v2965_v2 = vpack.c.bf16 %v2959_v0, %v2959_v0  ;;  %v7621_v3 = vpop.f32.mrb[33].mxu1 }
 0xc96   : > { %v2962_v5 = vpop.f32.mrb[34].mxu1 }
 0xc97   : > { %v7622_v6 = vpop.f32.mrb[35].mxu1  ;;  %7628 = vmatmul.mubr.msk.bf16.vlgmr.msra.gmra.mrb[36].mxu1 %vm1838_vm1, %v2965_v2  ;;  %v6747_v2 = vld [vmem:[%s9824_s0] ss:$0 sm:$0xff] }
 0xc98   : > { %7632 = vmatpush3.bf16.msra.mxu1 %v8223_v1  ;;  %7647 = vmatprep.mubr.msk.bf16.mxu1 %vm8555_vm0, %v8554_v4 }
 0xc99   : > { %7633 = vmatprep.subr.bf16.mxu1 %v8554_v4 }
 0xc9c   : > { %7634 = vmatpush3.bf16.msra.mxu1 %v8224_v7 }
 0xc9d   : > { %7635 = vmatprep.subr.bf16.mxu1 %v8554_v4 }
 0xca0   : > { %7636 = vmatpush3.bf16.msra.mxu1 %v8225_v8 }
 0xca1   : > { %7637 = vmatprep.subr.bf16.mxu1 %v8554_v4 }
 0xca4   : > { %7638 = vmatpush3.bf16.msra.mxu1 %v8226_v9  ;;  %v8423_v9 = vld [vmem:[#allocation2] sm:$0xff] }
 0xca5   : > { %7639 = vmatprep.subr.bf16.mxu1 %v8554_v4 }
 0xca8   : > { %7640 = vmatpush3.bf16.msra.mxu1 %v8227_v10 }
 0xca9   : > { %7641 = vmatprep.subr.bf16.mxu1 %v8554_v4 }
 0xcac   : > { %7642 = vmatpush3.bf16.msra.mxu1 %v8228_v11  ;;  %v8241_v11 = vld [vmem:[%s9822_s2] sm:$0xff]  }
 0xcad   : > { %7643 = vmatprep.subr.bf16.mxu1 %v8554_v4 }
 0xcb0   : > { %7644 = vmatpush3.bf16.msra.mxu1 %v8229_v12  ;;  %v8245_v12 = vld [vmem:[%s9823_s18] sm:$0xff]  }
 0xcb1   : > { %7645 = vmatprep.subr.bf16.mxu1 %v8554_v4 }
 0xcb4   : > { %7646 = vmatpush3.bf16.msra.mxu1 %v8230_v13  ;;  %v8242_v13 = vld [vmem:[%s9822_s2 + $0x8] sm:$0xff]  }
 0xcb5   : > { %7671 = vmatprep.subr.bf16.mxu1 %v8554_v4 }
 0xcb7   : > { %7648 = vmatmul.mubr.bf16.vlgmr.msra.gmra.mrb[40].mxu1 %v8936_v33 }
 0xcb8   : > { %7672 = vmatpush3.bf16.msra.mxu1 %v8231_v14  ;;  %7687 = vmatprep.mubr.msk.bf16.mxu1 %vm8555_vm0, %v8554_v4  ;;  %v8247_v14 = vld [vmem:[%s9823_s18 + $0x8] sm:$0xff]  }
 0xcb9   : > { %7673 = vmatprep.subr.bf16.mxu1 %v8554_v4 }
 0xcbc   : > { %7674 = vmatpush3.bf16.msra.mxu1 %v8232_v15  ;;  %v8243_v15 = vld [vmem:[%s9822_s2 + $0x10] sm:$0xff]  }
 0xcbd   : > { %7675 = vmatprep.subr.bf16.mxu1 %v8554_v4 }
 0xcc0   : > { %7676 = vmatpush3.bf16.msra.mxu1 %v8233_v16  ;;  %v8244_v16 = vld [vmem:[%s9822_s2 + $0x18] sm:$0xff]  }
 0xcc1   : > { %7677 = vmatprep.subr.bf16.mxu1 %v8554_v4 }
 0xcc4   : > { %7678 = vmatpush3.bf16.msra.mxu1 %v8234_v20  ;;  %v8246_v20 = vld [vmem:[%s9822_s2 + $0x20] sm:$0xff]  }
 0xcc5   : > { %7679 = vmatprep.subr.bf16.mxu1 %v8554_v4 }
 0xcc8   : > { %7680 = vmatpush3.bf16.msra.mxu1 %v8235_v21  ;;  %v8248_v21 = vld [vmem:[%s9822_s2 + $0x28] sm:$0xff]  }
 0xcc9   : > { %7681 = vmatprep.subr.bf16.mxu1 %v8554_v4 }
 0xccc   : > { %7682 = vmatpush3.bf16.msra.mxu1 %v8236_v22 }
 0xccd   : > { %7683 = vmatprep.subr.bf16.mxu1 %v8554_v4 }
 0xcd0   : > { %7684 = vmatpush3.bf16.msra.mxu1 %v8237_v23 }
 0xcd1   : > { %7685 = vmatprep.subr.bf16.mxu1 %v8554_v4 }
 0xcd4   : > { %7686 = vmatpush3.bf16.msra.mxu1 %v8238_v24 }
 0xcd5   : > { %7731 = vmatprep.subr.bf16.mxu1 %v8554_v4 }
 0xcd7   : > { %7688 = vmatmul.mubr.bf16.vlgmr.msra.gmra.mrb[44].mxu1 %v8936_v33  ;;  %v6729_v33 = vld [vmem:[%s9818_s14 + $0x3] ss:$0 sm:$0xff] }
 0xcd8   : > { %7747 = vmatprep.mubr.msk.bf16.mxu1 %vm8555_vm0, %v8554_v4  ;;  %7732 = vmatpush3.bf16.msra.mxu1 %v8241_v11 }
 0xcd9   : > { %7733 = vmatprep.subr.bf16.mxu1 %v8554_v4 }
 0xcdc   : > { %7734 = vmatpush3.bf16.msra.mxu1 %v8242_v13 }
 0xcdd   : > { %7735 = vmatprep.subr.bf16.mxu1 %v8554_v4 }
 0xce0   : > { %7736 = vmatpush3.bf16.msra.mxu1 %v8243_v15 }
 0xce1   : > { %7737 = vmatprep.subr.bf16.mxu1 %v8554_v4 }
 0xce4   : > { %7738 = vmatpush3.bf16.msra.mxu1 %v8244_v16 }
 0xce5   : > { %7739 = vmatprep.subr.bf16.mxu1 %v8554_v4 }
 0xce8   : > { %7740 = vmatpush3.bf16.msra.mxu1 %v8246_v20 }
 0xce9   : > { %7741 = vmatprep.subr.bf16.mxu1 %v8554_v4 }
 0xcec   : > { %7742 = vmatpush3.bf16.msra.mxu1 %v8248_v21 }
 0xced   : > { %7743 = vmatprep.subr.bf16.mxu1 %v8554_v4 }
 0xd6a   : > { %v3020_v25 = vpop.f32.mrb[36].mxu1 }
 0xd6b   : > { %v3026_v26 = vadd.f32 %v3020_v25, %v9153_v18  ;;  %v7629_v27 = vpop.f32.mrb[37].mxu1 }
 0xd6c   : > { %v3023_v28 = vpop.f32.mrb[38].mxu1  ;;  %v8250_v27 = vld [vmem:[%s9822_s2 + $0x30] sm:$0xff]  }
 0xd6d   : > { %v7630_v29 = vpop.f32.mrb[39].mxu1  ;;  %v8251_v28 = vld [vmem:[%s9823_s18 + $0x18] sm:$0xff]   ;;  %7744 = vmatpush3.bf16.msra.mxu1 %v8250_v27 }
 0xd6e   : > { %7745 = vmatprep.subr.bf16.mxu1 %v8554_v4  ;;  %v8252_v29 = vld [vmem:[%s9822_s2 + $0x38] sm:$0xff]  }
 0xd71   : > { %7746 = vmatpush3.bf16.msra.mxu1 %v8252_v29  ;;  %v8266_v29 = vld [vmem:[%s9822_s2 + $0x48] sm:$0xff]  }
 0xd72   : > { %7771 = vmatprep.subr.bf16.mxu1 %v8554_v4 }
 0xd8a   : > { %v3134_v31 = vpop.f32.mrb[40].mxu1 }
 0xd8b   : > { %v3135_v19 = vadd.f32 %v6677_v30, %v3134_v31  ;;  %v7649_v32 = vpop.f32.mrb[41].mxu1  ;;  %v8253_v30 = vld [vmem:[%s9823_s18 + $0x20] sm:$0xff]  }
 0xd8c   : > { %v3137_v34 = vpop.f32.mrb[42].mxu1  ;;  %v1467_v31 = vld [vmem:[%s9825_s15] sm:$0xff] }
 0xd8d   : > { %v3366_v35 = vpack.c.bf16 %v3135_v19, %v3135_v19  ;;  %v7650_v36 = vpop.f32.mrb[43].mxu1  ;;  %v1468_v19 = vld [vmem:[%s9825_s15 + $0x8] sm:$0xff] }
 0xd8e   : > { %v9272_v32 = vpack.c.bf16 %v1468_v19, %v1467_v31  ;;  %v8254_v34 = vld [vmem:[%s9823_s18 + $0x28] sm:$0xff]   ;;  %v8256_v36 = vld [vmem:[%s9823_s18 + $0x38] sm:$0xff]   ;;  %v8267_v19 = vld [vmem:[%s9822_s2 + $0x50] sm:$0xff]  }
 0xd8f   : > { %7694 = vmatmul.mubr.msk.bf16.vlgmr.msra.gmra.mrb[36].mxu0 %vm1838_vm1, %v3366_v35  ;;  %v8255_v35 = vld [vmem:[%s9823_s18 + $0x30] sm:$0xff]  }
 0xd90   : > { %7699 = vmatprep.mubr.msk.bf16.mxu0 %vm8555_vm0, %v8554_v4  ;;  %7748 = vmatmul.mubr.bf16.vlgmr.msra.gmra.mrb[48].mxu1 %v9272_v32 }
 0xd91   : > { %7773 = vmatprep.mubr.msk.bf16.mxu1 %vm8555_vm0, %v8554_v4 }
 0xdaa   : > { %v3360_v37 = vpop.f32.mrb[44].mxu1 }
 0xdab   : > { %v3361_v38 = vadd.f32 %v6729_v33, %v3360_v37  ;;  %v7689_v39 = vpop.f32.mrb[45].mxu1 }
 0xdac   : > { %v3363_v18 = vpop.f32.mrb[46].mxu1 }
 0xdad   : > { %v3428_v40 = vpack.c.bf16 %v3361_v38, %v3361_v38  ;;  %v7690_v41 = vpop.f32.mrb[47].mxu1  ;;  %v6748_v18 = vld [vmem:[%s1449_s11] ss:$0 sm:$0xff]  ;;  %s9831_s11 = sld [smem:[#allocation9_spill]] }
 0xdae   : > { %v6749_v41 = vld [vmem:[%s1452_s28] ss:$0 sm:$0xff]  ;;  %s9832_s28 = sld [smem:[#allocation65_spill]] }
 0xdaf   : > { %v3433_v42 = vsel %vm1904_vm2, %v3428_v40, 0 }
 0xdb0   : > { %7698 = vmatpush3.bf16.msra.mxu0 %v3433_v42 }
 0xdb1   : > { %7703 = vmatprep.subr.bf16.mxu0 %v8554_v4 }
 0xe62   : > { %v3408_v43 = vpop.f32.mrb[36].mxu0 }
 0xe63   : > { %v3414_v44 = vmul.f32 0.17677669, %v3408_v43  ;;  %v7695_v45 = vpop.f32.mrb[37].mxu0 }
 0xe64   : > { %v3411_v46 = vpop.f32.mrb[38].mxu0  ;;  %v6759_v45 = vld [vmem:[%s9828_s5] ss:$0 sm:$0xff] }
 0xe65   : > { %v7696_v47 = vpop.f32.mrb[39].mxu0  ;;  %v3415_v48 = vsel %vm1471_vm3, %v3414_v44, 1e-09  ;;  %v3790_v46 = vpop.f32.mrb[48].mxu1 }
 0xe66   : > { %v3416_v49 = vsel %vm1887_vm4, %v3415_v48, -inf  ;;  %v3791_v47 = vadd.f32 %v6759_v45, %v3790_v46  ;;  %v8277_v46 = vld [vmem:[%s9823_s18 + $0x60] sm:$0xff]  }
 0xe67   : > { %3417 = vmax.xlane.f32.xlu0 %v3416_v49 }
 0xef4   : > { %v3418_v50 = vpop.xlane.xlu0 %3417 }
 0xef5   : > { %v3419_v51 = vsub.f32 %v3415_v48, %v3418_v50  ;;  %v7749_v48 = vpop.f32.mrb[49].mxu1 }
 0xef6   : > { %v3793_v49 = vpop.f32.mrb[50].mxu1  ;;  %v8279_v48 = vld [vmem:[%s9823_s18 + $0x70] sm:$0xff]  }
 0xef7   : > { %v3420_v52 = vmul.f32 1.442695, %v3419_v51  ;;  %v3794_v50 = vadd.f32 %v6759_v45, %v3793_v49  ;;  %v7750_v51 = vpop.f32.mrb[51].mxu1  ;;  %v8275_v45 = vld [vmem:[%s9823_s18 + $0x58] sm:$0xff]  }
 0xef8   : > { %v8280_v49 = vld [vmem:[%s9823_s18 + $0x78] sm:$0xff]   ;;  %v8282_v51 = vld [vmem:[%s9830_s21 + $0x48] sm:$0xff]  }
 0xef9   : > { %8399 = vpow2.f32 %v3420_v52  ;;  %v3910_v52 = vpack.c.bf16 %v3794_v50, %v3791_v47  ;;  %v8278_v47 = vld [vmem:[%s9823_s18 + $0x68] sm:$0xff]   ;;  %v8281_v50 = vld [vmem:[%s9830_s21 + $0x40] sm:$0xff]  }
 0xf03   : > { %v8400_v53 = vpop.eup %8399 }
 0xf04   : > { %v3422_v54 = vsel %vm1887_vm4, %v8400_v53, 0.0 }
 0xf05   : > { %3423 = vadd.xlane.f32.xlu1 %v3422_v54  ;;  %v6750_v54 = vld [vmem:[%s9829_s24] ss:$0 sm:$0xff] }
 0xf92   : > { %v3424_v55 = vpop.xlane.xlu1 %3423 }
 0xf93   : > { %8401 = vrcp.f32 %v3424_v55 }
 0xf9d   : > { %v8402_v56 = vpop.eup %8401 }
 0xf9e   : > { %v3426_v57 = vmul.f32 %v8402_v56, %v8400_v53  ;;  %v3915_v53 = vsel %vm1838_vm1, %v3910_v52, 0  ;;  %v8283_v52 = vld [vmem:[%s9830_s21 + $0x50] sm:$0xff]  }
 0xf9f   : > { %7772 = vmatpush3.bf16.xpose.msra.mxu1 %v3915_v53  ;;  %v8284_v53 = vld [vmem:[%s9830_s21 + $0x58] sm:$0xff]  }
 0xfa0   : > { %v3427_v59 = vpack.c.bf16 %v3426_v57, %v3426_v57  ;;  %7777 = vmatprep.subr.bf16.mxu1 %v8554_v4 }
 0xfa2   : > { %7700 = vmatmul.mubr.msk.bf16.vlgmr.msra.gmra.mrb[40].mxu0 %vm1887_vm4, %v3427_v59 }
 0xfa3   : > { %7704 = vmatpush3.bf16.msra.mxu0 %v8239_v58  ;;  %7707 = vmatprep.mubr.msk.bf16.mxu0 %vm8555_vm0, %v8554_v4 }
 0xfa4   : > { %7705 = vmatprep.subr.bf16.mxu0 %v8554_v4 }
 0xfa7   : > { %7706 = vmatpush3.bf16.msra.mxu0 %v8240_v17 }
 0xfa8   : > { %7711 = vmatprep.subr.bf16.mxu0 %v8554_v4 }
0x1075   : > { %v3469_v60 = vpop.f32.mrb[40].mxu0 }
0x1076   : > { %v3475_v61 = vpack.c.bf16 %v3469_v60, %v3469_v60  ;;  %v7701_v62 = vpop.f32.mrb[41].mxu0  ;;  %v8257_v60 = vld [vmem:[%s9830_s21] sm:$0xff]  }
0x1077   : > { %v3472_v63 = vpop.f32.mrb[42].mxu0  ;;  %v8259_v62 = vld [vmem:[%s9830_s21 + $0x10] sm:$0xff]  }
0x1078   : > { %v7702_v0 = vpop.f32.mrb[43].mxu0  ;;  %7708 = vmatmul.mubr.msk.bf16.vlgmr.msra.gmra.mrb[44].mxu0 %vm1838_vm1, %v3475_v61  ;;  %v8258_v61 = vld [vmem:[%s9830_s21 + $0x8] sm:$0xff]   ;;  %v8260_v63 = vld [vmem:[%s9830_s21 + $0x18] sm:$0xff]  }
0x1079   : > { %7727 = vmatprep.mubr.msk.bf16.mxu0 %vm8555_vm0, %v8554_v4  ;;  %7712 = vmatpush3.bf16.msra.mxu0 %v8245_v12  ;;  %v8261_v0 = vld [vmem:[%s9830_s21 + $0x20] sm:$0xff]  }
0x107a   : > { %7713 = vmatprep.subr.bf16.mxu0 %v8554_v4 }
0x107d   : > { %7714 = vmatpush3.bf16.msra.mxu0 %v8247_v14 }
0x107e   : > { %7715 = vmatprep.subr.bf16.mxu0 %v8554_v4 }
0x114b   : > { %v3530_v1 = vpop.f32.mrb[44].mxu0 }
0x114c   : > { %v3536_v3 = vadd.f32 %v3530_v1, %v3026_v26  ;;  %v7709_v5 = vpop.f32.mrb[45].mxu0  ;;  %v8249_v26 = vld [vmem:[%s9823_s18 + $0x10] sm:$0xff]   ;;  %v8262_v1 = vld [vmem:[%s9830_s21 + $0x28] sm:$0xff]  }
0x114d   : > { %v3533_v6 = vpop.f32.mrb[46].mxu0  ;;  %7716 = vmatpush3.bf16.msra.mxu0 %v8249_v26  ;;  %v9323_v5 = vld [vmem:[%s9831_s11] sm:$0xff] }
0x114e   : > { %v3544_v7 = vadd.f32 %v6747_v2, %v3536_v3  ;;  %v7710_v8 = vpop.f32.mrb[47].mxu0  ;;  %7717 = vmatprep.subr.bf16.mxu0 %v8554_v4  ;;  %v8263_v2 = vld [vmem:[%s9830_s21 + $0x30] sm:$0xff]   ;;  %v8264_v3 = vld [vmem:[%s9830_s21 + $0x38] sm:$0xff]   ;;  %vm1473_vm5 = vcmp.gt.f32.partialorder %v9323_v5, 0.5 }
0x1150   : > { %v9242_v10 = vadd.f32 %v8423_v9, %v3544_v7 }
0x1151   : > { %7718 = vmatpush3.bf16.msra.mxu0 %v8251_v28 }
0x1152   : > { %3548 = vadd.xlane.f32.xlu0 %v9242_v10  ;;  %7719 = vmatprep.subr.bf16.mxu0 %v8554_v4 }
0x1155   : > { %7720 = vmatpush3.bf16.msra.mxu0 %v8253_v30 }
0x1156   : > { %7721 = vmatprep.subr.bf16.mxu0 %v8554_v4 }
0x1159   : > { %7722 = vmatpush3.bf16.msra.mxu0 %v8254_v34  ;;  %v8268_v34 = vld [vmem:[%s9822_s2 + $0x58] sm:$0xff]  }
0x115a   : > { %7723 = vmatprep.subr.bf16.mxu0 %v8554_v4 }
0x115d   : > { %7724 = vmatpush3.bf16.msra.mxu0 %v8255_v35  ;;  %v8270_v35 = vld [vmem:[%s9822_s2 + $0x60] sm:$0xff]  }
0x115e   : > { %7725 = vmatprep.subr.bf16.mxu0 %v8554_v4 }
0x1161   : > { %7726 = vmatpush3.bf16.msra.mxu0 %v8256_v36  ;;  %v8272_v36 = vld [vmem:[%s9822_s2 + $0x68] sm:$0xff]  }
0x1162   : > { %7751 = vmatprep.subr.bf16.mxu0 %v8554_v4 }
0x11df   : > { %v3549_v22 = vpop.xlane.xlu0 %3548 }
0x11e0   : > { %v3550_v23 = vmul.f32 0.0078125, %v3549_v22 }
0x11e2   : > { %v3551_v24 = vsub.f32 %v9242_v10, %v3550_v23 }
0x11e4   : > { %v3552_v25 = vmul.f32 %v3551_v24, %v3551_v24 }
0x11e6   : > { %3553 = vadd.xlane.f32.xlu1 %v3552_v25  ;;  %v8265_v25 = vld [vmem:[%s9822_s2 + $0x40] sm:$0xff]  }
0x1273   : > { %v3554_v33 = vpop.xlane.xlu1 %3553 }
0x1274   : > { %v3555_v37 = vmul.f32 0.0078125, %v3554_v33  ;;  %v8274_v33 = vld [vmem:[%s9822_s2 + $0x70] sm:$0xff]  }
0x1276   : > { %v3556_v38 = vadd.f32 1e-05, %v3555_v37  ;;  %v8276_v37 = vld [vmem:[%s9822_s2 + $0x78] sm:$0xff]  }
0x1278   : > { %8403 = vrsqrt.f32 %v3556_v38 }
0x1282   : > { %v8404_v39 = vpop.eup %8403 }
0x1283   : > { %v3558_v40 = vmul.f32 %v8404_v39, %v3551_v24  ;;  %v6768_v24 = vld [vmem:[%s9832_s28] ss:$0 sm:$0xff] }
0x1285   : > { %v3565_v42 = vmul.f32 %v6748_v18, %v3558_v40  ;;  %v8269_v40 = vld [vmem:[%s9823_s18 + $0x40] sm:$0xff]  }
0x1287   : > { %v3572_v43 = vadd.f32 %v6749_v41, %v3565_v42  ;;  %v8271_v42 = vld [vmem:[%s9823_s18 + $0x48] sm:$0xff]  }
0x1289   : > { %v9291_v44 = vpack.c.bf16 %v3572_v43, %v3572_v43  ;;  %v8273_v43 = vld [vmem:[%s9823_s18 + $0x50] sm:$0xff]  }
0x128b   : > { %7728 = vmatmul.mubr.bf16.vlgmr.msra.gmra.mrb[48].mxu0 %v9291_v44 }
0x128c   : > { %7767 = vmatprep.mubr.msk.bf16.mxu0 %vm8555_vm0, %v8554_v4  ;;  %7752 = vmatpush3.bf16.msra.mxu0 %v8257_v60 }
0x128d   : > { %7753 = vmatprep.subr.bf16.mxu0 %v8554_v4 }
0x1290   : > { %7754 = vmatpush3.bf16.msra.mxu0 %v8258_v61 }
0x1291   : > { %7755 = vmatprep.subr.bf16.mxu0 %v8554_v4 }
0x1294   : > { %7756 = vmatpush3.bf16.msra.mxu0 %v8259_v62 }
0x1295   : > { %7757 = vmatprep.subr.bf16.mxu0 %v8554_v4 }
0x1298   : > { %7758 = vmatpush3.bf16.msra.mxu0 %v8260_v63 }
0x1299   : > { %7759 = vmatprep.subr.bf16.mxu0 %v8554_v4 }
0x129c   : > { %7760 = vmatpush3.bf16.msra.mxu0 %v8261_v0 }
0x129d   : > { %7761 = vmatprep.subr.bf16.mxu0 %v8554_v4 }
0x12a0   : > { %7762 = vmatpush3.bf16.msra.mxu0 %v8262_v1 }
0x12a1   : > { %7763 = vmatprep.subr.bf16.mxu0 %v8554_v4 }
0x12a4   : > { %7764 = vmatpush3.bf16.msra.mxu0 %v8263_v2 }
0x12a5   : > { %7765 = vmatprep.subr.bf16.mxu0 %v8554_v4 }
0x12a8   : > { %7766 = vmatpush3.bf16.msra.mxu0 %v8264_v3 }
0x12a9   : > { %7803 = vmatprep.subr.bf16.mxu0 %v8554_v4 }
0x12ab   : > { %7768 = vmatmul.mubr.bf16.vlgmr.msra.gmra.mrb[52].mxu0 %v9272_v32 }
0x12ac   : > { %7819 = vmatprep.mubr.msk.bf16.mxu0 %vm8555_vm0, %v8554_v4  ;;  %7804 = vmatpush3.bf16.msra.mxu0 %v8265_v25 }
0x12ad   : > { %7805 = vmatprep.subr.bf16.mxu0 %v8554_v4 }
0x12b0   : > { %7806 = vmatpush3.bf16.msra.mxu0 %v8266_v29 }
0x12b1   : > { %7807 = vmatprep.subr.bf16.mxu0 %v8554_v4 }
0x12b4   : > { %7808 = vmatpush3.bf16.msra.mxu0 %v8267_v19 }
0x12b5   : > { %7809 = vmatprep.subr.bf16.mxu0 %v8554_v4 }
0x12b8   : > { %7810 = vmatpush3.bf16.msra.mxu0 %v8268_v34 }
0x12b9   : > { %7811 = vmatprep.subr.bf16.mxu0 %v8554_v4 }
0x12bc   : > { %7812 = vmatpush3.bf16.msra.mxu0 %v8270_v35 }
0x12bd   : > { %7813 = vmatprep.subr.bf16.mxu0 %v8554_v4 }
0x12c0   : > { %7814 = vmatpush3.bf16.msra.mxu0 %v8272_v36 }
0x12c1   : > { %7815 = vmatprep.subr.bf16.mxu0 %v8554_v4 }
0x12c4   : > { %7816 = vmatpush3.bf16.msra.mxu0 %v8274_v33 }
0x12c5   : > { %7817 = vmatprep.subr.bf16.mxu0 %v8554_v4 }
0x12c8   : > { %7818 = vmatpush3.bf16.msra.mxu0 %v8276_v37 }
0x12c9   : > { %7843 = vmatprep.subr.bf16.mxu0 %v8554_v4 }
0x12cb   : > { %7820 = vmatmul.mubr.bf16.vlgmr.msra.gmra.mrb[56].mxu0 %v9272_v32 }
0x12cc   : > { %7845 = vmatprep.mubr.msk.bf16.mxu0 %vm8555_vm0, %v8554_v4 }
0x135e   : > { %v3679_v55 = vpop.f32.mrb[48].mxu0 }
0x135f   : > { %v3680_v56 = vadd.f32 %v6750_v54, %v3679_v55  ;;  %v7729_v57 = vpop.f32.mrb[49].mxu0  ;;  %v8285_v54 = vld [vmem:[%s9830_s21 + $0x60] sm:$0xff]   ;;  %v8286_v55 = vld [vmem:[%s9830_s21 + $0x68] sm:$0xff]  }
0x1360   : > { %v3682_v58 = vpop.f32.mrb[50].mxu0  ;;  %v8288_v57 = vld [vmem:[%s9830_s21 + $0x78] sm:$0xff]  }
0x1361   : > { %v3909_v59 = vpack.c.bf16 %v3680_v56, %v3680_v56  ;;  %v7730_v17 = vpop.f32.mrb[51].mxu0  ;;  %v8287_v56 = vld [vmem:[%s9830_s21 + $0x70] sm:$0xff]   ;;  %v8289_v58 = vld [vmem:[%s8859_s30] sm:$0xff]  }
0x1362   : > { %v6822_v17 = vld [vmem:[%s9828_s5 + $0x1] ss:$0 sm:$0xff] }
0x1363   : > { %7774 = vmatmul.mubr.msk.bf16.vlgmr.msra.gmra.mrb[52].mxu1 %vm1838_vm1, %v3909_v59  ;;  %v8290_v59 = vld [vmem:[%s8859_s30 + $0x8] sm:$0xff]  }
0x1364   : > { %7779 = vmatprep.mubr.msk.bf16.mxu1 %vm8555_vm0, %v8554_v4 }
0x137e   : > { %v3902_v14 = vpop.f32.mrb[52].mxu0 }
0x137f   : > { %v7769_v15 = vpop.f32.mrb[53].mxu0  ;;  %v3903_v26 = vadd.f32 %v6768_v24, %v3902_v14 }
0x1380   : > { %v3905_v27 = vpop.f32.mrb[54].mxu0 }
0x1381   : > { %v7770_v28 = vpop.f32.mrb[55].mxu0  ;;  %v3906_v30 = vadd.f32 %v6768_v24, %v3905_v27 }
0x1383   : > { %v3972_v31 = vpack.c.bf16 %v3906_v30, %v3903_v26 }
0x1385   : > { %7778 = vmatpush3.bf16.msra.mxu1 %v3972_v31 }
0x1386   : > { %7783 = vmatprep.subr.bf16.mxu1 %v8554_v4 }
0x139e   : > { %v4241_v60 = vpop.f32.mrb[56].mxu0 }
0x139f   : > { %v4242_v61 = vadd.f32 %v6822_v17, %v4241_v60  ;;  %v7821_v62 = vpop.f32.mrb[57].mxu0  ;;  %v8297_v60 = vld [vmem:[%s9823_s18 + $0x80] sm:$0xff]  }
0x13a0   : > { %v4244_v63 = vpop.f32.mrb[58].mxu0 }
0x13a1   : > { %v4245_v0 = vadd.f32 %v6822_v17, %v4244_v63  ;;  %v7822_v1 = vpop.f32.mrb[59].mxu0 }
0x13a2   : > { %v8299_v1 = vld [vmem:[%s9823_s18 + $0x88] sm:$0xff]  }
0x13a3   : > { %v4363_v2 = vpack.c.bf16 %v4245_v0, %v4242_v61 }
0x13a5   : > { %v4368_v3 = vsel %vm1838_vm1, %v4363_v2, 0  ;;  %v8301_v2 = vld [vmem:[%s9823_s18 + $0x90] sm:$0xff]  }
0x13a6   : > { %7844 = vmatpush3.bf16.xpose.msra.mxu0 %v4368_v3  ;;  %v8303_v3 = vld [vmem:[%s9823_s18 + $0x98] sm:$0xff]  }
0x13a7   : > { %7849 = vmatprep.subr.bf16.mxu0 %v8554_v4 }
0x1436   : > { %v3951_v6 = vpop.f32.mrb[52].mxu1 }
0x1437   : > { %v3957_v7 = vmul.f32 0.17677669, %v3951_v6  ;;  %v7775_v8 = vpop.f32.mrb[53].mxu1 }
0x1438   : > { %v3954_v9 = vpop.f32.mrb[54].mxu1 }
0x1439   : > { %v7776_v11 = vpop.f32.mrb[55].mxu1  ;;  %v3958_v12 = vsel %vm1473_vm5, %v3957_v7, 1e-09 }
0x143a   : > { %v3960_v13 = vsel %vm3959_vm6, %v3958_v12, -inf }
0x143b   : > { %3961 = vmax.xlane.f32.xlu0 %v3960_v13 }
0x14c8   : > { %v3962_v16 = vpop.xlane.xlu0 %3961 }
0x14c9   : > { %v3963_v20 = vsub.f32 %v3958_v12, %v3962_v16  ;;  %v6796_v12 = vld [vmem:[%s9829_s24 + $0x1] ss:$0 sm:$0xff] }
0x14cb   : > { %v3964_v21 = vmul.f32 1.442695, %v3963_v20 }
0x14cd   : > { %8405 = vpow2.f32 %v3964_v21 }
0x14d7   : > { %v8406_v22 = vpop.eup %8405 }
0x14d8   : > { %v3966_v23 = vsel %vm3959_vm6, %v8406_v22, 0.0 }
0x14d9   : > { %3967 = vadd.xlane.f32.xlu1 %v3966_v23 }
0x1566   : > { %v3968_v38 = vpop.xlane.xlu1 %3967 }
0x1567   : > { %8407 = vrcp.f32 %v3968_v38 }
0x1571   : > { %v8408_v39 = vpop.eup %8407 }
0x1572   : > { %v3970_v18 = vmul.f32 %v8408_v39, %v8406_v22  ;;  %v6848_v22 = vld [vmem:[%s9832_s28 + $0x1] ss:$0 sm:$0xff] }
0x1574   : > { %v3971_v41 = vpack.c.bf16 %v3970_v18, %v3970_v18 }
0x1576   : > { %7780 = vmatmul.mubr.msk.bf16.vlgmr.msra.gmra.mrb[56].mxu1 %vm3959_vm6, %v3971_v41 }
0x1577   : > { %7784 = vmatpush3.bf16.msra.mxu1 %v8269_v40  ;;  %7799 = vmatprep.mubr.msk.bf16.mxu1 %vm8555_vm0, %v8554_v4 }
0x1578   : > { %7785 = vmatprep.subr.bf16.mxu1 %v8554_v4 }
0x157b   : > { %7786 = vmatpush3.bf16.msra.mxu1 %v8271_v42 }
0x157c   : > { %7787 = vmatprep.subr.bf16.mxu1 %v8554_v4 }
0x157f   : > { %7788 = vmatpush3.bf16.msra.mxu1 %v8273_v43 }
0x1580   : > { %7789 = vmatprep.subr.bf16.mxu1 %v8554_v4 }
0x1583   : > { %7790 = vmatpush3.bf16.msra.mxu1 %v8275_v45 }
0x1584   : > { %7791 = vmatprep.subr.bf16.mxu1 %v8554_v4 }
0x1587   : > { %7792 = vmatpush3.bf16.msra.mxu1 %v8277_v46  ;;  %v8291_v46 = vld [vmem:[%s9822_s2 + $0x80] sm:$0xff]  }
0x1588   : > { %7793 = vmatprep.subr.bf16.mxu1 %v8554_v4 }
0x158b   : > { %7794 = vmatpush3.bf16.msra.mxu1 %v8278_v47  ;;  %v8292_v47 = vld [vmem:[%s9822_s2 + $0x88] sm:$0xff]  }
0x158c   : > { %7795 = vmatprep.subr.bf16.mxu1 %v8554_v4 }
0x158f   : > { %7796 = vmatpush3.bf16.msra.mxu1 %v8279_v48  ;;  %v8294_v48 = vld [vmem:[%s9822_s2 + $0x90] sm:$0xff]  }
0x1590   : > { %7797 = vmatprep.subr.bf16.mxu1 %v8554_v4 }
0x1593   : > { %7798 = vmatpush3.bf16.msra.mxu1 %v8280_v49 }
0x1594   : > { %7823 = vmatprep.subr.bf16.mxu1 %v8554_v4 }
0x1596   : > { %7800 = vmatmul.mubr.bf16.vlgmr.msra.gmra.mrb[60].mxu1 %v9291_v44 }
0x1597   : > { %7824 = vmatpush3.bf16.msra.mxu1 %v8281_v50  ;;  %7839 = vmatprep.mubr.msk.bf16.mxu1 %vm8555_vm0, %v8554_v4 }
0x1598   : > { %7825 = vmatprep.subr.bf16.mxu1 %v8554_v4 }
0x159b   : > { %7826 = vmatpush3.bf16.msra.mxu1 %v8282_v51 }
0x159c   : > { %7827 = vmatprep.subr.bf16.mxu1 %v8554_v4 }
0x159f   : > { %7828 = vmatpush3.bf16.msra.mxu1 %v8283_v52  ;;  %v8293_v52 = vld [vmem:[%s8859_s30 + $0x10] sm:$0xff]  }
0x15a0   : > { %7829 = vmatprep.subr.bf16.mxu1 %v8554_v4 }
0x15a3   : > { %7830 = vmatpush3.bf16.msra.mxu1 %v8284_v53 }
0x15a4   : > { %7831 = vmatprep.subr.bf16.mxu1 %v8554_v4 }
0x15a7   : > { %7832 = vmatpush3.bf16.msra.mxu1 %v8285_v54  ;;  %v8295_v54 = vld [vmem:[%s8859_s30 + $0x18] sm:$0xff]  }
0x15a8   : > { %7833 = vmatprep.subr.bf16.mxu1 %v8554_v4 }
0x15ab   : > { %7834 = vmatpush3.bf16.msra.mxu1 %v8286_v55  ;;  %v8296_v55 = vld [vmem:[%s9822_s2 + $0x98] sm:$0xff]  }
0x15ac   : > { %7835 = vmatprep.subr.bf16.mxu1 %v8554_v4 }
0x15af   : > { %7836 = vmatpush3.bf16.msra.mxu1 %v8287_v56  ;;  %v8298_v56 = vld [vmem:[%s9822_s2 + $0xa0] sm:$0xff]  }
0x15b0   : > { %7837 = vmatprep.subr.bf16.mxu1 %v8554_v4 }
0x15b3   : > { %7838 = vmatpush3.bf16.msra.mxu1 %v8288_v57  ;;  %v8300_v57 = vld [vmem:[%s9822_s2 + $0xa8] sm:$0xff]  }
0x15b4   : > { %7863 = vmatprep.subr.bf16.mxu1 %v8554_v4 }
0x15b6   : > { %7840 = vmatmul.mubr.bf16.vlgmr.msra.gmra.mrb[64].mxu1 %v9272_v32 }
0x15b7   : > { %7864 = vmatpush3.bf16.msra.mxu1 %v8289_v58  ;;  %7867 = vmatprep.mubr.msk.bf16.mxu1 %vm8555_vm0, %v8554_v4  ;;  %v8302_v58 = vld [vmem:[%s9822_s2 + $0xb0] sm:$0xff]  }
0x15b8   : > { %7865 = vmatprep.subr.bf16.mxu1 %v8554_v4 }
0x15bb   : > { %7866 = vmatpush3.bf16.msra.mxu1 %v8290_v59  ;;  %v8304_v59 = vld [vmem:[%s9822_s2 + $0xb8] sm:$0xff]  }
0x15bc   : > { %7891 = vmatprep.subr.bf16.mxu1 %v8554_v4 }
0x1649   : > { %v4010_v6 = vpop.f32.mrb[56].mxu1 }
0x164a   : > { %v4016_v7 = vpack.c.bf16 %v4010_v6, %v4010_v6  ;;  %v7781_v8 = vpop.f32.mrb[57].mxu1  ;;  %v8305_v6 = vld [vmem:[%s9823_s18 + $0xa0] sm:$0xff]  }
0x164b   : > { %v4013_v9 = vpop.f32.mrb[58].mxu1  ;;  %v8307_v8 = vld [vmem:[%s9823_s18 + $0xb0] sm:$0xff]  }
0x164c   : > { %v7782_v11 = vpop.f32.mrb[59].mxu1  ;;  %7868 = vmatmul.mubr.msk.bf16.vlgmr.msra.gmra.mrb[68].mxu1 %vm1838_vm1, %v4016_v7  ;;  %v8306_v7 = vld [vmem:[%s9823_s18 + $0xa8] sm:$0xff]   ;;  %v8308_v9 = vld [vmem:[%s9823_s18 + $0xb8] sm:$0xff]  }
0x164d   : > { %7907 = vmatprep.mubr.msk.bf16.mxu1 %vm8555_vm0, %v8554_v4  ;;  %7892 = vmatpush3.bf16.msra.mxu1 %v8291_v46  ;;  %v6912_v11 = vld [vmem:[%s9828_s5 + $0x2] ss:$0 sm:$0xff] }
0x164e   : > { %7893 = vmatprep.subr.bf16.mxu1 %v8554_v4 }
0x1651   : > { %7894 = vmatpush3.bf16.msra.mxu1 %v8292_v47 }
0x1652   : > { %7895 = vmatprep.subr.bf16.mxu1 %v8554_v4 }
0x1655   : > { %7896 = vmatpush3.bf16.msra.mxu1 %v8294_v48 }
0x1656   : > { %7897 = vmatprep.subr.bf16.mxu1 %v8554_v4 }
0x1659   : > { %7898 = vmatpush3.bf16.msra.mxu1 %v8296_v55 }
0x165a   : > { %7899 = vmatprep.subr.bf16.mxu1 %v8554_v4 }
0x165d   : > { %7900 = vmatpush3.bf16.msra.mxu1 %v8298_v56 }
0x165e   : > { %7901 = vmatprep.subr.bf16.mxu1 %v8554_v4 }
0x1661   : > { %7902 = vmatpush3.bf16.msra.mxu1 %v8300_v57  ;;  %v6938_v57 = vld [vmem:[%s9832_s28 + $0x2] ss:$0 sm:$0xff] }
0x1662   : > { %7903 = vmatprep.subr.bf16.mxu1 %v8554_v4 }
0x1665   : > { %7904 = vmatpush3.bf16.msra.mxu1 %v8302_v58 }
0x1666   : > { %7905 = vmatprep.subr.bf16.mxu1 %v8554_v4 }
0x1669   : > { %v4128_v13 = vpop.f32.mrb[60].mxu1  ;;  %7906 = vmatpush3.bf16.msra.mxu1 %v8304_v59 }
0x166a   : > { %v4129_v14 = vadd.f32 %v6796_v12, %v4128_v13  ;;  %v7801_v15 = vpop.f32.mrb[61].mxu1  ;;  %7931 = vmatprep.subr.bf16.mxu1 %v8554_v4 }
0x166b   : > { %v4131_v16 = vpop.f32.mrb[62].mxu1 }
0x166c   : > { %v4362_v20 = vpack.c.bf16 %v4129_v14, %v4129_v14  ;;  %v7802_v21 = vpop.f32.mrb[63].mxu1  ;;  %7908 = vmatmul.mubr.bf16.vlgmr.msra.gmra.mrb[72].mxu1 %v9272_v32 }
0x166d   : > { %7933 = vmatprep.mubr.msk.bf16.mxu1 %vm8555_vm0, %v8554_v4 }
0x166e   : > { %7846 = vmatmul.mubr.msk.bf16.vlgmr.msra.gmra.mrb[60].mxu0 %vm1838_vm1, %v4362_v20 }
0x166f   : > { %7851 = vmatprep.mubr.msk.bf16.mxu0 %vm8555_vm0, %v8554_v4 }
0x1689   : > { %v4355_v23 = vpop.f32.mrb[64].mxu1 }
0x168a   : > { %v4356_v24 = vadd.f32 %v6848_v22, %v4355_v23  ;;  %v7841_v25 = vpop.f32.mrb[65].mxu1 }
0x168b   : > { %v4358_v26 = vpop.f32.mrb[66].mxu1 }
0x168c   : > { %v4359_v27 = vadd.f32 %v6848_v22, %v4358_v26  ;;  %v7842_v28 = vpop.f32.mrb[67].mxu1 }
0x168d   : > { %v6886_v28 = vld [vmem:[%s9829_s24 + $0x2] ss:$0 sm:$0xff] }
0x168e   : > { %v4424_v29 = vpack.c.bf16 %v4359_v27, %v4356_v24 }
0x1690   : > { %7850 = vmatpush3.bf16.msra.mxu0 %v4424_v29 }
0x1691   : > { %7855 = vmatprep.subr.bf16.mxu0 %v8554_v4 }
0x171f   : > { %v9408_v30 = vpop.f32.mrb[68].mxu1 }
0x1720   : > { %v7869_v31 = vpop.f32.mrb[69].mxu1 }
0x1721   : > { %v4581_v19 = vpop.f32.mrb[70].mxu1 }
0x1722   : > { %v7870_v34 = vpop.f32.mrb[71].mxu1 }
0x173f   : > { %v4804_v12 = vpop.f32.mrb[72].mxu1 }
0x1740   : > { %v4805_v13 = vadd.f32 %v6912_v11, %v4804_v12  ;;  %v7909_v14 = vpop.f32.mrb[73].mxu1  ;;  %v8326_v12 = vld [vmem:[%s9822_s2 + $0xe8] sm:$0xff]  }
0x1741   : > { %v4404_v35 = vpop.f32.mrb[60].mxu0  ;;  %v4807_v15 = vpop.f32.mrb[74].mxu1  ;;  %v8330_v14 = vld [vmem:[%s9822_s2 + $0xf8] sm:$0xff]  }
0x1742   : > { %v4410_v36 = vmul.f32 0.17677669, %v4404_v35  ;;  %v7847_v33 = vpop.f32.mrb[61].mxu0  ;;  %v4808_v16 = vadd.f32 %v6912_v11, %v4807_v15  ;;  %v7910_v20 = vpop.f32.mrb[75].mxu1  ;;  %v8324_v11 = vld [vmem:[%s9822_s2 + $0xe0] sm:$0xff]  }
0x1743   : > { %v4407_v37 = vpop.f32.mrb[62].mxu0  ;;  %v8310_v33 = vld [vmem:[%s9830_s21 + $0x88] sm:$0xff]  }
0x1744   : > { %v7848_v38 = vpop.f32.mrb[63].mxu0  ;;  %v4411_v39 = vsel %vm1473_vm5, %v4410_v36, 1e-09  ;;  %v4926_v21 = vpack.c.bf16 %v4808_v16, %v4805_v13  ;;  %v8311_v37 = vld [vmem:[%s9830_s21 + $0x90] sm:$0xff]   ;;  %v8323_v16 = vld [vmem:[%s9823_s18 + $0xc0] sm:$0xff]  }
0x1745   : > { %v4412_v18 = vsel %vm3959_vm6, %v4411_v39, -inf  ;;  %v8312_v38 = vld [vmem:[%s9830_s21 + $0x98] sm:$0xff]   ;;  %v8328_v13 = vld [vmem:[%s9822_s2 + $0xf0] sm:$0xff]  }
0x1746   : > { %4413 = vmax.xlane.f32.xlu0 %v4412_v18  ;;  %v4931_v22 = vsel %vm1838_vm1, %v4926_v21, 0  ;;  %v8314_v18 = vld [vmem:[%s9830_s21 + $0xa8] sm:$0xff]  }
0x1747   : > { %7932 = vmatpush3.bf16.xpose.msra.mxu1 %v4931_v22 }
0x1748   : > { %7937 = vmatprep.subr.bf16.mxu1 %v8554_v4 }
0x17d3   : > { %v4414_v40 = vpop.xlane.xlu0 %4413 }
0x17d4   : > { %v4415_v41 = vsub.f32 %v4411_v39, %v4414_v40  ;;  %v8313_v39 = vld [vmem:[%s9830_s21 + $0xa0] sm:$0xff]   ;;  %v8315_v40 = vld [vmem:[%s9830_s21 + $0xb0] sm:$0xff]  }
0x17d6   : > { %v4416_v42 = vmul.f32 1.442695, %v4415_v41  ;;  %v8316_v41 = vld [vmem:[%s9830_s21 + $0xb8] sm:$0xff]  }
0x17d8   : > { %8409 = vpow2.f32 %v4416_v42 }
0x17e2   : > { %v8410_v43 = vpop.eup %8409 }
0x17e3   : > { %v4418_v45 = vsel %vm3959_vm6, %v8410_v43, 0.0 }
0x17e4   : > { %4419 = vadd.xlane.f32.xlu1 %v4418_v45 }
0x1871   : > { %v4420_v49 = vpop.xlane.xlu1 %4419 }
0x1872   : > { %8411 = vrcp.f32 %v4420_v49 }
0x187c   : > { %v8412_v50 = vpop.eup %8411 }
0x187d   : > { %v4422_v51 = vmul.f32 %v8412_v50, %v8410_v43 }
0x187f   : > { %v4423_v53 = vpack.c.bf16 %v4422_v51, %v4422_v51 }
0x1881   : > { %7852 = vmatmul.mubr.msk.bf16.vlgmr.msra.gmra.mrb[64].mxu0 %vm3959_vm6, %v4423_v53 }
0x1882   : > { %7856 = vmatpush3.bf16.msra.mxu0 %v8293_v52  ;;  %7859 = vmatprep.mubr.msk.bf16.mxu0 %vm8555_vm0, %v8554_v4 }
0x1883   : > { %7857 = vmatprep.subr.bf16.mxu0 %v8554_v4 }
0x1886   : > { %7858 = vmatpush3.bf16.msra.mxu0 %v8295_v54 }
0x1887   : > { %7871 = vmatprep.subr.bf16.mxu0 %v8554_v4 }
0x1954   : > { %v4462_v17 = vpop.f32.mrb[64].mxu0 }
0x1955   : > { %v4468_v61 = vpack.c.bf16 %v4462_v17, %v4462_v17  ;;  %v7853_v62 = vpop.f32.mrb[65].mxu0 }
0x1956   : > { %v4465_v63 = vpop.f32.mrb[66].mxu0  ;;  %v8317_v62 = vld [vmem:[%s9822_s2 + $0xc0] sm:$0xff]  }
0x1957   : > { %v7854_v0 = vpop.f32.mrb[67].mxu0  ;;  %7860 = vmatmul.mubr.msk.bf16.vlgmr.msra.gmra.mrb[68].mxu0 %vm1838_vm1, %v4468_v61  ;;  %v8318_v63 = vld [vmem:[%s9822_s2 + $0xc8] sm:$0xff]  }
0x1958   : > { %7872 = vmatpush3.bf16.msra.mxu0 %v8297_v60  ;;  %7887 = vmatprep.mubr.msk.bf16.mxu0 %vm8555_vm0, %v8554_v4  ;;  %v8320_v0 = vld [vmem:[%s9822_s2 + $0xd0] sm:$0xff]  }
0x1959   : > { %7873 = vmatprep.subr.bf16.mxu0 %v8554_v4 }
0x195c   : > { %7874 = vmatpush3.bf16.msra.mxu0 %v8299_v1 }
0x195d   : > { %7875 = vmatprep.subr.bf16.mxu0 %v8554_v4 }
0x1960   : > { %7876 = vmatpush3.bf16.msra.mxu0 %v8301_v2 }
0x1961   : > { %7877 = vmatprep.subr.bf16.mxu0 %v8554_v4 }
0x1964   : > { %7878 = vmatpush3.bf16.msra.mxu0 %v8303_v3 }
0x1965   : > { %7879 = vmatprep.subr.bf16.mxu0 %v8554_v4 }
0x1968   : > { %7880 = vmatpush3.bf16.msra.mxu0 %v8305_v6  ;;  %v8319_v6 = vld [vmem:[%s8859_s30 + $0x20] sm:$0xff]  }
0x1969   : > { %7881 = vmatprep.subr.bf16.mxu0 %v8554_v4 }
0x196c   : > { %7882 = vmatpush3.bf16.msra.mxu0 %v8306_v7 }
0x196d   : > { %7883 = vmatprep.subr.bf16.mxu0 %v8554_v4 }
0x1970   : > { %7884 = vmatpush3.bf16.msra.mxu0 %v8307_v8  ;;  %v8321_v8 = vld [vmem:[%s8859_s30 + $0x28] sm:$0xff]  }
0x1971   : > { %7885 = vmatprep.subr.bf16.mxu0 %v8554_v4 }
0x1974   : > { %7886 = vmatpush3.bf16.msra.mxu0 %v8308_v9  ;;  %v8322_v9 = vld [vmem:[%s9822_s2 + $0xd8] sm:$0xff]  }
0x1975   : > { %7911 = vmatprep.subr.bf16.mxu0 %v8554_v4 }
0x1977   : > { %7888 = vmatmul.mubr.bf16.vlgmr.msra.gmra.mrb[72].mxu0 %v9291_v44 }
0x1978   : > { %7927 = vmatprep.mubr.msk.bf16.mxu0 %vm8555_vm0, %v8554_v4 }
0x1a2a   : > { %v4523_v23 = vpop.f32.mrb[68].mxu0 }
0x1a2b   : > { %v9466_v24 = vadd.f32 %v9408_v30, %v4523_v23  ;;  %v7861_v25 = vpop.f32.mrb[69].mxu0  ;;  %v8309_v30 = vld [vmem:[%s9830_s21 + $0x80] sm:$0xff]  }
0x1a2c   : > { %v4526_v26 = vpop.f32.mrb[70].mxu0  ;;  %7912 = vmatpush3.bf16.msra.mxu0 %v8309_v30  ;;  %v8325_v25 = vld [vmem:[%s9823_s18 + $0xc8] sm:$0xff]  }
0x1a2d   : > { %v7862_v27 = vpop.f32.mrb[71].mxu0  ;;  %7913 = vmatprep.subr.bf16.mxu0 %v8554_v4  ;;  %v8327_v26 = vld [vmem:[%s9823_s18 + $0xd0] sm:$0xff]  }
0x1a2e   : > { %v8329_v27 = vld [vmem:[%s9823_s18 + $0xd8] sm:$0xff]  }
0x1a30   : > { %7914 = vmatpush3.bf16.msra.mxu0 %v8310_v33 }
0x1a31   : > { %7915 = vmatprep.subr.bf16.mxu0 %v8554_v4 }
0x1a34   : > { %7916 = vmatpush3.bf16.msra.mxu0 %v8311_v37 }
0x1a35   : > { %7917 = vmatprep.subr.bf16.mxu0 %v8554_v4 }
0x1a38   : > { %7918 = vmatpush3.bf16.msra.mxu0 %v8312_v38 }
0x1a39   : > { %7919 = vmatprep.subr.bf16.mxu0 %v8554_v4 }
0x1a3c   : > { %7920 = vmatpush3.bf16.msra.mxu0 %v8313_v39 }
0x1a3d   : > { %7921 = vmatprep.subr.bf16.mxu0 %v8554_v4 }
0x1a40   : > { %7922 = vmatpush3.bf16.msra.mxu0 %v8314_v18 }
0x1a41   : > { %7923 = vmatprep.subr.bf16.mxu0 %v8554_v4 }
0x1a44   : > { %7924 = vmatpush3.bf16.msra.mxu0 %v8315_v40 }
0x1a45   : > { %7925 = vmatprep.subr.bf16.mxu0 %v8554_v4 }
0x1a48   : > { %7926 = vmatpush3.bf16.msra.mxu0 %v8316_v41 }
0x1a49   : > { %7971 = vmatprep.subr.bf16.mxu0 %v8554_v4 }
0x1a4a   : > { %v4691_v29 = vpop.f32.mrb[72].mxu0 }
0x1a4b   : > { %v4692_v31 = vadd.f32 %v6886_v28, %v4691_v29  ;;  %v7889_v19 = vpop.f32.mrb[73].mxu0  ;;  %7928 = vmatmul.mubr.bf16.vlgmr.msra.gmra.mrb[76].mxu0 %v9272_v32  ;;  %v8331_v28 = vld [vmem:[%s9823_s18 + $0xe0] sm:$0xff]   ;;  %v8332_v29 = vld [vmem:[%s9823_s18 + $0xe8] sm:$0xff]  }
0x1a4c   : > { %v4694_v34 = vpop.f32.mrb[74].mxu0  ;;  %7987 = vmatprep.mubr.msk.bf16.mxu0 %vm8555_vm0, %v8554_v4  ;;  %7972 = vmatpush3.bf16.msra.mxu0 %v8317_v62  ;;  %v8334_v19 = vld [vmem:[%s9823_s18 + $0xf8] sm:$0xff]  }
0x1a4d   : > { %v4925_v35 = vpack.c.bf16 %v4692_v31, %v4692_v31  ;;  %v7890_v36 = vpop.f32.mrb[75].mxu0  ;;  %7973 = vmatprep.subr.bf16.mxu0 %v8554_v4  ;;  %v8333_v31 = vld [vmem:[%s9823_s18 + $0xf0] sm:$0xff]   ;;  %v6999_v34 = vld [vmem:[%s9828_s5 + $0x3] ss:$0 sm:$0xff] }
0x1a4f   : > { %7934 = vmatmul.mubr.msk.bf16.vlgmr.msra.gmra.mrb[76].mxu1 %vm1838_vm1, %v4925_v35 }
0x1a50   : > { %7939 = vmatprep.mubr.msk.bf16.mxu1 %vm8555_vm0, %v8554_v4  ;;  %7974 = vmatpush3.bf16.msra.mxu0 %v8318_v63 }
0x1a51   : > { %7975 = vmatprep.subr.bf16.mxu0 %v8554_v4 }
0x1a54   : > { %7976 = vmatpush3.bf16.msra.mxu0 %v8320_v0 }
0x1a55   : > { %7977 = vmatprep.subr.bf16.mxu0 %v8554_v4 }
0x1a58   : > { %7978 = vmatpush3.bf16.msra.mxu0 %v8322_v9  ;;  %v7025_v9 = vld [vmem:[%s9832_s28 + $0x3] ss:$0 sm:$0xff] }
0x1a59   : > { %7979 = vmatprep.subr.bf16.mxu0 %v8554_v4 }
0x1a5c   : > { %7980 = vmatpush3.bf16.msra.mxu0 %v8324_v11 }
0x1a5d   : > { %7981 = vmatprep.subr.bf16.mxu0 %v8554_v4 }
0x1a60   : > { %7982 = vmatpush3.bf16.msra.mxu0 %v8326_v12 }
0x1a61   : > { %7983 = vmatprep.subr.bf16.mxu0 %v8554_v4 }
0x1a64   : > { %7984 = vmatpush3.bf16.msra.mxu0 %v8328_v13 }
0x1a65   : > { %7985 = vmatprep.subr.bf16.mxu0 %v8554_v4 }
0x1a68   : > { %7986 = vmatpush3.bf16.msra.mxu0 %v8330_v14 }
0x1a69   : > { %8011 = vmatprep.subr.bf16.mxu0 %v8554_v4 }
0x1a6b   : > { %7988 = vmatmul.mubr.bf16.vlgmr.msra.gmra.mrb[80].mxu0 %v9272_v32 }
0x1a6c   : > { %8013 = vmatprep.mubr.msk.bf16.mxu0 %vm8555_vm0, %v8554_v4 }
0x1b1e   : > { %v4918_v50 = vpop.f32.mrb[76].mxu0 }
0x1b1f   : > { %v7929_v51 = vpop.f32.mrb[77].mxu0  ;;  %v4919_v58 = vadd.f32 %v6938_v57, %v4918_v50 }
0x1b20   : > { %v4921_v59 = vpop.f32.mrb[78].mxu0 }
0x1b21   : > { %v7930_v17 = vpop.f32.mrb[79].mxu0  ;;  %v4922_v60 = vadd.f32 %v6938_v57, %v4921_v59  ;;  %v8341_v57 = vld [vmem:[%s9830_s21 + $0xf0] sm:$0xff]  }
0x1b22   : > { %v4967_v42 = vpop.f32.mrb[76].mxu1 }
0x1b23   : > { %v4973_v43 = vmul.f32 0.17677669, %v4967_v42  ;;  %v7935_v45 = vpop.f32.mrb[77].mxu1  ;;  %v4987_v61 = vpack.c.bf16 %v4922_v60, %v4919_v58  ;;  %v8342_v58 = vld [vmem:[%s9830_s21 + $0xf8] sm:$0xff]  }
0x1b24   : > { %v4970_v46 = vpop.f32.mrb[78].mxu1  ;;  %v6973_v45 = vld [vmem:[%s9829_s24 + $0x3] ss:$0 sm:$0xff] }
0x1b25   : > { %v7936_v47 = vpop.f32.mrb[79].mxu1  ;;  %v4974_v48 = vsel %vm1473_vm5, %v4973_v43, 1e-09  ;;  %7938 = vmatpush3.bf16.msra.mxu1 %v4987_v61 }
0x1b26   : > { %v4975_v49 = vsel %vm3959_vm6, %v4974_v48, -inf  ;;  %7943 = vmatprep.subr.bf16.mxu1 %v8554_v4 }
0x1b27   : > { %4976 = vmax.xlane.f32.xlu0 %v4975_v49 }
0x1b3e   : > { %v5313_v35 = vpop.f32.mrb[80].mxu0 }
0x1b3f   : > { %v5314_v36 = vadd.f32 %v6999_v34, %v5313_v35  ;;  %v7989_v30 = vpop.f32.mrb[81].mxu0 }
0x1b40   : > { %v5316_v33 = vpop.f32.mrb[82].mxu0 }
0x1b41   : > { %v5317_v37 = vadd.f32 %v6999_v34, %v5316_v33  ;;  %v7990_v38 = vpop.f32.mrb[83].mxu0 }
0x1b42   : > { %v8347_v38 = vld [vmem:[%s8865_s8 + $0x4] ss:$8 sps:$4 sm:$0xff]  }
0x1b43   : > { %v5435_v39 = vpack.c.bf16 %v5317_v37, %v5314_v36  ;;  %v8345_v37 = vld [vmem:[%s8865_s8] ss:$8 sps:$4 sm:$0xff]  }
0x1b45   : > { %v5440_v18 = vsel %vm1838_vm1, %v5435_v39, 0  ;;  %v8350_v39 = vld [vmem:[%s8865_s8 + $0x14] ss:$8 sps:$4 sm:$0xff]  }
0x1b46   : > { %8012 = vmatpush3.bf16.xpose.msra.mxu0 %v5440_v18  ;;  %v8348_v18 = vld [vmem:[%s8865_s8 + $0x10] ss:$8 sps:$4 sm:$0xff]  }
0x1b47   : > { %8017 = vmatprep.subr.bf16.mxu0 %v8554_v4 }
0x1bb4   : > { %v4977_v52 = vpop.xlane.xlu0 %4976 }
0x1bb5   : > { %v4978_v53 = vsub.f32 %v4974_v48, %v4977_v52  ;;  %v8336_v52 = vld [vmem:[%s9830_s21 + $0xc8] sm:$0xff]  }
0x1bb7   : > { %v4979_v54 = vmul.f32 1.442695, %v4978_v53  ;;  %v8337_v53 = vld [vmem:[%s9830_s21 + $0xd0] sm:$0xff]  }
0x1bb9   : > { %8413 = vpow2.f32 %v4979_v54  ;;  %v8338_v54 = vld [vmem:[%s9830_s21 + $0xd8] sm:$0xff]  }
0x1bc3   : > { %v8414_v55 = vpop.eup %8413 }
0x1bc4   : > { %v4981_v56 = vsel %vm3959_vm6, %v8414_v55, 0.0 }
0x1bc5   : > { %4982 = vadd.xlane.f32.xlu1 %v4981_v56  ;;  %v8340_v56 = vld [vmem:[%s9830_s21 + $0xe8] sm:$0xff]  }
0x1c52   : > { %v4983_v1 = vpop.xlane.xlu1 %4982 }
0x1c53   : > { %8415 = vrcp.f32 %v4983_v1 }
0x1c5d   : > { %v8416_v2 = vpop.eup %8415 }
0x1c5e   : > { %v4985_v3 = vmul.f32 %v8416_v2, %v8414_v55  ;;  %v8339_v55 = vld [vmem:[%s9830_s21 + $0xe0] sm:$0xff]  }
0x1c60   : > { %v4986_v7 = vpack.c.bf16 %v4985_v3, %v4985_v3 }
0x1c62   : > { %7940 = vmatmul.mubr.msk.bf16.vlgmr.msra.gmra.mrb[80].mxu1 %vm3959_vm6, %v4986_v7 }
0x1c63   : > { %7944 = vmatpush3.bf16.msra.mxu1 %v8319_v6  ;;  %7947 = vmatprep.mubr.msk.bf16.mxu1 %vm8555_vm0, %v8554_v4 }
0x1c64   : > { %7945 = vmatprep.subr.bf16.mxu1 %v8554_v4 }
0x1c67   : > { %7946 = vmatpush3.bf16.msra.mxu1 %v8321_v8 }
0x1c68   : > { %7951 = vmatprep.subr.bf16.mxu1 %v8554_v4 }
0x1d35   : > { %v5025_v15 = vpop.f32.mrb[80].mxu1 }
0x1d36   : > { %v5031_v20 = vpack.c.bf16 %v5025_v15, %v5025_v15  ;;  %v7941_v21 = vpop.f32.mrb[81].mxu1 }
0x1d37   : > { %v5028_v22 = vpop.f32.mrb[82].mxu1  ;;  %v8343_v21 = vld [vmem:[%s8859_s30 + $0x30] sm:$0xff]  }
0x1d38   : > { %v7942_v23 = vpop.f32.mrb[83].mxu1  ;;  %7948 = vmatmul.mubr.msk.bf16.vlgmr.msra.gmra.mrb[84].mxu1 %vm1838_vm1, %v5031_v20 }
0x1d39   : > { %7952 = vmatpush3.bf16.msra.mxu1 %v8323_v16  ;;  %7967 = vmatprep.mubr.msk.bf16.mxu1 %vm8555_vm0, %v8554_v4  ;;  %v8344_v23 = vld [vmem:[%s8859_s30 + $0x38] sm:$0xff]  }
0x1d3a   : > { %7953 = vmatprep.subr.bf16.mxu1 %v8554_v4 }
0x1d3d   : > { %7954 = vmatpush3.bf16.msra.mxu1 %v8325_v25 }
0x1d3e   : > { %7955 = vmatprep.subr.bf16.mxu1 %v8554_v4 }
0x1d41   : > { %7956 = vmatpush3.bf16.msra.mxu1 %v8327_v26 }
0x1d42   : > { %7957 = vmatprep.subr.bf16.mxu1 %v8554_v4 }
0x1d45   : > { %7958 = vmatpush3.bf16.msra.mxu1 %v8329_v27 }
0x1d46   : > { %7959 = vmatprep.subr.bf16.mxu1 %v8554_v4 }
0x1d49   : > { %7960 = vmatpush3.bf16.msra.mxu1 %v8331_v28 }
0x1d4a   : > { %7961 = vmatprep.subr.bf16.mxu1 %v8554_v4 }
0x1d4d   : > { %7962 = vmatpush3.bf16.msra.mxu1 %v8332_v29 }
0x1d4e   : > { %7963 = vmatprep.subr.bf16.mxu1 %v8554_v4 }
0x1d51   : > { %7964 = vmatpush3.bf16.msra.mxu1 %v8333_v31 }
0x1d52   : > { %7965 = vmatprep.subr.bf16.mxu1 %v8554_v4 }
0x1d55   : > { %7966 = vmatpush3.bf16.msra.mxu1 %v8334_v19  ;;  %v7043_v19 = vld [vmem:[%s1423_s7] ss:$0 sm:$0xff] }
0x1d56   : > { %7991 = vmatprep.subr.bf16.mxu1 %v8554_v4 }
0x1d58   : > { %7968 = vmatmul.mubr.bf16.vlgmr.msra.gmra.mrb[88].mxu1 %v9291_v44 }
0x1d59   : > { %8007 = vmatprep.mubr.msk.bf16.mxu1 %vm8555_vm0, %v8554_v4 }
0x1e0b   : > { %v5086_v40 = vpop.f32.mrb[84].mxu1 }
0x1e0c   : > { %v9549_v44 = vadd.f32 %v5086_v40, %v9466_v24  ;;  %v7949_v41 = vpop.f32.mrb[85].mxu1  ;;  %v8335_v24 = vld [vmem:[%s9830_s21 + $0xc0] sm:$0xff]  }
0x1e0d   : > { %v5089_v42 = vpop.f32.mrb[86].mxu1  ;;  %7992 = vmatpush3.bf16.msra.mxu1 %v8335_v24  ;;  %v8353_v40 = vld [vmem:[%s8865_s8 + $0x24] ss:$8 sps:$4 sm:$0xff]   ;;  %v8363_v24 = vld [vmem:[%s8865_s8 + $0x60] ss:$8 sps:$4 sm:$0xff]  }
0x1e0e   : > { %v7950_v43 = vpop.f32.mrb[87].mxu1  ;;  %7993 = vmatprep.subr.bf16.mxu1 %v8554_v4 }
0x1e11   : > { %7994 = vmatpush3.bf16.msra.mxu1 %v8336_v52  ;;  %v8368_v52 = vld [vmem:[%s8865_s8 + $0x74] ss:$8 sps:$4 sm:$0xff]  }
0x1e12   : > { %7995 = vmatprep.subr.bf16.mxu1 %v8554_v4 }
0x1e15   : > { %7996 = vmatpush3.bf16.msra.mxu1 %v8337_v53  ;;  %v8366_v53 = vld [vmem:[%s8865_s8 + $0x70] ss:$8 sps:$4 sm:$0xff]  }
0x1e16   : > { %7997 = vmatprep.subr.bf16.mxu1 %v8554_v4 }
0x1e19   : > { %7998 = vmatpush3.bf16.msra.mxu1 %v8338_v54  ;;  %v8556_v54 = vmov 0  }
0x1e1a   : > { %7999 = vmatprep.subr.bf16.mxu1 %v8554_v4 }
0x1e1d   : > { %8000 = vmatpush3.bf16.msra.mxu1 %v8339_v55  ;;  %v8369_v55 = vld [vmem:[%s8872_s9 + $0x40] sm:$0xff]  }
0x1e1e   : > { %8001 = vmatprep.subr.bf16.mxu1 %v8554_v4 }
0x1e21   : > { %8002 = vmatpush3.bf16.msra.mxu1 %v8340_v56  ;;  %v8370_v56 = vld [vmem:[%s8872_s9] sm:$0xff]  }
0x1e22   : > { %8003 = vmatprep.subr.bf16.mxu1 %v8554_v4 }
0x1e25   : > { %8004 = vmatpush3.bf16.msra.mxu1 %v8341_v57  ;;  %v8371_v57 = vld [vmem:[%s8872_s9 + $0x48] sm:$0xff]  }
0x1e26   : > { %8005 = vmatprep.subr.bf16.mxu1 %v8554_v4 }
0x1e29   : > { %8006 = vmatpush3.bf16.msra.mxu1 %v8342_v58  ;;  %v8372_v58 = vld [vmem:[%s8872_s9 + $0x8] sm:$0xff]  }
0x1e2a   : > { %7369 = vmatprep.subr.bf16.mxu1 %v8369_v55 }
0x1e2b   : > { %v5200_v46 = vpop.f32.mrb[88].mxu1 }
0x1e2c   : > { %v5201_v47 = vadd.f32 %v6973_v45, %v5200_v46  ;;  %v7969_v48 = vpop.f32.mrb[89].mxu1  ;;  %8008 = vmatmul.mubr.bf16.vlgmr.msra.gmra.mrb[92].mxu1 %v9272_v32  ;;  %v8356_v45 = vld [vmem:[%s8865_s8 + $0x34] ss:$8 sps:$4 sm:$0xff]   ;;  %v8354_v46 = vld [vmem:[%s8865_s8 + $0x30] ss:$8 sps:$4 sm:$0xff]  }
0x1e2d   : > { %v5203_v49 = vpop.f32.mrb[90].mxu1  ;;  %v8357_v48 = vld [vmem:[%s8865_s8 + $0x40] ss:$8 sps:$4 sm:$0xff]   ;;  %7370 = vmatpush3.bf16.msra.mxu1 %v8370_v56 }
0x1e2e   : > { %v5434_v50 = vpack.c.bf16 %v5201_v47, %v5201_v47  ;;  %v7970_v51 = vpop.f32.mrb[91].mxu1  ;;  %v8359_v47 = vld [vmem:[%s8865_s8 + $0x44] ss:$8 sps:$4 sm:$0xff]   ;;  %v8362_v49 = vld [vmem:[%s8865_s8 + $0x54] ss:$8 sps:$4 sm:$0xff]   ;;  %7371 = vmatprep.subr.bf16.mxu1 %v8371_v57 }
0x1e2f   : > { %v8365_v51 = vld [vmem:[%s8865_s8 + $0x64] ss:$8 sps:$4 sm:$0xff]  }
0x1e30   : > { %8014 = vmatmul.mubr.msk.bf16.vlgmr.msra.gmra.mrb[84].mxu0 %vm1838_vm1, %v5434_v50  ;;  %v8360_v50 = vld [vmem:[%s8865_s8 + $0x50] ss:$8 sps:$4 sm:$0xff]  }
0x1e31   : > { %8019 = vmatprep.mubr.msk.bf16.mxu0 %vm8555_vm0, %v8554_v4  ;;  %7372 = vmatpush3.bf16.msra.mxu1 %v8372_v58 }
0x1eff   : > { %v5427_v1 = vpop.f32.mrb[92].mxu1 }
0x1f00   : > { %v8009_v2 = vpop.f32.mrb[93].mxu1  ;;  %v5428_v11 = vadd.f32 %v7025_v9, %v5427_v1  ;;  %v8380_v1 = vld [vmem:[%s8872_s9 + $0x28] sm:$0xff]  }
0x1f01   : > { %v5430_v12 = vpop.f32.mrb[94].mxu1 }
0x1f02   : > { %v8010_v5 = vpop.f32.mrb[95].mxu1  ;;  %v5431_v13 = vadd.f32 %v7025_v9, %v5430_v12  ;;  %v7045_v9 = vld [vmem:[%s1458_s16] ss:$0 sm:$0xff] }
0x1f03   : > { %v5476_v59 = vpop.f32.mrb[84].mxu0 }
0x1f04   : > { %v5482_v17 = vmul.f32 0.17677669, %v5476_v59  ;;  %v8015_v60 = vpop.f32.mrb[85].mxu0  ;;  %v5496_v14 = vpack.c.bf16 %v5431_v13, %v5428_v11  ;;  %v8373_v59 = vld [vmem:[%s8872_s9 + $0x50] sm:$0xff]  }
0x1f05   : > { %v5479_v61 = vpop.f32.mrb[86].mxu0  ;;  %7373 = vmatprep.subr.bf16.mxu1 %v8373_v59  ;;  %v8375_v60 = vld [vmem:[%s8872_s9 + $0x58] sm:$0xff]   ;;  %v8381_v13 = vld [vmem:[%s8872_s9 + $0x70] sm:$0xff]  }
0x1f06   : > { %v8016_v62 = vpop.f32.mrb[87].mxu0  ;;  %v5483_v63 = vsel %vm1473_vm5, %v5482_v17, 1e-09  ;;  %8018 = vmatpush3.bf16.msra.mxu0 %v5496_v14  ;;  %v8374_v17 = vld [vmem:[%s8872_s9 + $0x10] sm:$0xff]   ;;  %v8376_v61 = vld [vmem:[%s8872_s9 + $0x18] sm:$0xff]  }
0x1f07   : > { %v5484_v0 = vsel %vm3959_vm6, %v5483_v63, -inf  ;;  %8023 = vmatprep.subr.bf16.mxu0 %v8554_v4  ;;  %7374 = vmatpush3.bf16.msra.mxu1 %v8374_v17  ;;  %v8377_v62 = vld [vmem:[%s8872_s9 + $0x60] sm:$0xff]   ;;  %v8382_v14 = vld [vmem:[%s8872_s9 + $0x30] sm:$0xff]  }
0x1f08   : > { %5485 = vmax.xlane.f32.xlu0 %v5484_v0  ;;  %7375 = vmatprep.subr.bf16.mxu1 %v8375_v60  ;;  %v8379_v0 = vld [vmem:[%s8872_s9 + $0x68] sm:$0xff]  }
0x1f0b   : > { %7376 = vmatpush3.bf16.msra.mxu1 %v8376_v61 }
0x1f0c   : > { %7377 = vmatprep.subr.bf16.mxu1 %v8377_v62 }
0x1f95   : > { %v5486_v3 = vpop.xlane.xlu0 %5485 }
0x1f96   : > { %v5487_v6 = vsub.f32 %v5483_v63, %v5486_v3  ;;  %v8378_v63 = vld [vmem:[%s8872_s9 + $0x20] sm:$0xff]  }
0x1f97   : > { %7378 = vmatpush3.bf16.msra.mxu1 %v8378_v63 }
0x1f98   : > { %v5488_v7 = vmul.f32 1.442695, %v5487_v6  ;;  %7379 = vmatprep.subr.bf16.mxu1 %v8379_v0 }
0x1f9a   : > { %8417 = vpow2.f32 %v5488_v7 }
0x1f9b   : > { %7380 = vmatpush3.bf16.msra.mxu1 %v8380_v1 }
0x1f9c   : > { %7381 = vmatprep.subr.bf16.mxu1 %v8381_v13 }
0x1f9f   : > { %7382 = vmatpush3.bf16.msra.mxu1 %v8382_v14 }
0x1fa4   : > { %v8418_v32 = vpop.eup %8417 }
0x1fa5   : > { %v5490_v8 = vsel %vm3959_vm6, %v8418_v32, 0.0 }
0x1fa6   : > { %5491 = vadd.xlane.f32.xlu1 %v5490_v8 }
0x2033   : > { %v5492_v15 = vpop.xlane.xlu1 %5491 }
0x2034   : > { %8419 = vrcp.f32 %v5492_v15  ;;  %v8383_v15 = vld [vmem:[%s8872_s9 + $0x78] sm:$0xff]  }
0x2035   : > { %7383 = vmatprep.subr.bf16.mxu1 %v8383_v15 }
0x203e   : > { %v8420_v16 = vpop.eup %8419 }
0x203f   : > { %v5494_v20 = vmul.f32 %v8420_v16, %v8418_v32  ;;  %v7044_v32 = vld [vmem:[%s1455_s10] ss:$0 sm:$0xff]  ;;  %v8384_v16 = vld [vmem:[%s8872_s9 + $0x38] sm:$0xff]   ;;  %s9836_s9 = sld [smem:[#allocation41_spill]] }
0x2040   : > { %7384 = vmatpush3.bf16.msra.mxu1 %v8384_v16 }
0x2041   : > { %v5495_v22 = vpack.c.bf16 %v5494_v20, %v5494_v20  ;;  %v5657_v20 = vlaneseq }
0x2043   : > { %8020 = vmatmul.mubr.msk.bf16.vlgmr.msra.gmra.mrb[88].mxu0 %vm3959_vm6, %v5495_v22 }
0x2044   : > { %8024 = vmatpush3.bf16.msra.mxu0 %v8343_v21  ;;  %8027 = vmatprep.mubr.msk.bf16.mxu0 %vm8555_vm0, %v8554_v4  ;;  %v5658_v21 = vshrl.u32 %v5657_v20, 7 }
0x2045   : > { %8025 = vmatprep.subr.bf16.mxu0 %v8554_v4  ;;  %p7079_p1 = scmp.ne.s32.totalorder %s9836_s9, 1 }
0x2046   : > { %v5659_v22 = vsub.s32 0, %v5658_v21  ;;  %s9838_s7 = sld [smem:[#allocation36_spill]] (!%p7079_p1) }
0x2048   : > { %8026 = vmatpush3.bf16.msra.mxu0 %v8344_v23  ;;  %v5655_v23 = vld [vmem:[%s8869_s12] sm:$0x3]  ;;  %s9837_s12 = sld [smem:[#allocation35_spill]] (!%p7079_p1) }
0x2049   : > { %5747 = vmatprep.subr.bf16.mxu0 %v8347_v38 }
0x2116   : > { %v5534_v25 = vpop.f32.mrb[88].mxu0 }
0x2117   : > { %v5540_v26 = vpack.c.bf16 %v5534_v25, %v5534_v25  ;;  %v8021_v27 = vpop.f32.mrb[89].mxu0  ;;  %v5663_v25 = vsub.s32 1, %v5658_v21 }
0x2118   : > { %v5537_v28 = vpop.f32.mrb[90].mxu0 }
0x2119   : > { %v8022_v29 = vpop.f32.mrb[91].mxu0  ;;  %8028 = vmatmul.mubr.msk.bf16.vlgmr.msra.gmra.mrb[92].mxu0 %vm1838_vm1, %v5540_v26  ;;  %v5660_v26 = vrot.slane %v5655_v23, %v5659_v22  ;;  %v5664_v27 = vrot.slane %v5655_v23, %v5663_v25 }
0x211a   : > { %5748 = vmatpush1.bf16.msra.mxu0 %v8345_v37  ;;  %5779 = vmatprep.mubr.bf16.mxu0 %v8556_v54 }
0x211b   : > { %5749 = vmatprep.subr.bf16.mxu0 %v8350_v39 }
0x211e   : > { %5750 = vmatpush1.bf16.msra.mxu0 %v8348_v18 }
0x211f   : > { %5751 = vmatprep.subr.bf16.mxu0 %v8353_v40 }
0x21ec   : > { %v5595_v31 = vpop.f32.mrb[92].mxu0 }
0x21ed   : > { %v5601_v34 = vadd.f32 %v5595_v31, %v9549_v44  ;;  %v8029_v4 = vpop.f32.mrb[93].mxu0  ;;  %v8351_v44 = vld [vmem:[%s8865_s8 + $0x20] ss:$8 sps:$4 sm:$0xff]  }
0x21ee   : > { %v5598_v35 = vpop.f32.mrb[94].mxu0  ;;  %5752 = vmatpush1.bf16.msra.mxu0 %v8351_v44  ;;  %v7078_v44 = vld [vmem:[%s1440_s20] ss:$0 sm:$0xff] }
0x21ef   : > { %v5609_v36 = vadd.f32 %v7043_v19, %v5601_v34  ;;  %v8030_v30 = vpop.f32.mrb[95].mxu0  ;;  %5753 = vmatprep.subr.bf16.mxu0 %v8356_v45 }
0x21f1   : > { %v9589_v33 = vadd.f32 %v5609_v36, %v9242_v10 }
0x21f2   : > { %5754 = vmatpush1.bf16.msra.mxu0 %v8354_v46 }
0x21f3   : > { %5613 = vadd.xlane.f32.xlu0 %v9589_v33  ;;  %5755 = vmatprep.subr.bf16.mxu0 %v8359_v47 }
0x21f6   : > { %5756 = vmatpush1.bf16.msra.mxu0 %v8357_v48 }
0x21f7   : > { %5757 = vmatprep.subr.bf16.mxu0 %v8362_v49 }
0x21fa   : > { %5758 = vmatpush1.bf16.msra.mxu0 %v8360_v50 }
0x21fb   : > { %5759 = vmatprep.subr.bf16.mxu0 %v8365_v51 }
0x21fe   : > { %5760 = vmatpush1.bf16.msra.mxu0 %v8363_v24 }
0x21ff   : > { %5761 = vmatprep.subr.bf16.mxu0 %v8368_v52  ;;  %v7081_v52 = vld [vmem:[%s9838_s7] ss:$0 sm:$0xff] (!%p7079_p1) }
0x2202   : > { %5762 = vmatpush1.bf16.msra.mxu0 %v8366_v53 }
0x2280   : > { %v5614_v10 = vpop.xlane.xlu0 %5613 }
0x2281   : > { %v5615_v41 = vmul.f32 0.0078125, %v5614_v10 }
0x2283   : > { %v5616_v42 = vsub.f32 %v9589_v33, %v5615_v41 }
0x2285   : > { %v5617_v43 = vmul.f32 %v5616_v42, %v5616_v42 }
0x2287   : > { %5618 = vadd.xlane.f32.xlu1 %v5617_v43 }
0x2314   : > { %v5619_v2 = vpop.xlane.xlu1 %5618 }
0x2315   : > { %v5620_v3 = vmul.f32 0.0078125, %v5619_v2 }
0x2317   : > { %v5621_v6 = vadd.f32 1e-05, %v5620_v3 }
0x2319   : > { %8421 = vrsqrt.f32 %v5621_v6 }
0x2323   : > { %v8422_v7 = vpop.eup %8421 }
0x2324   : > { %v5623_v8 = vmul.f32 %v8422_v7, %v5616_v42 }
0x2326   : > { %v5630_v11 = vmul.f32 %v7044_v32, %v5623_v8 }
0x2328   : > { %v5637_v12 = vadd.f32 %v7045_v9, %v5630_v11 }
0x232a   : > { %v5638_v5 = vpack.c.bf16 %v5637_v12, %v5637_v12 }
0x232c   : > { %5780 = vmatmul.mubr.bf16.vlgmr.msra.gmra.mrb[96].mxu0 %v5638_v5 }
0x23ff   : > { %v5781_v28 = vpop.f32.mrb[96].mxu0 }
0x2400   : > { %v5782_v29 = vadd.f32 %v5781_v28, %v5660_v26  ;;  %v5783_v31 = vpop.f32.mrb[97].mxu0 }
0x2401   : > { %v5784_v19 = vadd.f32 %v5783_v31, %v5664_v27  ;;  %v5785_v34 = vpop.f32.mrb[98].mxu0 }
0x2402   : > { %v5788_v4 = vmax.f32 %v5782_v29, 0.0  ;;  %v5786_v35 = vpop.f32.mrb[99].mxu0 }
0x2403   : > { %v5789_v36 = vmax.f32 %v5784_v19, 0.0 }
0x2404   : > { %v5790_v37 = vpack.c.bf16 %v5788_v4, %v5788_v4 }
0x2405   : > { %v5791_v30 = vpack.c.bf16 %v5789_v36, %v5789_v36 }
0x2407   : > { %5952 = vmatprep.mubr.bf16.mxu1 %v5791_v30 }
0x2408   : > { %5953 = vmatmul.mubr.bf16.vlgmr.msra.gmra.mrb[96].mxu1 %v5790_v37 }
0x24db   : > { %v7385_v38 = vpop.f32.mrb[96].mxu1 }
0x24dc   : > { %v7386_v39 = vpop.f32.mrb[97].mxu1 }
0x24dd   : > { %v7387_v18 = vadd.f32 %v7386_v39, %v7385_v38  ;;  %v7388_v40 = vpop.f32.mrb[98].mxu1  ;;  %5973 = sbr.rel (%p7079_p1) target bundleno = 9755 (0x261b), region = 156 }
0x24de   : > { %v7389_v10 = vpop.f32.mrb[99].mxu1 }
0x24df   : > { %v5960_v41 = vadd.f32 %v7387_v18, %v9589_v33  ;;  %v7080_v33 = vld [vmem:[%s9837_s12] ss:$0 sm:$0xff] (!%p7079_p1) }
0x24e1   : > { %v5968_v42 = vadd.f32 %v7078_v44, %v5960_v41 }
0x24e3   : > { %5969 = vst [vmem:[#allocation2] sm:$0xff] %v5968_v42  ;;  %5976 = vadd.xlane.f32.xlu0 (!%p7079_p1), %v5968_v42 }
0x2570   : > { %v5977_v43 = vpop.xlane.xlu0 %5976 }
0x2571   : > { %v5978_v45 = vmul.f32 0.0078125, %v5977_v43 }
0x2573   : > { %v5979_v46 = vsub.f32 %v5968_v42, %v5978_v45 }
0x2575   : > { %v5980_v47 = vmul.f32 %v5979_v46, %v5979_v46 }
0x2577   : > { %5981 = vadd.xlane.f32.xlu0 %v5980_v47 }
0x2604   : > { %v5982_v48 = vpop.xlane.xlu0 %5981 }
0x2605   : > { %v5983_v49 = vmul.f32 0.0078125, %v5982_v48 }
0x2607   : > { %v5984_v50 = vadd.f32 1e-05, %v5983_v49 }
0x2609   : > { %8424 = vrsqrt.f32 %v5984_v50 }
0x2613   : > { %v8425_v51 = vpop.eup %8424 }
0x2614   : > { %v5986_v24 = vmul.f32 %v8425_v51, %v5979_v46 }
0x2616   : > { %v5993_v53 = vmul.f32 %v7080_v33, %v5986_v24 }
0x2618   : > { %v6000_v54 = vadd.f32 %v7081_v52, %v5993_v53 }
0x261a   : > { %6001 = vst [vmem:[%s1344_s26] sm:$0xff] %v6000_v54 }
0x261b PF: > { %s9839_s20 = sld [smem:[#allocation42_spill]]  ;;  %s9840_s10 = sld [smem:[#allocation37_spill]] }
0x261c   : > { %s9842_s16 = sld [smem:[#allocation39_spill]]  ;;  %s6016_s14 = sshll.u32 %s1344_s26, 4  ;;  %s6017_s14 = int_to_ptr.vmem [resolvable:$true] %s6016_s14 }
0x261d   : > { %s8426_s1 = scalar_lea.vmem %s6017_s14, 128  ;;  %s8557_s2 = smov [#allocation3]  }
0x261e   : > { %p8427_p2 = scmp.ne.s32.totalorder %s6017_s14, %s8426_s1  ;;  %s8430_s18 = sshll.u32 %s8557_s2, 4  ;;  %s8431_s18 = int_to_ptr.vmem [resolvable:$false] %s8430_s18 }
0x261f   : > { %s8432_s0 = scalar_lea.vmem %s8431_s18, 256  ;;  %p8433_p6 = scmp.lt.s32.totalorder %s6017_s14, %s8431_s18 }
0x2620   : > { %p8428_p4 = pnand %p8427_p2, %p8777_p3  ;;  %p8434_p7 = scmp.lt.s32.totalorder %s8432_s0, %s8426_s1 }
0x2621   : > { %s9841_s23 = smov %s9840_s10  ;;  %s7083_s17 = sshll.u32 %s9839_s20, 7 }
0x2622   : > { %s9643_s3 = scalar_lea.hbm %s9840_s10, %s7083_s17  ;;  %s9844_s19 = sand.u32 1, %s9842_s16  }
0x2623   : > { %s6003_s6 = scalar_lea.sflag [#allocation4], %s9844_s19  ;;  %p8429_p5 = pneg %p8428_p4 }
0x2624   : > { %p8435_p8 = por %p8434_p7, %p8433_p6 }
0x2626   : > { %p8436_p10 = pnand %p8435_p8, %p8429_p5 }
0x2628   : > { %8439 = shalt.err (!%p8436_p10)
}
0x2629   : > { %s8440_s22 = scalar_lea.hbm %s9643_s3, 128  ;;  %s8444_s26 = scalar_lea.hbm %s9841_s23, 256 }
0x262a   : > { %p8441_p11 = scmp.ne.s32.totalorder %s9643_s3, %s8440_s22  ;;  %p8445_p0 = scmp.lt.u32.totalorder %s9643_s3, %s9841_s23 }
0x262b   : > { %p8446_p1 = scmp.lt.u32.totalorder %s8444_s26, %s8440_s22  ;;  %p8448_p4 = scmp.lt.u32.totalorder %s8440_s22, %s9643_s3 }
0x262c   : > { %p8442_p12 = pnand %p8441_p11, %p8777_p3 }
0x262d   : > { %p8447_p2 = por %p8446_p1, %p8445_p0 }
0x262e   : > { %p8443_p13 = pneg %p8442_p12 }
0x262f   : > { %p8449_p6 = por %p8448_p4, %p8447_p2 }
0x2631   : > { %p8450_p5 = pnand %p8449_p6, %p8443_p13 }
0x2633   : > { %8453 = shalt.err (!%p8450_p5)
}
0x2634   : > { %8031 = dma.vmem_to_hbm [thread:$0]  (%p8777_p3), %s6017_s14, 128, %s9643_s3, %s6003_s6  }
0x2635 PF: > { %s9845_s15 = sld [smem:[#allocation45_spill]]  ;;  %s9846_s27 = sld [smem:[#allocation38_spill]] }
0x263b   : > { %p8037_p7 = scmp.ge.s32.totalorder %s9845_s15, 2  ;;  %s6028_s5 = sand.u32 1, %s9846_s27  }
0x263c   : > { %s6029_s24 = scalar_lea.sflag [#allocation4], %s6028_s5 }
0x263d   : > { %p8034_p8 = pnand %p8037_p7, %p8787_p9 }
0x263f   : > { %8487 = dma.done.wait (!%p8034_p8), %s6029_s24, 128  }
0x2640   : > { %8489 = vsyncadd (!%p8034_p8), %s6029_s24, 4294967168  ;;  %s78_s16 = sadd.s32 1, %s9845_s15   ;;  %s9848_s28 = sld [smem:[#allocation39_spill]] }
0x2641   : > { %p75_p10 = scmp.ge.s32.totalorder %s78_s16, 6   ;;  %s9849_s1 = sld [smem:[#allocation40_spill]] }
0x2642   : > { %s9850_s2 = sld [smem:[#allocation50_spill]]  ;;  %s9851_s7 = sld [smem:[#allocation43_spill]] }
0x2643   : > { %s9852_s10 = sld [smem:[#allocation44_spill]]  ;;  %s9853_s11 = sld [smem:[#allocation46_spill]] }
0x2644   : > { %s9854_s15 = sld [smem:[#allocation48_spill]]  ;;  %77 = sbr.rel (!%p75_p10) target bundleno = 80 (0x50), region = 346 }
0x264b   :  { %6034 = vsyncpa [#allocation4], 1 }
0x264c   :  { %6036 = vsyncpa [#allocation4 + $0x1], 1 }

</bundles_post_ra>
